<compile_context>
chip_gen: v5e
topology: v5e:2x2
jax: 0.10.0
libtpu: 0.0.40
codegen_flags: <defaults>
</compile_context>

<pallas_src>
import jax
import jax.numpy as jnp
from jax import lax
from jax.experimental import pallas as pl
from jax.experimental.pallas import tpu as pltpu

# ---------------- sizes (small, consistent with the module's forward) ----------------
B = 2          # batch
T = 16         # grapheme sequence length
V_G = 32       # grapheme vocab
E = 32         # grapheme embedding dim
H = 32         # encoder GRU hidden dim
A = 32         # attention dim
E_P = 32       # phoneme embedding dim
H_D = 32       # decoder GRU hidden dim
V_P = 16       # phoneme vocab
BOS = 0


def seq2seq_kernel(
    emb_char_ref,   # (B, T, E)    f32 — character embeddings
    e_in_ref,       # (B, E_P)     f32 — BOS phoneme embedding
    lens_ref,       # (B, 1)       i32 — absolute grapheme lengths
    w_ih_ref,       # (E, 3H)      encoder GRU input weights, gates packed [r|z|n]
    b_ih_ref,       # (1, 3H)
    w_hh_ref,       # (H, 3H)      encoder GRU hidden weights, packed
    b_hh_ref,       # (1, 3H)
    wa_enc_ref,     # (H, A)       attention: encoder projection
    va_ref,         # (1, A)       attention: score vector
    wd_ihe_ref,     # (E_P, 3H_D)  decoder GRU weights for phoneme-embedding input
    wd_ihc_ref,     # (H, 3H_D)    decoder GRU weights for attention-context input
    bd_ih_ref,      # (1, 3H_D)
    bd_hh_ref,      # (1, 3H_D)
    wl_ref,         # (H_D, V_P)   output linear
    bl_ref,         # (1, V_P)
    enc_out_ref,    # out: (B, T, H)
    p_seq_ref,      # out: (B, V_P) log-probs
    attn_ref,       # out: (B, T)   attention weights
):
    b_sz, t_len, e_dim = emb_char_ref.shape
    h_enc = wa_enc_ref.shape[0]
    h_dec = wl_ref.shape[0]

    def mm(a, b):
        return jnp.dot(a, b, preferred_element_type=jnp.float32)

    # ---- input-side GRU projections for ALL timesteps: one batched matmul ----
    emb_flat = emb_char_ref[...].reshape(b_sz * t_len, e_dim)          # (B*T, E)
    xg = (mm(emb_flat, w_ih_ref[...]) + b_ih_ref[...]).reshape(
        b_sz, t_len, 3 * h_enc)                                        # (B, T, 3H)

    w_hh = w_hh_ref[...]    # used every step — keep live across the recurrence
    b_hh = b_hh_ref[...]

    # ---- encoder GRU recurrence, fully unrolled (T static & small) ----
    # Per step: one fused (B,H)x(H,3H) matmul + gate nonlinearities; nothing else.
    h = jnp.zeros((b_sz, h_enc), jnp.float32)
    for t in range(t_len):
        hg = mm(h, w_hh) + b_hh                                        # (B, 3H)
        g = xg[:, t, :]                                                # (B, 3H)
        r = jax.nn.sigmoid(g[:, :h_enc] + hg[:, :h_enc])
        z = jax.nn.sigmoid(g[:, h_enc:2 * h_enc] + hg[:, h_enc:2 * h_enc])
        n = jnp.tanh(g[:, 2 * h_enc:] + r * hg[:, 2 * h_enc:])
        h = (1.0 - z) * n + z * h
        enc_out_ref[:, t, :] = h

    # ---- attention energies, batched over all timesteps (off the recurrence) ----
    # Initial decoder state is zero, so its attention projection is exactly zero
    # and omitted (mathematically identical to the reference module).
    enc_all = enc_out_ref[...]                                         # (B, T, H)
    e_att = jnp.tanh(mm(enc_all.reshape(b_sz * t_len, h_enc), wa_enc_ref[...]))
    e_att = e_att.reshape(b_sz, t_len, -1)                             # (B, T, A)
    scores = jnp.sum(e_att * va_ref[...], axis=-1)                     # (B, T)

    # ---- masked softmax over time ----
    lens = lens_ref[...]                                               # (B, 1) i32
    t_idx = lax.broadcasted_iota(jnp.int32, (b_sz, t_len), 1)
    scores = jnp.where(t_idx < lens, scores, -1e30)
    m = jnp.max(scores, axis=1, keepdims=True)
    e = jnp.exp(scores - m)
    attn_w = e * pl.reciprocal(jnp.sum(e, axis=1, keepdims=True), approx=False)
    attn_ref[...] = attn_w                                             # (B, T)

    # ---- attention context: single weighted reduction over T ----
    ctx = jnp.sum(attn_w[:, :, None] * enc_all, axis=1)                # (B, H)

    # ---- decoder GRU single BOS step ----
    # Initial decoder state is zero: hidden-side matmuls reduce to the hidden
    # bias, and h' = (1 - z) * n.
    gi = (mm(e_in_ref[...], wd_ihe_ref[...]) + mm(ctx, wd_ihc_ref[...])
          + bd_ih_ref[...])                                            # (B, 3H_D)
    gh = bd_hh_ref[...]                                                # (1, 3H_D)
    r = jax.nn.sigmoid(gi[:, :h_dec] + gh[:, :h_dec])
    z = jax.nn.sigmoid(gi[:, h_dec:2 * h_dec] + gh[:, h_dec:2 * h_dec])
    n = jnp.tanh(gi[:, 2 * h_dec:] + r * gh[:, 2 * h_dec:])
    h1 = (1.0 - z) * n                                                 # (B, H_D)

    # ---- output linear + log_softmax ----
    logits = mm(h1, wl_ref[...]) + bl_ref[...]                         # (B, V_P)
    mx = jnp.max(logits, axis=-1, keepdims=True)
    lse = mx + jnp.log(jnp.sum(jnp.exp(logits - mx), axis=-1, keepdims=True))
    p_seq_ref[...] = logits - lse


def make_params(key):
    ks = jax.random.split(key, 16)
    s = 0.1
    p = {
        "enc_emb": jax.random.normal(ks[0], (V_G, E), jnp.float32) * s,
        "dec_emb": jax.random.normal(ks[1], (V_P, E_P), jnp.float32) * s,
        "w_ih": jax.random.normal(ks[2], (3, E, H), jnp.float32) * s,
        "w_hh": jax.random.normal(ks[3], (3, H, H), jnp.float32) * s,
        "b_ih": jax.random.normal(ks[4], (3, 1, H), jnp.float32) * s,
        "b_hh": jax.random.normal(ks[5], (3, 1, H), jnp.float32) * s,
        "wa_enc": jax.random.normal(ks[6], (H, A), jnp.float32) * s,
        # wa_dec / wd_hh exist in the module but contribute exactly zero for the
        # single BOS step with a zero initial decoder state; not passed to kernel.
        "wa_dec": jax.random.normal(ks[7], (H_D, A), jnp.float32) * s,
        "va": jax.random.normal(ks[8], (A, 1), jnp.float32) * s,
        "wd_ihe": jax.random.normal(ks[9], (3, E_P, H_D), jnp.float32) * s,
        "wd_ihc": jax.random.normal(ks[10], (3, H, H_D), jnp.float32) * s,
        "wd_hh": jax.random.normal(ks[11], (3, H_D, H_D), jnp.float32) * s,
        "bd_ih": jax.random.normal(ks[12], (3, 1, H_D), jnp.float32) * s,
        "bd_hh": jax.random.normal(ks[13], (3, 1, H_D), jnp.float32) * s,
        "wl": jax.random.normal(ks[14], (H_D, V_P), jnp.float32) * s,
        "bl": jax.random.normal(ks[15], (1, V_P), jnp.float32) * s,
    }
    return p


def _pack3(w):
    """Pack per-gate [r, z, n] params (3, in, out) -> (in, 3*out) along lanes."""
    return jnp.concatenate([w[0], w[1], w[2]], axis=-1)


def attention_seq2seq_forward(grapheme_encoded, params, phn_encoded=None):
    """Mirrors AttentionSeq2Seq.forward: returns (p_seq, char_lens, encoder_out, w)."""
    chars, char_lens = grapheme_encoded          # chars: (B, T) int32, char_lens: (B,) relative
    b_sz, t_len = chars.shape

    # ----- glue (embedding gathers / dummy phonemes / length conversion) -----
    if phn_encoded is None:
        phn_bos = jnp.zeros((b_sz, 1), jnp.int32) + BOS   # get_dummy_phonemes
    else:
        phn_bos, _ = phn_encoded
    emb_char = jnp.take(params["enc_emb"], chars, axis=0)         # (B, T, E)
    e_in = jnp.take(params["dec_emb"], phn_bos[:, 0], axis=0)     # (B, E_P)
    lens_abs = jnp.round(char_lens * t_len).astype(jnp.int32).reshape(b_sz, 1)

    # Pack GRU gate weights along the output (lane) axis so each recurrent step
    # is a single lane-dense matmul. wa_dec / wd_hh omitted (zero contribution).
    weights = (
        _pack3(params["w_ih"]),              # (E, 3H)
        _pack3(params["b_ih"]),              # (1, 3H)
        _pack3(params["w_hh"]),              # (H, 3H)
        _pack3(params["b_hh"]),              # (1, 3H)
        params["wa_enc"],                    # (H, A)
        params["va"].T,                      # (1, A)
        _pack3(params["wd_ihe"]),            # (E_P, 3H_D)
        _pack3(params["wd_ihc"]),            # (H, 3H_D)
        _pack3(params["bd_ih"]),             # (1, 3H_D)
        _pack3(params["bd_hh"]),             # (1, 3H_D)
        params["wl"],                        # (H_D, V_P)
        params["bl"],                        # (1, V_P)
    )
    n_in = 3 + len(weights)

    out_shapes = (
        jax.ShapeDtypeStruct((b_sz, t_len, H), jnp.float32),   # encoder_out (B,T,H)
        jax.ShapeDtypeStruct((b_sz, V_P), jnp.float32),        # p_seq for the single BOS step
        jax.ShapeDtypeStruct((b_sz, t_len), jnp.float32),      # attention weights (B,T)
    )
    f = pl.pallas_call(
        seq2seq_kernel,
        out_shape=out_shapes,
        in_specs=[pl.BlockSpec(memory_space=pltpu.MemorySpace.VMEM)] * n_in,
        out_specs=tuple(pl.BlockSpec(memory_space=pltpu.MemorySpace.VMEM) for _ in range(3)),
    )
    encoder_out, p_seq_2d, attn_bt = f(emb_char, e_in, lens_abs, *weights)

    p_seq = p_seq_2d[:, None, :]                          # (B, 1, V_P) log-probs
    w = attn_bt[:, None, :]                               # (B, 1, T)
    return p_seq, char_lens, encoder_out, w


if __name__ == "__main__":
    key = jax.random.PRNGKey(0)
    k_par, k_chars = jax.random.split(key)
    params = make_params(k_par)

    chars = jax.random.randint(k_chars, (B, T), 1, V_G, dtype=jnp.int32)
    char_lens = jnp.array([1.0, 0.75], dtype=jnp.float32)   # relative lengths (speechbrain convention)

    # TODO(synk): use_word_emb / word_emb_enc branch not exercised (use_word_emb=False default).
    p_seq, out_lens, encoder_out, w = attention_seq2seq_forward((chars, char_lens), params)
    jax.block_until_ready((p_seq, out_lens, encoder_out, w))

    assert p_seq.shape == (B, 1, V_P)
    assert encoder_out.shape == (B, T, H)
    assert w.shape == (B, 1, T)
    assert bool(jnp.all(jnp.isfinite(p_seq)))
    # log_softmax rows must sum to 1 in prob space; masked attention sums to 1.
    assert bool(jnp.allclose(jnp.exp(p_seq).sum(-1), 1.0, atol=1e-4))
    assert bool(jnp.allclose(w.sum(-1), 1.0, atol=1e-4))
    print("KERNEL_OK")
</pallas_src>

<mosaic_0001>
module attributes {stable_mosaic.version = 11 : i64} {
  func.func @seq2seq_kernel(%arg0: memref<2x16x32xf32, #tpu.memory_space<vmem>>, %arg1: memref<2x32xf32, #tpu.memory_space<vmem>>, %arg2: memref<2x1xi32, #tpu.memory_space<vmem>>, %arg3: memref<32x96xf32, #tpu.memory_space<vmem>>, %arg4: memref<1x96xf32, #tpu.memory_space<vmem>>, %arg5: memref<32x96xf32, #tpu.memory_space<vmem>>, %arg6: memref<1x96xf32, #tpu.memory_space<vmem>>, %arg7: memref<32x32xf32, #tpu.memory_space<vmem>>, %arg8: memref<1x32xf32, #tpu.memory_space<vmem>>, %arg9: memref<32x96xf32, #tpu.memory_space<vmem>>, %arg10: memref<32x96xf32, #tpu.memory_space<vmem>>, %arg11: memref<1x96xf32, #tpu.memory_space<vmem>>, %arg12: memref<1x96xf32, #tpu.memory_space<vmem>>, %arg13: memref<32x16xf32, #tpu.memory_space<vmem>>, %arg14: memref<1x16xf32, #tpu.memory_space<vmem>>, %arg15: memref<2x16x32xf32, #tpu.memory_space<vmem>>, %arg16: memref<2x16xf32, #tpu.memory_space<vmem>>, %arg17: memref<2x16xf32, #tpu.memory_space<vmem>>) attributes {dimension_semantics = [], scalar_prefetch = 0 : i64, scratch_operands = 0 : i64, tpu.core_type = #tpu.core_type<tc>} {
    %c0 = arith.constant 0 : index
    %c0_0 = arith.constant 0 : index
    %c0_1 = arith.constant 0 : index
    %0 = vector.load %arg0[%c0, %c0_0, %c0_1] : memref<2x16x32xf32, #tpu.memory_space<vmem>>, vector<2x16x32xf32>
    %1 = vector.shape_cast %0 : vector<2x16x32xf32> to vector<32x32xf32>
    %c0_2 = arith.constant 0 : index
    %c0_3 = arith.constant 0 : index
    %2 = vector.load %arg3[%c0_2, %c0_3] : memref<32x96xf32, #tpu.memory_space<vmem>>, vector<32x96xf32>
    %cst = arith.constant dense<0.000000e+00> : vector<32x96xf32>
    %3 = tpu.matmul %1, %2, %cst {dimension_numbers = #tpu.dot_dimension_numbers<[1], [0], [0], [1], [0, 0, 1, 1], [], []>} : vector<32x32xf32>, vector<32x96xf32>, vector<32x96xf32> -> vector<32x96xf32>
    %c0_4 = arith.constant 0 : index
    %c0_5 = arith.constant 0 : index
    %4 = vector.load %arg4[%c0_4, %c0_5] : memref<1x96xf32, #tpu.memory_space<vmem>>, vector<1x96xf32>
    %5 = vector.broadcast %4 : vector<1x96xf32> to vector<32x96xf32>
    %6 = arith.addf %3, %5 : vector<32x96xf32>
    %7 = vector.shape_cast %6 : vector<32x96xf32> to vector<2x16x96xf32>
    %c0_6 = arith.constant 0 : index
    %c0_7 = arith.constant 0 : index
    %8 = vector.load %arg5[%c0_6, %c0_7] : memref<32x96xf32, #tpu.memory_space<vmem>>, vector<32x96xf32>
    %c0_8 = arith.constant 0 : index
    %c0_9 = arith.constant 0 : index
    %9 = vector.load %arg6[%c0_8, %c0_9] : memref<1x96xf32, #tpu.memory_space<vmem>>, vector<1x96xf32>
    %cst_10 = arith.constant 0.000000e+00 : f32
    %10 = vector.broadcast %cst_10 : f32 to vector<2x32xf32>
    %cst_11 = arith.constant dense<0.000000e+00> : vector<2x96xf32>
    %11 = tpu.matmul %10, %8, %cst_11 {dimension_numbers = #tpu.dot_dimension_numbers<[1], [0], [0], [1], [0, 0, 1, 1], [], []>} : vector<2x32xf32>, vector<32x96xf32>, vector<2x96xf32> -> vector<2x96xf32>
    %12 = vector.broadcast %9 : vector<1x96xf32> to vector<2x96xf32>
    %13 = arith.addf %11, %12 : vector<2x96xf32>
    %14 = vector.extract_strided_slice %7 {offsets = [0, 0, 0], sizes = [2, 1, 96], strides = [1, 1, 1]} : vector<2x16x96xf32> to vector<2x1x96xf32>
    %15 = vector.shape_cast %14 : vector<2x1x96xf32> to vector<2x96xf32>
    %16 = vector.extract_strided_slice %15 {offsets = [0, 0], sizes = [2, 32], strides = [1, 1]} : vector<2x96xf32> to vector<2x32xf32>
    %17 = vector.extract_strided_slice %13 {offsets = [0, 0], sizes = [2, 32], strides = [1, 1]} : vector<2x96xf32> to vector<2x32xf32>
    %18 = arith.addf %16, %17 : vector<2x32xf32>
    %19 = arith.negf %18 : vector<2x32xf32>
    %20 = math.exp %19 : vector<2x32xf32>
    %cst_12 = arith.constant 1.000000e+00 : f32
    %21 = vector.broadcast %cst_12 : f32 to vector<2x32xf32>
    %22 = arith.addf %21, %20 : vector<2x32xf32>
    %23 = arith.divf %21, %22 : vector<2x32xf32>
    %24 = vector.extract_strided_slice %15 {offsets = [0, 32], sizes = [2, 32], strides = [1, 1]} : vector<2x96xf32> to vector<2x32xf32>
    %25 = vector.extract_strided_slice %13 {offsets = [0, 32], sizes = [2, 32], strides = [1, 1]} : vector<2x96xf32> to vector<2x32xf32>
    %26 = arith.addf %24, %25 : vector<2x32xf32>
    %27 = arith.negf %26 : vector<2x32xf32>
    %28 = math.exp %27 : vector<2x32xf32>
    %cst_13 = arith.constant 1.000000e+00 : f32
    %29 = vector.broadcast %cst_13 : f32 to vector<2x32xf32>
    %30 = arith.addf %29, %28 : vector<2x32xf32>
    %31 = arith.divf %29, %30 : vector<2x32xf32>
    %32 = vector.extract_strided_slice %15 {offsets = [0, 64], sizes = [2, 32], strides = [1, 1]} : vector<2x96xf32> to vector<2x32xf32>
    %33 = vector.extract_strided_slice %13 {offsets = [0, 64], sizes = [2, 32], strides = [1, 1]} : vector<2x96xf32> to vector<2x32xf32>
    %34 = arith.mulf %23, %33 : vector<2x32xf32>
    %35 = arith.addf %32, %34 : vector<2x32xf32>
    %36 = math.tanh %35 : vector<2x32xf32>
    %cst_14 = arith.constant 1.000000e+00 : f32
    %37 = vector.broadcast %cst_14 : f32 to vector<2x32xf32>
    %38 = arith.subf %37, %31 : vector<2x32xf32>
    %39 = arith.mulf %38, %36 : vector<2x32xf32>
    %40 = arith.mulf %31, %10 : vector<2x32xf32>
    %41 = arith.addf %39, %40 : vector<2x32xf32>
    %c0_15 = arith.constant 0 : index
    %c0_16 = arith.constant 0 : index
    %c0_17 = arith.constant 0 : index
    %42 = vector.load %arg15[%c0_15, %c0_16, %c0_17] : memref<2x16x32xf32, #tpu.memory_space<vmem>>, vector<2x1x32xf32>
    %43 = vector.shape_cast %42 : vector<2x1x32xf32> to vector<2x32xf32>
    %44 = vector.shape_cast %41 : vector<2x32xf32> to vector<2x1x32xf32>
    tpu.vector_store %arg15[%c0_15, %c0_16, %c0_17], %44 {strides = array<i32>} : memref<2x16x32xf32, #tpu.memory_space<vmem>>, vector<2x1x32xf32>,
    %cst_18 = arith.constant dense<0.000000e+00> : vector<2x96xf32>
    %45 = tpu.matmul %41, %8, %cst_18 {dimension_numbers = #tpu.dot_dimension_numbers<[1], [0], [0], [1], [0, 0, 1, 1], [], []>} : vector<2x32xf32>, vector<32x96xf32>, vector<2x96xf32> -> vector<2x96xf32>
    %46 = vector.broadcast %9 : vector<1x96xf32> to vector<2x96xf32>
    %47 = arith.addf %45, %46 : vector<2x96xf32>
    %48 = vector.extract_strided_slice %7 {offsets = [0, 1, 0], sizes = [2, 1, 96], strides = [1, 1, 1]} : vector<2x16x96xf32> to vector<2x1x96xf32>
    %49 = vector.shape_cast %48 : vector<2x1x96xf32> to vector<2x96xf32>
    %50 = vector.extract_strided_slice %49 {offsets = [0, 0], sizes = [2, 32], strides = [1, 1]} : vector<2x96xf32> to vector<2x32xf32>
    %51 = vector.extract_strided_slice %47 {offsets = [0, 0], sizes = [2, 32], strides = [1, 1]} : vector<2x96xf32> to vector<2x32xf32>
    %52 = arith.addf %50, %51 : vector<2x32xf32>
    %53 = arith.negf %52 : vector<2x32xf32>
    %54 = math.exp %53 : vector<2x32xf32>
    %cst_19 = arith.constant 1.000000e+00 : f32
    %55 = vector.broadcast %cst_19 : f32 to vector<2x32xf32>
    %56 = arith.addf %55, %54 : vector<2x32xf32>
    %57 = arith.divf %55, %56 : vector<2x32xf32>
    %58 = vector.extract_strided_slice %49 {offsets = [0, 32], sizes = [2, 32], strides = [1, 1]} : vector<2x96xf32> to vector<2x32xf32>
    %59 = vector.extract_strided_slice %47 {offsets = [0, 32], sizes = [2, 32], strides = [1, 1]} : vector<2x96xf32> to vector<2x32xf32>
    %60 = arith.addf %58, %59 : vector<2x32xf32>
    %61 = arith.negf %60 : vector<2x32xf32>
    %62 = math.exp %61 : vector<2x32xf32>
    %cst_20 = arith.constant 1.000000e+00 : f32
    %63 = vector.broadcast %cst_20 : f32 to vector<2x32xf32>
    %64 = arith.addf %63, %62 : vector<2x32xf32>
    %65 = arith.divf %63, %64 : vector<2x32xf32>
    %66 = vector.extract_strided_slice %49 {offsets = [0, 64], sizes = [2, 32], strides = [1, 1]} : vector<2x96xf32> to vector<2x32xf32>
    %67 = vector.extract_strided_slice %47 {offsets = [0, 64], sizes = [2, 32], strides = [1, 1]} : vector<2x96xf32> to vector<2x32xf32>
    %68 = arith.mulf %57, %67 : vector<2x32xf32>
    %69 = arith.addf %66, %68 : vector<2x32xf32>
    %70 = math.tanh %69 : vector<2x32xf32>
    %cst_21 = arith.constant 1.000000e+00 : f32
    %71 = vector.broadcast %cst_21 : f32 to vector<2x32xf32>
    %72 = arith.subf %71, %65 : vector<2x32xf32>
    %73 = arith.mulf %72, %70 : vector<2x32xf32>
    %74 = arith.mulf %65, %41 : vector<2x32xf32>
    %75 = arith.addf %73, %74 : vector<2x32xf32>
    %c0_22 = arith.constant 0 : index
    %c1 = arith.constant 1 : index
    %c0_23 = arith.constant 0 : index
    %76 = vector.load %arg15[%c0_22, %c1, %c0_23] : memref<2x16x32xf32, #tpu.memory_space<vmem>>, vector<2x1x32xf32>
    %77 = vector.shape_cast %76 : vector<2x1x32xf32> to vector<2x32xf32>
    %78 = vector.shape_cast %75 : vector<2x32xf32> to vector<2x1x32xf32>
    tpu.vector_store %arg15[%c0_22, %c1, %c0_23], %78 {strides = array<i32>} : memref<2x16x32xf32, #tpu.memory_space<vmem>>, vector<2x1x32xf32>,
    %cst_24 = arith.constant dense<0.000000e+00> : vector<2x96xf32>
    %79 = tpu.matmul %75, %8, %cst_24 {dimension_numbers = #tpu.dot_dimension_numbers<[1], [0], [0], [1], [0, 0, 1, 1], [], []>} : vector<2x32xf32>, vector<32x96xf32>, vector<2x96xf32> -> vector<2x96xf32>
    %80 = vector.broadcast %9 : vector<1x96xf32> to vector<2x96xf32>
    %81 = arith.addf %79, %80 : vector<2x96xf32>
    %82 = vector.extract_strided_slice %7 {offsets = [0, 2, 0], sizes = [2, 1, 96], strides = [1, 1, 1]} : vector<2x16x96xf32> to vector<2x1x96xf32>
    %83 = vector.shape_cast %82 : vector<2x1x96xf32> to vector<2x96xf32>
    %84 = vector.extract_strided_slice %83 {offsets = [0, 0], sizes = [2, 32], strides = [1, 1]} : vector<2x96xf32> to vector<2x32xf32>
    %85 = vector.extract_strided_slice %81 {offsets = [0, 0], sizes = [2, 32], strides = [1, 1]} : vector<2x96xf32> to vector<2x32xf32>
    %86 = arith.addf %84, %85 : vector<2x32xf32>
    %87 = arith.negf %86 : vector<2x32xf32>
    %88 = math.exp %87 : vector<2x32xf32>
    %cst_25 = arith.constant 1.000000e+00 : f32
    %89 = vector.broadcast %cst_25 : f32 to vector<2x32xf32>
    %90 = arith.addf %89, %88 : vector<2x32xf32>
    %91 = arith.divf %89, %90 : vector<2x32xf32>
    %92 = vector.extract_strided_slice %83 {offsets = [0, 32], sizes = [2, 32], strides = [1, 1]} : vector<2x96xf32> to vector<2x32xf32>
    %93 = vector.extract_strided_slice %81 {offsets = [0, 32], sizes = [2, 32], strides = [1, 1]} : vector<2x96xf32> to vector<2x32xf32>
    %94 = arith.addf %92, %93 : vector<2x32xf32>
    %95 = arith.negf %94 : vector<2x32xf32>
    %96 = math.exp %95 : vector<2x32xf32>
    %cst_26 = arith.constant 1.000000e+00 : f32
    %97 = vector.broadcast %cst_26 : f32 to vector<2x32xf32>
    %98 = arith.addf %97, %96 : vector<2x32xf32>
    %99 = arith.divf %97, %98 : vector<2x32xf32>
    %100 = vector.extract_strided_slice %83 {offsets = [0, 64], sizes = [2, 32], strides = [1, 1]} : vector<2x96xf32> to vector<2x32xf32>
    %101 = vector.extract_strided_slice %81 {offsets = [0, 64], sizes = [2, 32], strides = [1, 1]} : vector<2x96xf32> to vector<2x32xf32>
    %102 = arith.mulf %91, %101 : vector<2x32xf32>
    %103 = arith.addf %100, %102 : vector<2x32xf32>
    %104 = math.tanh %103 : vector<2x32xf32>
    %cst_27 = arith.constant 1.000000e+00 : f32
    %105 = vector.broadcast %cst_27 : f32 to vector<2x32xf32>
    %106 = arith.subf %105, %99 : vector<2x32xf32>
    %107 = arith.mulf %106, %104 : vector<2x32xf32>
    %108 = arith.mulf %99, %75 : vector<2x32xf32>
    %109 = arith.addf %107, %108 : vector<2x32xf32>
    %c0_28 = arith.constant 0 : index
    %c2 = arith.constant 2 : index
    %c0_29 = arith.constant 0 : index
    %110 = vector.load %arg15[%c0_28, %c2, %c0_29] : memref<2x16x32xf32, #tpu.memory_space<vmem>>, vector<2x1x32xf32>
    %111 = vector.shape_cast %110 : vector<2x1x32xf32> to vector<2x32xf32>
    %112 = vector.shape_cast %109 : vector<2x32xf32> to vector<2x1x32xf32>
    tpu.vector_store %arg15[%c0_28, %c2, %c0_29], %112 {strides = array<i32>} : memref<2x16x32xf32, #tpu.memory_space<vmem>>, vector<2x1x32xf32>,
    %cst_30 = arith.constant dense<0.000000e+00> : vector<2x96xf32>
    %113 = tpu.matmul %109, %8, %cst_30 {dimension_numbers = #tpu.dot_dimension_numbers<[1], [0], [0], [1], [0, 0, 1, 1], [], []>} : vector<2x32xf32>, vector<32x96xf32>, vector<2x96xf32> -> vector<2x96xf32>
    %114 = vector.broadcast %9 : vector<1x96xf32> to vector<2x96xf32>
    %115 = arith.addf %113, %114 : vector<2x96xf32>
    %116 = vector.extract_strided_slice %7 {offsets = [0, 3, 0], sizes = [2, 1, 96], strides = [1, 1, 1]} : vector<2x16x96xf32> to vector<2x1x96xf32>
    %117 = vector.shape_cast %116 : vector<2x1x96xf32> to vector<2x96xf32>
    %118 = vector.extract_strided_slice %117 {offsets = [0, 0], sizes = [2, 32], strides = [1, 1]} : vector<2x96xf32> to vector<2x32xf32>
    %119 = vector.extract_strided_slice %115 {offsets = [0, 0], sizes = [2, 32], strides = [1, 1]} : vector<2x96xf32> to vector<2x32xf32>
    %120 = arith.addf %118, %119 : vector<2x32xf32>
    %121 = arith.negf %120 : vector<2x32xf32>
    %122 = math.exp %121 : vector<2x32xf32>
    %cst_31 = arith.constant 1.000000e+00 : f32
    %123 = vector.broadcast %cst_31 : f32 to vector<2x32xf32>
    %124 = arith.addf %123, %122 : vector<2x32xf32>
    %125 = arith.divf %123, %124 : vector<2x32xf32>
    %126 = vector.extract_strided_slice %117 {offsets = [0, 32], sizes = [2, 32], strides = [1, 1]} : vector<2x96xf32> to vector<2x32xf32>
    %127 = vector.extract_strided_slice %115 {offsets = [0, 32], sizes = [2, 32], strides = [1, 1]} : vector<2x96xf32> to vector<2x32xf32>
    %128 = arith.addf %126, %127 : vector<2x32xf32>
    %129 = arith.negf %128 : vector<2x32xf32>
    %130 = math.exp %129 : vector<2x32xf32>
    %cst_32 = arith.constant 1.000000e+00 : f32
    %131 = vector.broadcast %cst_32 : f32 to vector<2x32xf32>
    %132 = arith.addf %131, %130 : vector<2x32xf32>
    %133 = arith.divf %131, %132 : vector<2x32xf32>
    %134 = vector.extract_strided_slice %117 {offsets = [0, 64], sizes = [2, 32], strides = [1, 1]} : vector<2x96xf32> to vector<2x32xf32>
    %135 = vector.extract_strided_slice %115 {offsets = [0, 64], sizes = [2, 32], strides = [1, 1]} : vector<2x96xf32> to vector<2x32xf32>
    %136 = arith.mulf %125, %135 : vector<2x32xf32>
    %137 = arith.addf %134, %136 : vector<2x32xf32>
    %138 = math.tanh %137 : vector<2x32xf32>
    %cst_33 = arith.constant 1.000000e+00 : f32
    %139 = vector.broadcast %cst_33 : f32 to vector<2x32xf32>
    %140 = arith.subf %139, %133 : vector<2x32xf32>
    %141 = arith.mulf %140, %138 : vector<2x32xf32>
    %142 = arith.mulf %133, %109 : vector<2x32xf32>
    %143 = arith.addf %141, %142 : vector<2x32xf32>
    %c0_34 = arith.constant 0 : index
    %c3 = arith.constant 3 : index
    %c0_35 = arith.constant 0 : index
    %144 = vector.load %arg15[%c0_34, %c3, %c0_35] : memref<2x16x32xf32, #tpu.memory_space<vmem>>, vector<2x1x32xf32>
    %145 = vector.shape_cast %144 : vector<2x1x32xf32> to vector<2x32xf32>
    %146 = vector.shape_cast %143 : vector<2x32xf32> to vector<2x1x32xf32>
    tpu.vector_store %arg15[%c0_34, %c3, %c0_35], %146 {strides = array<i32>} : memref<2x16x32xf32, #tpu.memory_space<vmem>>, vector<2x1x32xf32>,
    %cst_36 = arith.constant dense<0.000000e+00> : vector<2x96xf32>
    %147 = tpu.matmul %143, %8, %cst_36 {dimension_numbers = #tpu.dot_dimension_numbers<[1], [0], [0], [1], [0, 0, 1, 1], [], []>} : vector<2x32xf32>, vector<32x96xf32>, vector<2x96xf32> -> vector<2x96xf32>
    %148 = vector.broadcast %9 : vector<1x96xf32> to vector<2x96xf32>
    %149 = arith.addf %147, %148 : vector<2x96xf32>
    %150 = vector.extract_strided_slice %7 {offsets = [0, 4, 0], sizes = [2, 1, 96], strides = [1, 1, 1]} : vector<2x16x96xf32> to vector<2x1x96xf32>
    %151 = vector.shape_cast %150 : vector<2x1x96xf32> to vector<2x96xf32>
    %152 = vector.extract_strided_slice %151 {offsets = [0, 0], sizes = [2, 32], strides = [1, 1]} : vector<2x96xf32> to vector<2x32xf32>
    %153 = vector.extract_strided_slice %149 {offsets = [0, 0], sizes = [2, 32], strides = [1, 1]} : vector<2x96xf32> to vector<2x32xf32>
    %154 = arith.addf %152, %153 : vector<2x32xf32>
    %155 = arith.negf %154 : vector<2x32xf32>
    %156 = math.exp %155 : vector<2x32xf32>
    %cst_37 = arith.constant 1.000000e+00 : f32
    %157 = vector.broadcast %cst_37 : f32 to vector<2x32xf32>
    %158 = arith.addf %157, %156 : vector<2x32xf32>
    %159 = arith.divf %157, %158 : vector<2x32xf32>
    %160 = vector.extract_strided_slice %151 {offsets = [0, 32], sizes = [2, 32], strides = [1, 1]} : vector<2x96xf32> to vector<2x32xf32>
    %161 = vector.extract_strided_slice %149 {offsets = [0, 32], sizes = [2, 32], strides = [1, 1]} : vector<2x96xf32> to vector<2x32xf32>
    %162 = arith.addf %160, %161 : vector<2x32xf32>
    %163 = arith.negf %162 : vector<2x32xf32>
    %164 = math.exp %163 : vector<2x32xf32>
    %cst_38 = arith.constant 1.000000e+00 : f32
    %165 = vector.broadcast %cst_38 : f32 to vector<2x32xf32>
    %166 = arith.addf %165, %164 : vector<2x32xf32>
    %167 = arith.divf %165, %166 : vector<2x32xf32>
    %168 = vector.extract_strided_slice %151 {offsets = [0, 64], sizes = [2, 32], strides = [1, 1]} : vector<2x96xf32> to vector<2x32xf32>
    %169 = vector.extract_strided_slice %149 {offsets = [0, 64], sizes = [2, 32], strides = [1, 1]} : vector<2x96xf32> to vector<2x32xf32>
    %170 = arith.mulf %159, %169 : vector<2x32xf32>
    %171 = arith.addf %168, %170 : vector<2x32xf32>
    %172 = math.tanh %171 : vector<2x32xf32>
    %cst_39 = arith.constant 1.000000e+00 : f32
    %173 = vector.broadcast %cst_39 : f32 to vector<2x32xf32>
    %174 = arith.subf %173, %167 : vector<2x32xf32>
    %175 = arith.mulf %174, %172 : vector<2x32xf32>
    %176 = arith.mulf %167, %143 : vector<2x32xf32>
    %177 = arith.addf %175, %176 : vector<2x32xf32>
    %c0_40 = arith.constant 0 : index
    %c4 = arith.constant 4 : index
    %c0_41 = arith.constant 0 : index
    %178 = vector.load %arg15[%c0_40, %c4, %c0_41] : memref<2x16x32xf32, #tpu.memory_space<vmem>>, vector<2x1x32xf32>
    %179 = vector.shape_cast %178 : vector<2x1x32xf32> to vector<2x32xf32>
    %180 = vector.shape_cast %177 : vector<2x32xf32> to vector<2x1x32xf32>
    tpu.vector_store %arg15[%c0_40, %c4, %c0_41], %180 {strides = array<i32>} : memref<2x16x32xf32, #tpu.memory_space<vmem>>, vector<2x1x32xf32>,
    %cst_42 = arith.constant dense<0.000000e+00> : vector<2x96xf32>
    %181 = tpu.matmul %177, %8, %cst_42 {dimension_numbers = #tpu.dot_dimension_numbers<[1], [0], [0], [1], [0, 0, 1, 1], [], []>} : vector<2x32xf32>, vector<32x96xf32>, vector<2x96xf32> -> vector<2x96xf32>
    %182 = vector.broadcast %9 : vector<1x96xf32> to vector<2x96xf32>
    %183 = arith.addf %181, %182 : vector<2x96xf32>
    %184 = vector.extract_strided_slice %7 {offsets = [0, 5, 0], sizes = [2, 1, 96], strides = [1, 1, 1]} : vector<2x16x96xf32> to vector<2x1x96xf32>
    %185 = vector.shape_cast %184 : vector<2x1x96xf32> to vector<2x96xf32>
    %186 = vector.extract_strided_slice %185 {offsets = [0, 0], sizes = [2, 32], strides = [1, 1]} : vector<2x96xf32> to vector<2x32xf32>
    %187 = vector.extract_strided_slice %183 {offsets = [0, 0], sizes = [2, 32], strides = [1, 1]} : vector<2x96xf32> to vector<2x32xf32>
    %188 = arith.addf %186, %187 : vector<2x32xf32>
    %189 = arith.negf %188 : vector<2x32xf32>
    %190 = math.exp %189 : vector<2x32xf32>
    %cst_43 = arith.constant 1.000000e+00 : f32
    %191 = vector.broadcast %cst_43 : f32 to vector<2x32xf32>
    %192 = arith.addf %191, %190 : vector<2x32xf32>
    %193 = arith.divf %191, %192 : vector<2x32xf32>
    %194 = vector.extract_strided_slice %185 {offsets = [0, 32], sizes = [2, 32], strides = [1, 1]} : vector<2x96xf32> to vector<2x32xf32>
    %195 = vector.extract_strided_slice %183 {offsets = [0, 32], sizes = [2, 32], strides = [1, 1]} : vector<2x96xf32> to vector<2x32xf32>
    %196 = arith.addf %194, %195 : vector<2x32xf32>
    %197 = arith.negf %196 : vector<2x32xf32>
    %198 = math.exp %197 : vector<2x32xf32>
    %cst_44 = arith.constant 1.000000e+00 : f32
    %199 = vector.broadcast %cst_44 : f32 to vector<2x32xf32>
    %200 = arith.addf %199, %198 : vector<2x32xf32>
    %201 = arith.divf %199, %200 : vector<2x32xf32>
    %202 = vector.extract_strided_slice %185 {offsets = [0, 64], sizes = [2, 32], strides = [1, 1]} : vector<2x96xf32> to vector<2x32xf32>
    %203 = vector.extract_strided_slice %183 {offsets = [0, 64], sizes = [2, 32], strides = [1, 1]} : vector<2x96xf32> to vector<2x32xf32>
    %204 = arith.mulf %193, %203 : vector<2x32xf32>
    %205 = arith.addf %202, %204 : vector<2x32xf32>
    %206 = math.tanh %205 : vector<2x32xf32>
    %cst_45 = arith.constant 1.000000e+00 : f32
    %207 = vector.broadcast %cst_45 : f32 to vector<2x32xf32>
    %208 = arith.subf %207, %201 : vector<2x32xf32>
    %209 = arith.mulf %208, %206 : vector<2x32xf32>
    %210 = arith.mulf %201, %177 : vector<2x32xf32>
    %211 = arith.addf %209, %210 : vector<2x32xf32>
    %c0_46 = arith.constant 0 : index
    %c5 = arith.constant 5 : index
    %c0_47 = arith.constant 0 : index
    %212 = vector.load %arg15[%c0_46, %c5, %c0_47] : memref<2x16x32xf32, #tpu.memory_space<vmem>>, vector<2x1x32xf32>
    %213 = vector.shape_cast %212 : vector<2x1x32xf32> to vector<2x32xf32>
    %214 = vector.shape_cast %211 : vector<2x32xf32> to vector<2x1x32xf32>
    tpu.vector_store %arg15[%c0_46, %c5, %c0_47], %214 {strides = array<i32>} : memref<2x16x32xf32, #tpu.memory_space<vmem>>, vector<2x1x32xf32>,
    %cst_48 = arith.constant dense<0.000000e+00> : vector<2x96xf32>
    %215 = tpu.matmul %211, %8, %cst_48 {dimension_numbers = #tpu.dot_dimension_numbers<[1], [0], [0], [1], [0, 0, 1, 1], [], []>} : vector<2x32xf32>, vector<32x96xf32>, vector<2x96xf32> -> vector<2x96xf32>
    %216 = vector.broadcast %9 : vector<1x96xf32> to vector<2x96xf32>
    %217 = arith.addf %215, %216 : vector<2x96xf32>
    %218 = vector.extract_strided_slice %7 {offsets = [0, 6, 0], sizes = [2, 1, 96], strides = [1, 1, 1]} : vector<2x16x96xf32> to vector<2x1x96xf32>
    %219 = vector.shape_cast %218 : vector<2x1x96xf32> to vector<2x96xf32>
    %220 = vector.extract_strided_slice %219 {offsets = [0, 0], sizes = [2, 32], strides = [1, 1]} : vector<2x96xf32> to vector<2x32xf32>
    %221 = vector.extract_strided_slice %217 {offsets = [0, 0], sizes = [2, 32], strides = [1, 1]} : vector<2x96xf32> to vector<2x32xf32>
    %222 = arith.addf %220, %221 : vector<2x32xf32>
    %223 = arith.negf %222 : vector<2x32xf32>
    %224 = math.exp %223 : vector<2x32xf32>
    %cst_49 = arith.constant 1.000000e+00 : f32
    %225 = vector.broadcast %cst_49 : f32 to vector<2x32xf32>
    %226 = arith.addf %225, %224 : vector<2x32xf32>
    %227 = arith.divf %225, %226 : vector<2x32xf32>
    %228 = vector.extract_strided_slice %219 {offsets = [0, 32], sizes = [2, 32], strides = [1, 1]} : vector<2x96xf32> to vector<2x32xf32>
    %229 = vector.extract_strided_slice %217 {offsets = [0, 32], sizes = [2, 32], strides = [1, 1]} : vector<2x96xf32> to vector<2x32xf32>
    %230 = arith.addf %228, %229 : vector<2x32xf32>
    %231 = arith.negf %230 : vector<2x32xf32>
    %232 = math.exp %231 : vector<2x32xf32>
    %cst_50 = arith.constant 1.000000e+00 : f32
    %233 = vector.broadcast %cst_50 : f32 to vector<2x32xf32>
    %234 = arith.addf %233, %232 : vector<2x32xf32>
    %235 = arith.divf %233, %234 : vector<2x32xf32>
    %236 = vector.extract_strided_slice %219 {offsets = [0, 64], sizes = [2, 32], strides = [1, 1]} : vector<2x96xf32> to vector<2x32xf32>
    %237 = vector.extract_strided_slice %217 {offsets = [0, 64], sizes = [2, 32], strides = [1, 1]} : vector<2x96xf32> to vector<2x32xf32>
    %238 = arith.mulf %227, %237 : vector<2x32xf32>
    %239 = arith.addf %236, %238 : vector<2x32xf32>
    %240 = math.tanh %239 : vector<2x32xf32>
    %cst_51 = arith.constant 1.000000e+00 : f32
    %241 = vector.broadcast %cst_51 : f32 to vector<2x32xf32>
    %242 = arith.subf %241, %235 : vector<2x32xf32>
    %243 = arith.mulf %242, %240 : vector<2x32xf32>
    %244 = arith.mulf %235, %211 : vector<2x32xf32>
    %245 = arith.addf %243, %244 : vector<2x32xf32>
    %c0_52 = arith.constant 0 : index
    %c6 = arith.constant 6 : index
    %c0_53 = arith.constant 0 : index
    %246 = vector.load %arg15[%c0_52, %c6, %c0_53] : memref<2x16x32xf32, #tpu.memory_space<vmem>>, vector<2x1x32xf32>
    %247 = vector.shape_cast %246 : vector<2x1x32xf32> to vector<2x32xf32>
    %248 = vector.shape_cast %245 : vector<2x32xf32> to vector<2x1x32xf32>
    tpu.vector_store %arg15[%c0_52, %c6, %c0_53], %248 {strides = array<i32>} : memref<2x16x32xf32, #tpu.memory_space<vmem>>, vector<2x1x32xf32>,
    %cst_54 = arith.constant dense<0.000000e+00> : vector<2x96xf32>
    %249 = tpu.matmul %245, %8, %cst_54 {dimension_numbers = #tpu.dot_dimension_numbers<[1], [0], [0], [1], [0, 0, 1, 1], [], []>} : vector<2x32xf32>, vector<32x96xf32>, vector<2x96xf32> -> vector<2x96xf32>
    %250 = vector.broadcast %9 : vector<1x96xf32> to vector<2x96xf32>
    %251 = arith.addf %249, %250 : vector<2x96xf32>
    %252 = vector.extract_strided_slice %7 {offsets = [0, 7, 0], sizes = [2, 1, 96], strides = [1, 1, 1]} : vector<2x16x96xf32> to vector<2x1x96xf32>
    %253 = vector.shape_cast %252 : vector<2x1x96xf32> to vector<2x96xf32>
    %254 = vector.extract_strided_slice %253 {offsets = [0, 0], sizes = [2, 32], strides = [1, 1]} : vector<2x96xf32> to vector<2x32xf32>
    %255 = vector.extract_strided_slice %251 {offsets = [0, 0], sizes = [2, 32], strides = [1, 1]} : vector<2x96xf32> to vector<2x32xf32>
    %256 = arith.addf %254, %255 : vector<2x32xf32>
    %257 = arith.negf %256 : vector<2x32xf32>
    %258 = math.exp %257 : vector<2x32xf32>
    %cst_55 = arith.constant 1.000000e+00 : f32
    %259 = vector.broadcast %cst_55 : f32 to vector<2x32xf32>
    %260 = arith.addf %259, %258 : vector<2x32xf32>
    %261 = arith.divf %259, %260 : vector<2x32xf32>
    %262 = vector.extract_strided_slice %253 {offsets = [0, 32], sizes = [2, 32], strides = [1, 1]} : vector<2x96xf32> to vector<2x32xf32>
    %263 = vector.extract_strided_slice %251 {offsets = [0, 32], sizes = [2, 32], strides = [1, 1]} : vector<2x96xf32> to vector<2x32xf32>
    %264 = arith.addf %262, %263 : vector<2x32xf32>
    %265 = arith.negf %264 : vector<2x32xf32>
    %266 = math.exp %265 : vector<2x32xf32>
    %cst_56 = arith.constant 1.000000e+00 : f32
    %267 = vector.broadcast %cst_56 : f32 to vector<2x32xf32>
    %268 = arith.addf %267, %266 : vector<2x32xf32>
    %269 = arith.divf %267, %268 : vector<2x32xf32>
    %270 = vector.extract_strided_slice %253 {offsets = [0, 64], sizes = [2, 32], strides = [1, 1]} : vector<2x96xf32> to vector<2x32xf32>
    %271 = vector.extract_strided_slice %251 {offsets = [0, 64], sizes = [2, 32], strides = [1, 1]} : vector<2x96xf32> to vector<2x32xf32>
    %272 = arith.mulf %261, %271 : vector<2x32xf32>
    %273 = arith.addf %270, %272 : vector<2x32xf32>
    %274 = math.tanh %273 : vector<2x32xf32>
    %cst_57 = arith.constant 1.000000e+00 : f32
    %275 = vector.broadcast %cst_57 : f32 to vector<2x32xf32>
    %276 = arith.subf %275, %269 : vector<2x32xf32>
    %277 = arith.mulf %276, %274 : vector<2x32xf32>
    %278 = arith.mulf %269, %245 : vector<2x32xf32>
    %279 = arith.addf %277, %278 : vector<2x32xf32>
    %c0_58 = arith.constant 0 : index
    %c7 = arith.constant 7 : index
    %c0_59 = arith.constant 0 : index
    %280 = vector.load %arg15[%c0_58, %c7, %c0_59] : memref<2x16x32xf32, #tpu.memory_space<vmem>>, vector<2x1x32xf32>
    %281 = vector.shape_cast %280 : vector<2x1x32xf32> to vector<2x32xf32>
    %282 = vector.shape_cast %279 : vector<2x32xf32> to vector<2x1x32xf32>
    tpu.vector_store %arg15[%c0_58, %c7, %c0_59], %282 {strides = array<i32>} : memref<2x16x32xf32, #tpu.memory_space<vmem>>, vector<2x1x32xf32>,
    %cst_60 = arith.constant dense<0.000000e+00> : vector<2x96xf32>
    %283 = tpu.matmul %279, %8, %cst_60 {dimension_numbers = #tpu.dot_dimension_numbers<[1], [0], [0], [1], [0, 0, 1, 1], [], []>} : vector<2x32xf32>, vector<32x96xf32>, vector<2x96xf32> -> vector<2x96xf32>
    %284 = vector.broadcast %9 : vector<1x96xf32> to vector<2x96xf32>
    %285 = arith.addf %283, %284 : vector<2x96xf32>
    %286 = vector.extract_strided_slice %7 {offsets = [0, 8, 0], sizes = [2, 1, 96], strides = [1, 1, 1]} : vector<2x16x96xf32> to vector<2x1x96xf32>
    %287 = vector.shape_cast %286 : vector<2x1x96xf32> to vector<2x96xf32>
    %288 = vector.extract_strided_slice %287 {offsets = [0, 0], sizes = [2, 32], strides = [1, 1]} : vector<2x96xf32> to vector<2x32xf32>
    %289 = vector.extract_strided_slice %285 {offsets = [0, 0], sizes = [2, 32], strides = [1, 1]} : vector<2x96xf32> to vector<2x32xf32>
    %290 = arith.addf %288, %289 : vector<2x32xf32>
    %291 = arith.negf %290 : vector<2x32xf32>
    %292 = math.exp %291 : vector<2x32xf32>
    %cst_61 = arith.constant 1.000000e+00 : f32
    %293 = vector.broadcast %cst_61 : f32 to vector<2x32xf32>
    %294 = arith.addf %293, %292 : vector<2x32xf32>
    %295 = arith.divf %293, %294 : vector<2x32xf32>
    %296 = vector.extract_strided_slice %287 {offsets = [0, 32], sizes = [2, 32], strides = [1, 1]} : vector<2x96xf32> to vector<2x32xf32>
    %297 = vector.extract_strided_slice %285 {offsets = [0, 32], sizes = [2, 32], strides = [1, 1]} : vector<2x96xf32> to vector<2x32xf32>
    %298 = arith.addf %296, %297 : vector<2x32xf32>
    %299 = arith.negf %298 : vector<2x32xf32>
    %300 = math.exp %299 : vector<2x32xf32>
    %cst_62 = arith.constant 1.000000e+00 : f32
    %301 = vector.broadcast %cst_62 : f32 to vector<2x32xf32>
    %302 = arith.addf %301, %300 : vector<2x32xf32>
    %303 = arith.divf %301, %302 : vector<2x32xf32>
    %304 = vector.extract_strided_slice %287 {offsets = [0, 64], sizes = [2, 32], strides = [1, 1]} : vector<2x96xf32> to vector<2x32xf32>
    %305 = vector.extract_strided_slice %285 {offsets = [0, 64], sizes = [2, 32], strides = [1, 1]} : vector<2x96xf32> to vector<2x32xf32>
    %306 = arith.mulf %295, %305 : vector<2x32xf32>
    %307 = arith.addf %304, %306 : vector<2x32xf32>
    %308 = math.tanh %307 : vector<2x32xf32>
    %cst_63 = arith.constant 1.000000e+00 : f32
    %309 = vector.broadcast %cst_63 : f32 to vector<2x32xf32>
    %310 = arith.subf %309, %303 : vector<2x32xf32>
    %311 = arith.mulf %310, %308 : vector<2x32xf32>
    %312 = arith.mulf %303, %279 : vector<2x32xf32>
    %313 = arith.addf %311, %312 : vector<2x32xf32>
    %c0_64 = arith.constant 0 : index
    %c8 = arith.constant 8 : index
    %c0_65 = arith.constant 0 : index
    %314 = vector.load %arg15[%c0_64, %c8, %c0_65] : memref<2x16x32xf32, #tpu.memory_space<vmem>>, vector<2x1x32xf32>
    %315 = vector.shape_cast %314 : vector<2x1x32xf32> to vector<2x32xf32>
    %316 = vector.shape_cast %313 : vector<2x32xf32> to vector<2x1x32xf32>
    tpu.vector_store %arg15[%c0_64, %c8, %c0_65], %316 {strides = array<i32>} : memref<2x16x32xf32, #tpu.memory_space<vmem>>, vector<2x1x32xf32>,
    %cst_66 = arith.constant dense<0.000000e+00> : vector<2x96xf32>
    %317 = tpu.matmul %313, %8, %cst_66 {dimension_numbers = #tpu.dot_dimension_numbers<[1], [0], [0], [1], [0, 0, 1, 1], [], []>} : vector<2x32xf32>, vector<32x96xf32>, vector<2x96xf32> -> vector<2x96xf32>
    %318 = vector.broadcast %9 : vector<1x96xf32> to vector<2x96xf32>
    %319 = arith.addf %317, %318 : vector<2x96xf32>
    %320 = vector.extract_strided_slice %7 {offsets = [0, 9, 0], sizes = [2, 1, 96], strides = [1, 1, 1]} : vector<2x16x96xf32> to vector<2x1x96xf32>
    %321 = vector.shape_cast %320 : vector<2x1x96xf32> to vector<2x96xf32>
    %322 = vector.extract_strided_slice %321 {offsets = [0, 0], sizes = [2, 32], strides = [1, 1]} : vector<2x96xf32> to vector<2x32xf32>
    %323 = vector.extract_strided_slice %319 {offsets = [0, 0], sizes = [2, 32], strides = [1, 1]} : vector<2x96xf32> to vector<2x32xf32>
    %324 = arith.addf %322, %323 : vector<2x32xf32>
    %325 = arith.negf %324 : vector<2x32xf32>
    %326 = math.exp %325 : vector<2x32xf32>
    %cst_67 = arith.constant 1.000000e+00 : f32
    %327 = vector.broadcast %cst_67 : f32 to vector<2x32xf32>
    %328 = arith.addf %327, %326 : vector<2x32xf32>
    %329 = arith.divf %327, %328 : vector<2x32xf32>
    %330 = vector.extract_strided_slice %321 {offsets = [0, 32], sizes = [2, 32], strides = [1, 1]} : vector<2x96xf32> to vector<2x32xf32>
    %331 = vector.extract_strided_slice %319 {offsets = [0, 32], sizes = [2, 32], strides = [1, 1]} : vector<2x96xf32> to vector<2x32xf32>
    %332 = arith.addf %330, %331 : vector<2x32xf32>
    %333 = arith.negf %332 : vector<2x32xf32>
    %334 = math.exp %333 : vector<2x32xf32>
    %cst_68 = arith.constant 1.000000e+00 : f32
    %335 = vector.broadcast %cst_68 : f32 to vector<2x32xf32>
    %336 = arith.addf %335, %334 : vector<2x32xf32>
    %337 = arith.divf %335, %336 : vector<2x32xf32>
    %338 = vector.extract_strided_slice %321 {offsets = [0, 64], sizes = [2, 32], strides = [1, 1]} : vector<2x96xf32> to vector<2x32xf32>
    %339 = vector.extract_strided_slice %319 {offsets = [0, 64], sizes = [2, 32], strides = [1, 1]} : vector<2x96xf32> to vector<2x32xf32>
    %340 = arith.mulf %329, %339 : vector<2x32xf32>
    %341 = arith.addf %338, %340 : vector<2x32xf32>
    %342 = math.tanh %341 : vector<2x32xf32>
    %cst_69 = arith.constant 1.000000e+00 : f32
    %343 = vector.broadcast %cst_69 : f32 to vector<2x32xf32>
    %344 = arith.subf %343, %337 : vector<2x32xf32>
    %345 = arith.mulf %344, %342 : vector<2x32xf32>
    %346 = arith.mulf %337, %313 : vector<2x32xf32>
    %347 = arith.addf %345, %346 : vector<2x32xf32>
    %c0_70 = arith.constant 0 : index
    %c9 = arith.constant 9 : index
    %c0_71 = arith.constant 0 : index
    %348 = vector.load %arg15[%c0_70, %c9, %c0_71] : memref<2x16x32xf32, #tpu.memory_space<vmem>>, vector<2x1x32xf32>
    %349 = vector.shape_cast %348 : vector<2x1x32xf32> to vector<2x32xf32>
    %350 = vector.shape_cast %347 : vector<2x32xf32> to vector<2x1x32xf32>
    tpu.vector_store %arg15[%c0_70, %c9, %c0_71], %350 {strides = array<i32>} : memref<2x16x32xf32, #tpu.memory_space<vmem>>, vector<2x1x32xf32>,
    %cst_72 = arith.constant dense<0.000000e+00> : vector<2x96xf32>
    %351 = tpu.matmul %347, %8, %cst_72 {dimension_numbers = #tpu.dot_dimension_numbers<[1], [0], [0], [1], [0, 0, 1, 1], [], []>} : vector<2x32xf32>, vector<32x96xf32>, vector<2x96xf32> -> vector<2x96xf32>
    %352 = vector.broadcast %9 : vector<1x96xf32> to vector<2x96xf32>
    %353 = arith.addf %351, %352 : vector<2x96xf32>
    %354 = vector.extract_strided_slice %7 {offsets = [0, 10, 0], sizes = [2, 1, 96], strides = [1, 1, 1]} : vector<2x16x96xf32> to vector<2x1x96xf32>
    %355 = vector.shape_cast %354 : vector<2x1x96xf32> to vector<2x96xf32>
    %356 = vector.extract_strided_slice %355 {offsets = [0, 0], sizes = [2, 32], strides = [1, 1]} : vector<2x96xf32> to vector<2x32xf32>
    %357 = vector.extract_strided_slice %353 {offsets = [0, 0], sizes = [2, 32], strides = [1, 1]} : vector<2x96xf32> to vector<2x32xf32>
    %358 = arith.addf %356, %357 : vector<2x32xf32>
    %359 = arith.negf %358 : vector<2x32xf32>
    %360 = math.exp %359 : vector<2x32xf32>
    %cst_73 = arith.constant 1.000000e+00 : f32
    %361 = vector.broadcast %cst_73 : f32 to vector<2x32xf32>
    %362 = arith.addf %361, %360 : vector<2x32xf32>
    %363 = arith.divf %361, %362 : vector<2x32xf32>
    %364 = vector.extract_strided_slice %355 {offsets = [0, 32], sizes = [2, 32], strides = [1, 1]} : vector<2x96xf32> to vector<2x32xf32>
    %365 = vector.extract_strided_slice %353 {offsets = [0, 32], sizes = [2, 32], strides = [1, 1]} : vector<2x96xf32> to vector<2x32xf32>
    %366 = arith.addf %364, %365 : vector<2x32xf32>
    %367 = arith.negf %366 : vector<2x32xf32>
    %368 = math.exp %367 : vector<2x32xf32>
    %cst_74 = arith.constant 1.000000e+00 : f32
    %369 = vector.broadcast %cst_74 : f32 to vector<2x32xf32>
    %370 = arith.addf %369, %368 : vector<2x32xf32>
    %371 = arith.divf %369, %370 : vector<2x32xf32>
    %372 = vector.extract_strided_slice %355 {offsets = [0, 64], sizes = [2, 32], strides = [1, 1]} : vector<2x96xf32> to vector<2x32xf32>
    %373 = vector.extract_strided_slice %353 {offsets = [0, 64], sizes = [2, 32], strides = [1, 1]} : vector<2x96xf32> to vector<2x32xf32>
    %374 = arith.mulf %363, %373 : vector<2x32xf32>
    %375 = arith.addf %372, %374 : vector<2x32xf32>
    %376 = math.tanh %375 : vector<2x32xf32>
    %cst_75 = arith.constant 1.000000e+00 : f32
    %377 = vector.broadcast %cst_75 : f32 to vector<2x32xf32>
    %378 = arith.subf %377, %371 : vector<2x32xf32>
    %379 = arith.mulf %378, %376 : vector<2x32xf32>
    %380 = arith.mulf %371, %347 : vector<2x32xf32>
    %381 = arith.addf %379, %380 : vector<2x32xf32>
    %c0_76 = arith.constant 0 : index
    %c10 = arith.constant 10 : index
    %c0_77 = arith.constant 0 : index
    %382 = vector.load %arg15[%c0_76, %c10, %c0_77] : memref<2x16x32xf32, #tpu.memory_space<vmem>>, vector<2x1x32xf32>
    %383 = vector.shape_cast %382 : vector<2x1x32xf32> to vector<2x32xf32>
    %384 = vector.shape_cast %381 : vector<2x32xf32> to vector<2x1x32xf32>
    tpu.vector_store %arg15[%c0_76, %c10, %c0_77], %384 {strides = array<i32>} : memref<2x16x32xf32, #tpu.memory_space<vmem>>, vector<2x1x32xf32>,
    %cst_78 = arith.constant dense<0.000000e+00> : vector<2x96xf32>
    %385 = tpu.matmul %381, %8, %cst_78 {dimension_numbers = #tpu.dot_dimension_numbers<[1], [0], [0], [1], [0, 0, 1, 1], [], []>} : vector<2x32xf32>, vector<32x96xf32>, vector<2x96xf32> -> vector<2x96xf32>
    %386 = vector.broadcast %9 : vector<1x96xf32> to vector<2x96xf32>
    %387 = arith.addf %385, %386 : vector<2x96xf32>
    %388 = vector.extract_strided_slice %7 {offsets = [0, 11, 0], sizes = [2, 1, 96], strides = [1, 1, 1]} : vector<2x16x96xf32> to vector<2x1x96xf32>
    %389 = vector.shape_cast %388 : vector<2x1x96xf32> to vector<2x96xf32>
    %390 = vector.extract_strided_slice %389 {offsets = [0, 0], sizes = [2, 32], strides = [1, 1]} : vector<2x96xf32> to vector<2x32xf32>
    %391 = vector.extract_strided_slice %387 {offsets = [0, 0], sizes = [2, 32], strides = [1, 1]} : vector<2x96xf32> to vector<2x32xf32>
    %392 = arith.addf %390, %391 : vector<2x32xf32>
    %393 = arith.negf %392 : vector<2x32xf32>
    %394 = math.exp %393 : vector<2x32xf32>
    %cst_79 = arith.constant 1.000000e+00 : f32
    %395 = vector.broadcast %cst_79 : f32 to vector<2x32xf32>
    %396 = arith.addf %395, %394 : vector<2x32xf32>
    %397 = arith.divf %395, %396 : vector<2x32xf32>
    %398 = vector.extract_strided_slice %389 {offsets = [0, 32], sizes = [2, 32], strides = [1, 1]} : vector<2x96xf32> to vector<2x32xf32>
    %399 = vector.extract_strided_slice %387 {offsets = [0, 32], sizes = [2, 32], strides = [1, 1]} : vector<2x96xf32> to vector<2x32xf32>
    %400 = arith.addf %398, %399 : vector<2x32xf32>
    %401 = arith.negf %400 : vector<2x32xf32>
    %402 = math.exp %401 : vector<2x32xf32>
    %cst_80 = arith.constant 1.000000e+00 : f32
    %403 = vector.broadcast %cst_80 : f32 to vector<2x32xf32>
    %404 = arith.addf %403, %402 : vector<2x32xf32>
    %405 = arith.divf %403, %404 : vector<2x32xf32>
    %406 = vector.extract_strided_slice %389 {offsets = [0, 64], sizes = [2, 32], strides = [1, 1]} : vector<2x96xf32> to vector<2x32xf32>
    %407 = vector.extract_strided_slice %387 {offsets = [0, 64], sizes = [2, 32], strides = [1, 1]} : vector<2x96xf32> to vector<2x32xf32>
    %408 = arith.mulf %397, %407 : vector<2x32xf32>
    %409 = arith.addf %406, %408 : vector<2x32xf32>
    %410 = math.tanh %409 : vector<2x32xf32>
    %cst_81 = arith.constant 1.000000e+00 : f32
    %411 = vector.broadcast %cst_81 : f32 to vector<2x32xf32>
    %412 = arith.subf %411, %405 : vector<2x32xf32>
    %413 = arith.mulf %412, %410 : vector<2x32xf32>
    %414 = arith.mulf %405, %381 : vector<2x32xf32>
    %415 = arith.addf %413, %414 : vector<2x32xf32>
    %c0_82 = arith.constant 0 : index
    %c11 = arith.constant 11 : index
    %c0_83 = arith.constant 0 : index
    %416 = vector.load %arg15[%c0_82, %c11, %c0_83] : memref<2x16x32xf32, #tpu.memory_space<vmem>>, vector<2x1x32xf32>
    %417 = vector.shape_cast %416 : vector<2x1x32xf32> to vector<2x32xf32>
    %418 = vector.shape_cast %415 : vector<2x32xf32> to vector<2x1x32xf32>
    tpu.vector_store %arg15[%c0_82, %c11, %c0_83], %418 {strides = array<i32>} : memref<2x16x32xf32, #tpu.memory_space<vmem>>, vector<2x1x32xf32>,
    %cst_84 = arith.constant dense<0.000000e+00> : vector<2x96xf32>
    %419 = tpu.matmul %415, %8, %cst_84 {dimension_numbers = #tpu.dot_dimension_numbers<[1], [0], [0], [1], [0, 0, 1, 1], [], []>} : vector<2x32xf32>, vector<32x96xf32>, vector<2x96xf32> -> vector<2x96xf32>
    %420 = vector.broadcast %9 : vector<1x96xf32> to vector<2x96xf32>
    %421 = arith.addf %419, %420 : vector<2x96xf32>
    %422 = vector.extract_strided_slice %7 {offsets = [0, 12, 0], sizes = [2, 1, 96], strides = [1, 1, 1]} : vector<2x16x96xf32> to vector<2x1x96xf32>
    %423 = vector.shape_cast %422 : vector<2x1x96xf32> to vector<2x96xf32>
    %424 = vector.extract_strided_slice %423 {offsets = [0, 0], sizes = [2, 32], strides = [1, 1]} : vector<2x96xf32> to vector<2x32xf32>
    %425 = vector.extract_strided_slice %421 {offsets = [0, 0], sizes = [2, 32], strides = [1, 1]} : vector<2x96xf32> to vector<2x32xf32>
    %426 = arith.addf %424, %425 : vector<2x32xf32>
    %427 = arith.negf %426 : vector<2x32xf32>
    %428 = math.exp %427 : vector<2x32xf32>
    %cst_85 = arith.constant 1.000000e+00 : f32
    %429 = vector.broadcast %cst_85 : f32 to vector<2x32xf32>
    %430 = arith.addf %429, %428 : vector<2x32xf32>
    %431 = arith.divf %429, %430 : vector<2x32xf32>
    %432 = vector.extract_strided_slice %423 {offsets = [0, 32], sizes = [2, 32], strides = [1, 1]} : vector<2x96xf32> to vector<2x32xf32>
    %433 = vector.extract_strided_slice %421 {offsets = [0, 32], sizes = [2, 32], strides = [1, 1]} : vector<2x96xf32> to vector<2x32xf32>
    %434 = arith.addf %432, %433 : vector<2x32xf32>
    %435 = arith.negf %434 : vector<2x32xf32>
    %436 = math.exp %435 : vector<2x32xf32>
    %cst_86 = arith.constant 1.000000e+00 : f32
    %437 = vector.broadcast %cst_86 : f32 to vector<2x32xf32>
    %438 = arith.addf %437, %436 : vector<2x32xf32>
    %439 = arith.divf %437, %438 : vector<2x32xf32>
    %440 = vector.extract_strided_slice %423 {offsets = [0, 64], sizes = [2, 32], strides = [1, 1]} : vector<2x96xf32> to vector<2x32xf32>
    %441 = vector.extract_strided_slice %421 {offsets = [0, 64], sizes = [2, 32], strides = [1, 1]} : vector<2x96xf32> to vector<2x32xf32>
    %442 = arith.mulf %431, %441 : vector<2x32xf32>
    %443 = arith.addf %440, %442 : vector<2x32xf32>
    %444 = math.tanh %443 : vector<2x32xf32>
    %cst_87 = arith.constant 1.000000e+00 : f32
    %445 = vector.broadcast %cst_87 : f32 to vector<2x32xf32>
    %446 = arith.subf %445, %439 : vector<2x32xf32>
    %447 = arith.mulf %446, %444 : vector<2x32xf32>
    %448 = arith.mulf %439, %415 : vector<2x32xf32>
    %449 = arith.addf %447, %448 : vector<2x32xf32>
    %c0_88 = arith.constant 0 : index
    %c12 = arith.constant 12 : index
    %c0_89 = arith.constant 0 : index
    %450 = vector.load %arg15[%c0_88, %c12, %c0_89] : memref<2x16x32xf32, #tpu.memory_space<vmem>>, vector<2x1x32xf32>
    %451 = vector.shape_cast %450 : vector<2x1x32xf32> to vector<2x32xf32>
    %452 = vector.shape_cast %449 : vector<2x32xf32> to vector<2x1x32xf32>
    tpu.vector_store %arg15[%c0_88, %c12, %c0_89], %452 {strides = array<i32>} : memref<2x16x32xf32, #tpu.memory_space<vmem>>, vector<2x1x32xf32>,
    %cst_90 = arith.constant dense<0.000000e+00> : vector<2x96xf32>
    %453 = tpu.matmul %449, %8, %cst_90 {dimension_numbers = #tpu.dot_dimension_numbers<[1], [0], [0], [1], [0, 0, 1, 1], [], []>} : vector<2x32xf32>, vector<32x96xf32>, vector<2x96xf32> -> vector<2x96xf32>
    %454 = vector.broadcast %9 : vector<1x96xf32> to vector<2x96xf32>
    %455 = arith.addf %453, %454 : vector<2x96xf32>
    %456 = vector.extract_strided_slice %7 {offsets = [0, 13, 0], sizes = [2, 1, 96], strides = [1, 1, 1]} : vector<2x16x96xf32> to vector<2x1x96xf32>
    %457 = vector.shape_cast %456 : vector<2x1x96xf32> to vector<2x96xf32>
    %458 = vector.extract_strided_slice %457 {offsets = [0, 0], sizes = [2, 32], strides = [1, 1]} : vector<2x96xf32> to vector<2x32xf32>
    %459 = vector.extract_strided_slice %455 {offsets = [0, 0], sizes = [2, 32], strides = [1, 1]} : vector<2x96xf32> to vector<2x32xf32>
    %460 = arith.addf %458, %459 : vector<2x32xf32>
    %461 = arith.negf %460 : vector<2x32xf32>
    %462 = math.exp %461 : vector<2x32xf32>
    %cst_91 = arith.constant 1.000000e+00 : f32
    %463 = vector.broadcast %cst_91 : f32 to vector<2x32xf32>
    %464 = arith.addf %463, %462 : vector<2x32xf32>
    %465 = arith.divf %463, %464 : vector<2x32xf32>
    %466 = vector.extract_strided_slice %457 {offsets = [0, 32], sizes = [2, 32], strides = [1, 1]} : vector<2x96xf32> to vector<2x32xf32>
    %467 = vector.extract_strided_slice %455 {offsets = [0, 32], sizes = [2, 32], strides = [1, 1]} : vector<2x96xf32> to vector<2x32xf32>
    %468 = arith.addf %466, %467 : vector<2x32xf32>
    %469 = arith.negf %468 : vector<2x32xf32>
    %470 = math.exp %469 : vector<2x32xf32>
    %cst_92 = arith.constant 1.000000e+00 : f32
    %471 = vector.broadcast %cst_92 : f32 to vector<2x32xf32>
    %472 = arith.addf %471, %470 : vector<2x32xf32>
    %473 = arith.divf %471, %472 : vector<2x32xf32>
    %474 = vector.extract_strided_slice %457 {offsets = [0, 64], sizes = [2, 32], strides = [1, 1]} : vector<2x96xf32> to vector<2x32xf32>
    %475 = vector.extract_strided_slice %455 {offsets = [0, 64], sizes = [2, 32], strides = [1, 1]} : vector<2x96xf32> to vector<2x32xf32>
    %476 = arith.mulf %465, %475 : vector<2x32xf32>
    %477 = arith.addf %474, %476 : vector<2x32xf32>
    %478 = math.tanh %477 : vector<2x32xf32>
    %cst_93 = arith.constant 1.000000e+00 : f32
    %479 = vector.broadcast %cst_93 : f32 to vector<2x32xf32>
    %480 = arith.subf %479, %473 : vector<2x32xf32>
    %481 = arith.mulf %480, %478 : vector<2x32xf32>
    %482 = arith.mulf %473, %449 : vector<2x32xf32>
    %483 = arith.addf %481, %482 : vector<2x32xf32>
    %c0_94 = arith.constant 0 : index
    %c13 = arith.constant 13 : index
    %c0_95 = arith.constant 0 : index
    %484 = vector.load %arg15[%c0_94, %c13, %c0_95] : memref<2x16x32xf32, #tpu.memory_space<vmem>>, vector<2x1x32xf32>
    %485 = vector.shape_cast %484 : vector<2x1x32xf32> to vector<2x32xf32>
    %486 = vector.shape_cast %483 : vector<2x32xf32> to vector<2x1x32xf32>
    tpu.vector_store %arg15[%c0_94, %c13, %c0_95], %486 {strides = array<i32>} : memref<2x16x32xf32, #tpu.memory_space<vmem>>, vector<2x1x32xf32>,
    %cst_96 = arith.constant dense<0.000000e+00> : vector<2x96xf32>
    %487 = tpu.matmul %483, %8, %cst_96 {dimension_numbers = #tpu.dot_dimension_numbers<[1], [0], [0], [1], [0, 0, 1, 1], [], []>} : vector<2x32xf32>, vector<32x96xf32>, vector<2x96xf32> -> vector<2x96xf32>
    %488 = vector.broadcast %9 : vector<1x96xf32> to vector<2x96xf32>
    %489 = arith.addf %487, %488 : vector<2x96xf32>
    %490 = vector.extract_strided_slice %7 {offsets = [0, 14, 0], sizes = [2, 1, 96], strides = [1, 1, 1]} : vector<2x16x96xf32> to vector<2x1x96xf32>
    %491 = vector.shape_cast %490 : vector<2x1x96xf32> to vector<2x96xf32>
    %492 = vector.extract_strided_slice %491 {offsets = [0, 0], sizes = [2, 32], strides = [1, 1]} : vector<2x96xf32> to vector<2x32xf32>
    %493 = vector.extract_strided_slice %489 {offsets = [0, 0], sizes = [2, 32], strides = [1, 1]} : vector<2x96xf32> to vector<2x32xf32>
    %494 = arith.addf %492, %493 : vector<2x32xf32>
    %495 = arith.negf %494 : vector<2x32xf32>
    %496 = math.exp %495 : vector<2x32xf32>
    %cst_97 = arith.constant 1.000000e+00 : f32
    %497 = vector.broadcast %cst_97 : f32 to vector<2x32xf32>
    %498 = arith.addf %497, %496 : vector<2x32xf32>
    %499 = arith.divf %497, %498 : vector<2x32xf32>
    %500 = vector.extract_strided_slice %491 {offsets = [0, 32], sizes = [2, 32], strides = [1, 1]} : vector<2x96xf32> to vector<2x32xf32>
    %501 = vector.extract_strided_slice %489 {offsets = [0, 32], sizes = [2, 32], strides = [1, 1]} : vector<2x96xf32> to vector<2x32xf32>
    %502 = arith.addf %500, %501 : vector<2x32xf32>
    %503 = arith.negf %502 : vector<2x32xf32>
    %504 = math.exp %503 : vector<2x32xf32>
    %cst_98 = arith.constant 1.000000e+00 : f32
    %505 = vector.broadcast %cst_98 : f32 to vector<2x32xf32>
    %506 = arith.addf %505, %504 : vector<2x32xf32>
    %507 = arith.divf %505, %506 : vector<2x32xf32>
    %508 = vector.extract_strided_slice %491 {offsets = [0, 64], sizes = [2, 32], strides = [1, 1]} : vector<2x96xf32> to vector<2x32xf32>
    %509 = vector.extract_strided_slice %489 {offsets = [0, 64], sizes = [2, 32], strides = [1, 1]} : vector<2x96xf32> to vector<2x32xf32>
    %510 = arith.mulf %499, %509 : vector<2x32xf32>
    %511 = arith.addf %508, %510 : vector<2x32xf32>
    %512 = math.tanh %511 : vector<2x32xf32>
    %cst_99 = arith.constant 1.000000e+00 : f32
    %513 = vector.broadcast %cst_99 : f32 to vector<2x32xf32>
    %514 = arith.subf %513, %507 : vector<2x32xf32>
    %515 = arith.mulf %514, %512 : vector<2x32xf32>
    %516 = arith.mulf %507, %483 : vector<2x32xf32>
    %517 = arith.addf %515, %516 : vector<2x32xf32>
    %c0_100 = arith.constant 0 : index
    %c14 = arith.constant 14 : index
    %c0_101 = arith.constant 0 : index
    %518 = vector.load %arg15[%c0_100, %c14, %c0_101] : memref<2x16x32xf32, #tpu.memory_space<vmem>>, vector<2x1x32xf32>
    %519 = vector.shape_cast %518 : vector<2x1x32xf32> to vector<2x32xf32>
    %520 = vector.shape_cast %517 : vector<2x32xf32> to vector<2x1x32xf32>
    tpu.vector_store %arg15[%c0_100, %c14, %c0_101], %520 {strides = array<i32>} : memref<2x16x32xf32, #tpu.memory_space<vmem>>, vector<2x1x32xf32>,
    %cst_102 = arith.constant dense<0.000000e+00> : vector<2x96xf32>
    %521 = tpu.matmul %517, %8, %cst_102 {dimension_numbers = #tpu.dot_dimension_numbers<[1], [0], [0], [1], [0, 0, 1, 1], [], []>} : vector<2x32xf32>, vector<32x96xf32>, vector<2x96xf32> -> vector<2x96xf32>
    %522 = vector.broadcast %9 : vector<1x96xf32> to vector<2x96xf32>
    %523 = arith.addf %521, %522 : vector<2x96xf32>
    %524 = vector.extract_strided_slice %7 {offsets = [0, 15, 0], sizes = [2, 1, 96], strides = [1, 1, 1]} : vector<2x16x96xf32> to vector<2x1x96xf32>
    %525 = vector.shape_cast %524 : vector<2x1x96xf32> to vector<2x96xf32>
    %526 = vector.extract_strided_slice %525 {offsets = [0, 0], sizes = [2, 32], strides = [1, 1]} : vector<2x96xf32> to vector<2x32xf32>
    %527 = vector.extract_strided_slice %523 {offsets = [0, 0], sizes = [2, 32], strides = [1, 1]} : vector<2x96xf32> to vector<2x32xf32>
    %528 = arith.addf %526, %527 : vector<2x32xf32>
    %529 = arith.negf %528 : vector<2x32xf32>
    %530 = math.exp %529 : vector<2x32xf32>
    %cst_103 = arith.constant 1.000000e+00 : f32
    %531 = vector.broadcast %cst_103 : f32 to vector<2x32xf32>
    %532 = arith.addf %531, %530 : vector<2x32xf32>
    %533 = arith.divf %531, %532 : vector<2x32xf32>
    %534 = vector.extract_strided_slice %525 {offsets = [0, 32], sizes = [2, 32], strides = [1, 1]} : vector<2x96xf32> to vector<2x32xf32>
    %535 = vector.extract_strided_slice %523 {offsets = [0, 32], sizes = [2, 32], strides = [1, 1]} : vector<2x96xf32> to vector<2x32xf32>
    %536 = arith.addf %534, %535 : vector<2x32xf32>
    %537 = arith.negf %536 : vector<2x32xf32>
    %538 = math.exp %537 : vector<2x32xf32>
    %cst_104 = arith.constant 1.000000e+00 : f32
    %539 = vector.broadcast %cst_104 : f32 to vector<2x32xf32>
    %540 = arith.addf %539, %538 : vector<2x32xf32>
    %541 = arith.divf %539, %540 : vector<2x32xf32>
    %542 = vector.extract_strided_slice %525 {offsets = [0, 64], sizes = [2, 32], strides = [1, 1]} : vector<2x96xf32> to vector<2x32xf32>
    %543 = vector.extract_strided_slice %523 {offsets = [0, 64], sizes = [2, 32], strides = [1, 1]} : vector<2x96xf32> to vector<2x32xf32>
    %544 = arith.mulf %533, %543 : vector<2x32xf32>
    %545 = arith.addf %542, %544 : vector<2x32xf32>
    %546 = math.tanh %545 : vector<2x32xf32>
    %cst_105 = arith.constant 1.000000e+00 : f32
    %547 = vector.broadcast %cst_105 : f32 to vector<2x32xf32>
    %548 = arith.subf %547, %541 : vector<2x32xf32>
    %549 = arith.mulf %548, %546 : vector<2x32xf32>
    %550 = arith.mulf %541, %517 : vector<2x32xf32>
    %551 = arith.addf %549, %550 : vector<2x32xf32>
    %c0_106 = arith.constant 0 : index
    %c15 = arith.constant 15 : index
    %c0_107 = arith.constant 0 : index
    %552 = vector.load %arg15[%c0_106, %c15, %c0_107] : memref<2x16x32xf32, #tpu.memory_space<vmem>>, vector<2x1x32xf32>
    %553 = vector.shape_cast %552 : vector<2x1x32xf32> to vector<2x32xf32>
    %554 = vector.shape_cast %551 : vector<2x32xf32> to vector<2x1x32xf32>
    tpu.vector_store %arg15[%c0_106, %c15, %c0_107], %554 {strides = array<i32>} : memref<2x16x32xf32, #tpu.memory_space<vmem>>, vector<2x1x32xf32>,
    %c0_108 = arith.constant 0 : index
    %c0_109 = arith.constant 0 : index
    %c0_110 = arith.constant 0 : index
    %555 = vector.load %arg15[%c0_108, %c0_109, %c0_110] : memref<2x16x32xf32, #tpu.memory_space<vmem>>, vector<2x16x32xf32>
    %556 = vector.shape_cast %555 : vector<2x16x32xf32> to vector<32x32xf32>
    %c0_111 = arith.constant 0 : index
    %c0_112 = arith.constant 0 : index
    %557 = vector.load %arg7[%c0_111, %c0_112] : memref<32x32xf32, #tpu.memory_space<vmem>>, vector<32x32xf32>
    %cst_113 = arith.constant dense<0.000000e+00> : vector<32x32xf32>
    %558 = tpu.matmul %556, %557, %cst_113 {dimension_numbers = #tpu.dot_dimension_numbers<[1], [0], [0], [1], [0, 0, 1, 1], [], []>} : vector<32x32xf32>, vector<32x32xf32>, vector<32x32xf32> -> vector<32x32xf32>
    %559 = math.tanh %558 : vector<32x32xf32>
    %560 = vector.shape_cast %559 : vector<32x32xf32> to vector<2x16x32xf32>
    %c0_114 = arith.constant 0 : index
    %c0_115 = arith.constant 0 : index
    %561 = vector.load %arg8[%c0_114, %c0_115] : memref<1x32xf32, #tpu.memory_space<vmem>>, vector<1x32xf32>
    %562 = vector.shape_cast %561 : vector<1x32xf32> to vector<1x1x32xf32>
    %563 = vector.broadcast %562 : vector<1x1x32xf32> to vector<2x16x32xf32>
    %564 = arith.mulf %560, %563 : vector<2x16x32xf32>
    %cst_116 = arith.constant dense<0.000000e+00> : vector<2x16xf32>
    %565 = vector.multi_reduction <add>, %564, %cst_116 [2] : vector<2x16x32xf32> to vector<2x16xf32>
    %c0_117 = arith.constant 0 : index
    %c0_118 = arith.constant 0 : index
    %566 = vector.load %arg2[%c0_117, %c0_118] : memref<2x1xi32, #tpu.memory_space<vmem>>, vector<2x1xi32>
    %567 = tpu.iota {dimensions = array<i32: 1>} : vector<2x16xi32>
    %568 = vector.broadcast %566 : vector<2x1xi32> to vector<2x16xi32>
    %569 = arith.cmpi slt, %567, %568 : vector<2x16xi32>
    %cst_119 = arith.constant -1.000000e+30 : f32
    %570 = vector.broadcast %cst_119 : f32 to vector<2x16xf32>
    %571 = arith.select %569, %565, %570 : vector<2x16xi1>, vector<2x16xf32>
    %cst_120 = arith.constant dense<0xFF800000> : vector<2xf32>
    %572 = vector.multi_reduction <maximumf>, %571, %cst_120 [1] : vector<2x16xf32> to vector<2xf32>
    %573 = vector.shape_cast %572 : vector<2xf32> to vector<2x1xf32>
    %574 = vector.broadcast %573 : vector<2x1xf32> to vector<2x16xf32>
    %575 = arith.subf %571, %574 : vector<2x16xf32>
    %576 = math.exp %575 : vector<2x16xf32>
    %cst_121 = arith.constant dense<0.000000e+00> : vector<2xf32>
    %577 = vector.multi_reduction <add>, %576, %cst_121 [1] : vector<2x16xf32> to vector<2xf32>
    %578 = vector.shape_cast %577 : vector<2xf32> to vector<2x1xf32>
    %579 = tpu.reciprocal %578 : vector<2x1xf32> -> vector<2x1xf32>
    %580 = vector.broadcast %579 : vector<2x1xf32> to vector<2x16xf32>
    %581 = arith.mulf %576, %580 : vector<2x16xf32>
    %c0_122 = arith.constant 0 : index
    %c0_123 = arith.constant 0 : index
    %582 = vector.load %arg17[%c0_122, %c0_123] : memref<2x16xf32, #tpu.memory_space<vmem>>, vector<2x16xf32>
    tpu.vector_store %arg17[%c0_122, %c0_123], %581 {strides = array<i32>} : memref<2x16xf32, #tpu.memory_space<vmem>>, vector<2x16xf32>,
    %583 = vector.shape_cast %581 : vector<2x16xf32> to vector<2x16x1xf32>
    %584 = vector.broadcast %583 : vector<2x16x1xf32> to vector<2x16x32xf32>
    %585 = arith.mulf %584, %555 : vector<2x16x32xf32>
    %cst_124 = arith.constant dense<0.000000e+00> : vector<2x32xf32>
    %586 = vector.multi_reduction <add>, %585, %cst_124 [1] : vector<2x16x32xf32> to vector<2x32xf32>
    %c0_125 = arith.constant 0 : index
    %c0_126 = arith.constant 0 : index
    %587 = vector.load %arg1[%c0_125, %c0_126] : memref<2x32xf32, #tpu.memory_space<vmem>>, vector<2x32xf32>
    %c0_127 = arith.constant 0 : index
    %c0_128 = arith.constant 0 : index
    %588 = vector.load %arg9[%c0_127, %c0_128] : memref<32x96xf32, #tpu.memory_space<vmem>>, vector<32x96xf32>
    %cst_129 = arith.constant dense<0.000000e+00> : vector<2x96xf32>
    %589 = tpu.matmul %587, %588, %cst_129 {dimension_numbers = #tpu.dot_dimension_numbers<[1], [0], [0], [1], [0, 0, 1, 1], [], []>} : vector<2x32xf32>, vector<32x96xf32>, vector<2x96xf32> -> vector<2x96xf32>
    %c0_130 = arith.constant 0 : index
    %c0_131 = arith.constant 0 : index
    %590 = vector.load %arg10[%c0_130, %c0_131] : memref<32x96xf32, #tpu.memory_space<vmem>>, vector<32x96xf32>
    %cst_132 = arith.constant dense<0.000000e+00> : vector<2x96xf32>
    %591 = tpu.matmul %586, %590, %cst_132 {dimension_numbers = #tpu.dot_dimension_numbers<[1], [0], [0], [1], [0, 0, 1, 1], [], []>} : vector<2x32xf32>, vector<32x96xf32>, vector<2x96xf32> -> vector<2x96xf32>
    %592 = arith.addf %589, %591 : vector<2x96xf32>
    %c0_133 = arith.constant 0 : index
    %c0_134 = arith.constant 0 : index
    %593 = vector.load %arg11[%c0_133, %c0_134] : memref<1x96xf32, #tpu.memory_space<vmem>>, vector<1x96xf32>
    %594 = vector.broadcast %593 : vector<1x96xf32> to vector<2x96xf32>
    %595 = arith.addf %592, %594 : vector<2x96xf32>
    %c0_135 = arith.constant 0 : index
    %c0_136 = arith.constant 0 : index
    %596 = vector.load %arg12[%c0_135, %c0_136] : memref<1x96xf32, #tpu.memory_space<vmem>>, vector<1x96xf32>
    %597 = vector.extract_strided_slice %595 {offsets = [0, 0], sizes = [2, 32], strides = [1, 1]} : vector<2x96xf32> to vector<2x32xf32>
    %598 = vector.extract_strided_slice %596 {offsets = [0, 0], sizes = [1, 32], strides = [1, 1]} : vector<1x96xf32> to vector<1x32xf32>
    %599 = vector.broadcast %598 : vector<1x32xf32> to vector<2x32xf32>
    %600 = arith.addf %597, %599 : vector<2x32xf32>
    %601 = arith.negf %600 : vector<2x32xf32>
    %602 = math.exp %601 : vector<2x32xf32>
    %cst_137 = arith.constant 1.000000e+00 : f32
    %603 = vector.broadcast %cst_137 : f32 to vector<2x32xf32>
    %604 = arith.addf %603, %602 : vector<2x32xf32>
    %605 = arith.divf %603, %604 : vector<2x32xf32>
    %606 = vector.extract_strided_slice %595 {offsets = [0, 32], sizes = [2, 32], strides = [1, 1]} : vector<2x96xf32> to vector<2x32xf32>
    %607 = vector.extract_strided_slice %596 {offsets = [0, 32], sizes = [1, 32], strides = [1, 1]} : vector<1x96xf32> to vector<1x32xf32>
    %608 = vector.broadcast %607 : vector<1x32xf32> to vector<2x32xf32>
    %609 = arith.addf %606, %608 : vector<2x32xf32>
    %610 = arith.negf %609 : vector<2x32xf32>
    %611 = math.exp %610 : vector<2x32xf32>
    %cst_138 = arith.constant 1.000000e+00 : f32
    %612 = vector.broadcast %cst_138 : f32 to vector<2x32xf32>
    %613 = arith.addf %612, %611 : vector<2x32xf32>
    %614 = arith.divf %612, %613 : vector<2x32xf32>
    %615 = vector.extract_strided_slice %595 {offsets = [0, 64], sizes = [2, 32], strides = [1, 1]} : vector<2x96xf32> to vector<2x32xf32>
    %616 = vector.extract_strided_slice %596 {offsets = [0, 64], sizes = [1, 32], strides = [1, 1]} : vector<1x96xf32> to vector<1x32xf32>
    %617 = vector.broadcast %616 : vector<1x32xf32> to vector<2x32xf32>
    %618 = arith.mulf %605, %617 : vector<2x32xf32>
    %619 = arith.addf %615, %618 : vector<2x32xf32>
    %620 = math.tanh %619 : vector<2x32xf32>
    %cst_139 = arith.constant 1.000000e+00 : f32
    %621 = vector.broadcast %cst_139 : f32 to vector<2x32xf32>
    %622 = arith.subf %621, %614 : vector<2x32xf32>
    %623 = arith.mulf %622, %620 : vector<2x32xf32>
    %c0_140 = arith.constant 0 : index
    %c0_141 = arith.constant 0 : index
    %624 = vector.load %arg13[%c0_140, %c0_141] : memref<32x16xf32, #tpu.memory_space<vmem>>, vector<32x16xf32>
    %cst_142 = arith.constant dense<0.000000e+00> : vector<2x16xf32>
    %625 = tpu.matmul %623, %624, %cst_142 {dimension_numbers = #tpu.dot_dimension_numbers<[1], [0], [0], [1], [0, 0, 1, 1], [], []>} : vector<2x32xf32>, vector<32x16xf32>, vector<2x16xf32> -> vector<2x16xf32>
    %c0_143 = arith.constant 0 : index
    %c0_144 = arith.constant 0 : index
    %626 = vector.load %arg14[%c0_143, %c0_144] : memref<1x16xf32, #tpu.memory_space<vmem>>, vector<1x16xf32>
    %627 = vector.broadcast %626 : vector<1x16xf32> to vector<2x16xf32>
    %628 = arith.addf %625, %627 : vector<2x16xf32>
    %cst_145 = arith.constant dense<0xFF800000> : vector<2xf32>
    %629 = vector.multi_reduction <maximumf>, %628, %cst_145 [1] : vector<2x16xf32> to vector<2xf32>
    %630 = vector.shape_cast %629 : vector<2xf32> to vector<2x1xf32>
    %631 = vector.broadcast %630 : vector<2x1xf32> to vector<2x16xf32>
    %632 = arith.subf %628, %631 : vector<2x16xf32>
    %633 = math.exp %632 : vector<2x16xf32>
    %cst_146 = arith.constant dense<0.000000e+00> : vector<2xf32>
    %634 = vector.multi_reduction <add>, %633, %cst_146 [1] : vector<2x16xf32> to vector<2xf32>
    %635 = vector.shape_cast %634 : vector<2xf32> to vector<2x1xf32>
    %636 = math.log %635 : vector<2x1xf32>
    %637 = arith.addf %630, %636 : vector<2x1xf32>
    %638 = vector.broadcast %637 : vector<2x1xf32> to vector<2x16xf32>
    %639 = arith.subf %628, %638 : vector<2x16xf32>
    %c0_147 = arith.constant 0 : index
    %c0_148 = arith.constant 0 : index
    %640 = vector.load %arg16[%c0_147, %c0_148] : memref<2x16xf32, #tpu.memory_space<vmem>>, vector<2x16xf32>
    tpu.vector_store %arg16[%c0_147, %c0_148], %639 {strides = array<i32>} : memref<2x16xf32, #tpu.memory_space<vmem>>, vector<2x16xf32>,
    return
  }
}

</mosaic_0001>

<bundles_post_ra>
// kernel: tpu_custom_call.1
= control target key start
LH: loop header
LB: loop body
LE: loop exit
PB: predicated region body
PF: predicated region fallthrough
CT: control target
= control target key end

     0   :  { %s3824_s0 = inlined_call_operand.vmem [shape: f32[2,16,32], index: 0, kind: input, shape index: {}]   ;;  %s3825_s1 = inlined_call_operand.vmem [shape: f32[2,32], index: 1, kind: input, shape index: {}]   ;;  %s3826_s2 = inlined_call_operand.vmem [shape: s32[2,1], index: 2, kind: input, shape index: {}]   ;;  %s3827_s3 = inlined_call_operand.hbm [shape: f32[32,96], index: 3, kind: input, shape index: {}]   ;;  %s3828_s4 = inlined_call_operand.vmem [shape: f32[1,96], index: 4, kind: input, shape index: {}]   ;;  %s3829_s5 = inlined_call_operand.hbm [shape: f32[32,96], index: 5, kind: input, shape index: {}]   ;;  %s3830_s6 = inlined_call_operand.vmem [shape: f32[1,96], index: 6, kind: input, shape index: {}]   ;;  %s3831_s7 = inlined_call_operand.hbm [shape: f32[32,32], index: 7, kind: input, shape index: {}]   ;;  %s3832_s8 = inlined_call_operand.vmem [shape: f32[1,32], index: 8, kind: input, shape index: {}]   ;;  %s3833_s9 = inlined_call_operand.hbm [shape: f32[32,96], index: 9, kind: input, shape index: {}]   ;;  %s3834_s10 = inlined_call_operand.hbm [shape: f32[32,96], index: 10, kind: input, shape index: {}]   ;;  %s3835_s11 = inlined_call_operand.vmem [shape: f32[1,96], index: 11, kind: input, shape index: {}]   ;;  %s3836_s12 = inlined_call_operand.vmem [shape: f32[1,96], index: 12, kind: input, shape index: {}]   ;;  %s3837_s13 = inlined_call_operand.vmem [shape: f32[32,16], index: 13, kind: input, shape index: {}]   ;;  %s3838_s14 = inlined_call_operand.vmem [shape: f32[1,16], index: 14, kind: input, shape index: {}]   ;;  %s3839_s15 = inlined_call_operand.hbm [shape: f32[2,16,32], index: 15, kind: output, shape index: {0}]   ;;  %s3840_s16 = inlined_call_operand.hbm [shape: f32[2,16], index: 16, kind: output, shape index: {1}]   ;;  %s3841_s17 = inlined_call_operand.hbm [shape: f32[2,16], index: 17, kind: output, shape index: {2}]  }
   0x1   :  { %3843 = sst [smem:[#allocation20_spill]] %s3824_s0 }
   0x2   :  { %3844 = sst [smem:[#allocation21_spill]] %s3825_s1 }
   0x3   :  { %23 = vsyncpa [#allocation3], 0 }
   0x4   :  { %24 = vsyncpa [#allocation6], 0 }
   0x5   :  { %25 = vsyncpa [#allocation9], 0 }
   0x6   :  { %26 = vsyncpa [#allocation4], 0 }
   0x7   :  { %27 = vsyncpa [#allocation13], 0  ;;  %s53_s26 = sshll.u32 %s3829_s5, 4  ;;  %s3023_s27 = smov [#allocation5]   ;;  %s54_s26 = int_to_ptr.hbm [resolvable:$true] %s53_s26 }
   0x8   :  { %s55_s28 = sshll.u32 %s3023_s27, 4  ;;  %s83_s30 = sshll.u32 %s3833_s9, 4  ;;  %s56_s28 = int_to_ptr.vmem [resolvable:$true] %s55_s28  ;;  %s84_s30 = int_to_ptr.hbm [resolvable:$true] %s83_s30 }
   0x9   :  { %s3024_s18 = smov 128   ;;  %s3025_s19 = smov 8  }
   0xa   :  { %61 = dma.hbm_to_vmem [thread:$0]  %s54_s26, 512, %s56_s28, [#allocation6], %s3024_s18, %s3024_s18, %s3025_s19  }
   0xb   :  { %s3026_s1 = smov [#allocation8]   ;;  %s38_s5 = sshll.u32 %s3827_s3, 4  ;;  %s39_s5 = int_to_ptr.hbm [resolvable:$true] %s38_s5 }
   0xc   :  { %s85_s20 = sshll.u32 %s3026_s1, 4  ;;  %s68_s24 = sshll.u32 %s3831_s7, 4  ;;  %s86_s20 = int_to_ptr.vmem [resolvable:$true] %s85_s20  ;;  %s69_s24 = int_to_ptr.hbm [resolvable:$true] %s68_s24 }
   0xd   :  { %91 = dma.hbm_to_vmem [thread:$0]  %s84_s30, 512, %s86_s20, [#allocation9], %s3024_s18, %s3024_s18, %s3025_s19  }
   0xe   :  { %s3027_s25 = smov [#allocation2]   ;;  %s3028_s26 = smov [#allocation7]  }
   0xf   :  { %s40_s27 = sshll.u32 %s3027_s25, 4  ;;  %s70_s3 = sshll.u32 %s3028_s26, 4  ;;  %s41_s27 = int_to_ptr.vmem [resolvable:$true] %s40_s27  ;;  %s71_s3 = int_to_ptr.vmem [resolvable:$true] %s70_s3 }
  0x10   :  { %46 = dma.hbm_to_vmem [thread:$0]  %s39_s5, 512, %s41_s27, [#allocation3], %s3024_s18, %s3024_s18, %s3025_s19  }
  0x11   :  { %s96_s0 = sshll.u32 %s3834_s10, 4  ;;  %s3029_s7 = smov [#allocation10]   ;;  %s97_s0 = int_to_ptr.hbm [resolvable:$true] %s96_s0 }
  0x12   :  { %76 = dma.hbm_to_vmem [thread:$0]  %s69_s24, 512, %s71_s3, [#allocation6], %s3024_s18, %s3024_s18, %s3025_s19  }
  0x13   :  { %s98_s30 = sshll.u32 %s3029_s7, 4  ;;  %s99_s30 = int_to_ptr.vmem [resolvable:$true] %s98_s30 }
  0x14   :  { %104 = dma.hbm_to_vmem [thread:$0]  %s97_s0, 512, %s99_s30, [#allocation9], %s3024_s18, %s3024_s18, %s3025_s19  }
  0x15   :  { %3013 = dma.done.wait [#allocation3], 512  }
  0x16   :  { %3014 = vsyncadd [#allocation3], 4294966784 }
  0x17   :  { %3015 = dma.done.wait [#allocation6], 1024  }
  0x18   :  { %3016 = vsyncadd [#allocation6], 4294966272 }
  0x19   :  { %3017 = dma.done.wait [#allocation9], 1024  }
  0x1a   :  { %3018 = vsyncadd [#allocation9], 4294966272  ;;  %v140_v0 = vld [vmem:[#allocation2 + $0x18] sm:$0xff]  ;;  %v139_v1 = vld [vmem:[#allocation2 + $0x10] sm:$0xff]  ;;  %s3845_s20 = sld [smem:[#allocation20_spill]]  ;;  %vm145_vm0 = vcmask 261120  }
  0x1b   :  { %2566 = vmatpush.msra.mxu1 %v140_v0  ;;  %v3157_v2 = vld [vmem:[#allocation5 + $0x18] sm:$0xff]  ;;  %170 = vmatpush.msra.mxu0 %v140_v0  ;;  %v138_v3 = vld [vmem:[#allocation2 + $0x8] sm:$0xff]  ;;  %v137_v4 = vld [vmem:[#allocation2] sm:$0xff]  ;;  %v3030_v10 = vmov 0.0   ;;  %s3031_s23 = smov 64   ;;  %s3032_s27 = smov 96  }
  0x1c   :  { %2567 = vmatpush.msra.mxu2 %v140_v0  ;;  %448 = vmatpush.msra.mxu3 %v3157_v2  ;;  %v3163_v6 = vld [vmem:[#allocation5 + $0x10] sm:$0xff]  ;;  %v3165_v7 = vld [vmem:[#allocation5 + $0x8] sm:$0xff]  ;;  %v3175_v9 = vld [vmem:[#allocation5] sm:$0xff]  ;;  %vm310_vm9 = vcmask 1041409   ;;  %s3846_s5 = sld [smem:[#allocation21_spill]]  ;;  %s3034_s1 = smov [#allocation11]  }
  0x1d   :  { %2568 = vmatpush.msra.mxu1 %v139_v1  ;;  %171 = vmatpush.msra.mxu0 %v139_v1  ;;  %v3204_v12 = vld [vmem:[%s3830_s6] ss:$0 sm:$0xff]  ;;  %s2486_s24 = sshll.u32 %s3841_s17, 4  ;;  %s2487_s24 = int_to_ptr.hbm [resolvable:$true] %s2486_s24 }
  0x1e   :  { %2569 = vmatpush.msra.mxu2 %v139_v1  ;;  %449 = vmatpush.msra.mxu3 %v3163_v6  ;;  %v2594_v16 = vld [vmem:[%s3828_s4] ss:$0 sm:$0xff] }
  0x1f   :  { %2570 = vmatpush.msra.mxu1 %v138_v3  ;;  %172 = vmatpush.msra.mxu0 %v138_v3 }
  0x20   :  { %v135_v5 = vld [vmem:[%s3845_s20 + $0x10] sm:$0xff]  ;;  %v133_v8 = vld [vmem:[%s3845_s20] sm:$0xff]  ;;  %2571 = vmatpush.msra.mxu2 %v138_v3  ;;  %450 = vmatpush.msra.mxu3 %v3165_v7  ;;  %v136_v58 = vld [vmem:[%s3845_s20 + $0x18] sm:$0xff] }
  0x21   :  { %2572 = vmatpush.msra.mxu1 %v137_v4  ;;  %173 = vmatpush.msra.mxu0 %v137_v4 }
  0x22   :  { %2509 = vmatmul.msk.f32.vlgmr.msra.gmra.mxu1 %vm145_vm0, %v135_v5  ;;  %2507 = vmatmul.msk.f32.vlgmr.msra.gmra.mxu0 %vm145_vm0, %v133_v8 }
  0x23   :  { %210 = vmatpush.msrb.mxu1 %v3157_v2  ;;  %2573 = vmatpush.msra.mxu2 %v137_v4 }
  0x24   :  { %451 = vmatpush.msra.mxu3 %v3175_v9  ;;  %1668 = vmatpush.msrb.mxu0 %v3157_v2 }
  0x25   :  { %328 = vmatpush.msrb.mxu2 %v3157_v2  ;;  %211 = vmatpush.msrb.mxu1 %v3163_v6 }
  0x26   :  { %817 = vmatpush.msrb.mxu3 %v3157_v2  ;;  %1669 = vmatpush.msrb.mxu0 %v3163_v6 }
  0x27   :  { %329 = vmatpush.msrb.mxu2 %v3163_v6  ;;  %212 = vmatpush.msrb.mxu1 %v3165_v7 }
  0x28   :  { %818 = vmatpush.msrb.mxu3 %v3163_v6  ;;  %1670 = vmatpush.msrb.mxu0 %v3165_v7 }
  0x29   :  { %330 = vmatpush.msrb.mxu2 %v3165_v7  ;;  %213 = vmatpush.msrb.mxu1 %v3175_v9 }
  0x2a   :  { %819 = vmatpush.msrb.mxu3 %v3165_v7  ;;  %214 = vmatmul.f32.vlgmr.msrb.gmra.mxu1 %v3030_v10 }
  0x2b   :  { %331 = vmatpush.msrb.mxu2 %v3175_v9  ;;  %571 = vmatpush.msra.mxu1 %v3157_v2 }
  0x2c   :  { %820 = vmatpush.msrb.mxu3 %v3175_v9  ;;  %1671 = vmatpush.msrb.mxu0 %v3175_v9 }
  0x2d   :  { %572 = vmatpush.msra.mxu1 %v3163_v6  ;;  %2510 = vmatmul.msk.f32.vlgmr.msra.gmra.mxu2 %vm145_vm0, %v136_v58 }
  0x2e   :  { %694 = vmatpush.msra.mxu2 %v3157_v2 }
  0x2f   :  { %573 = vmatpush.msra.mxu1 %v3165_v7 }
  0x30   :  { %695 = vmatpush.msra.mxu2 %v3163_v6 }
  0x31   :  { %574 = vmatpush.msra.mxu1 %v3175_v9 }
  0x32   :  { %696 = vmatpush.msra.mxu2 %v3165_v7 }
  0x33   :  { %940 = vmatpush.msrb.mxu1 %v3157_v2 }
  0x34   :  { %697 = vmatpush.msra.mxu2 %v3175_v9 }
  0x35   :  { %941 = vmatpush.msrb.mxu1 %v3163_v6 }
  0x37   :  { %942 = vmatpush.msrb.mxu1 %v3165_v7 }
  0x39   :  { %943 = vmatpush.msrb.mxu1 %v3175_v9 }
  0x9f   :  { %v181_v11 = vpop.f32.mrf.mxu1  ;;  %v175_v19 = vpop.f32.mrf.mxu0 }
  0xa0   :  { %v3212_v17 = vadd.f32 %v2594_v16, %v181_v11  ;;  %v3215_v20 = vadd.f32 %v2594_v16, %v175_v19 }
  0xa7   :  { %v215_v13 = vpop.f32.mrf.mxu1 }
  0xa8   :  { %v216_v14 = vadd.f32 %v3204_v12, %v215_v13 }
  0xaa   :  { %v219_v15 = vrot.slane %v216_v14, 1  ;;  %v222_v22 = vadd.f32 %v216_v14, %v3215_v20 }
  0xac   :  { %264 = vrot.lane.b32.xlu0 %v219_v15, %s3031_s23  ;;  %v223_v18 = vadd.f32 %v219_v15, %v3212_v17  ;;  %v2511_v23 = vmul.f32 -1.442695, %v222_v22 }
  0xae   :  { %v2512_v21 = vmul.f32 -1.442695, %v223_v18 }
  0xb0   :  { %2600 = vpow2.f32 %v2512_v21  ;;  %v3247_v13 = vpop.f32.mrf.mxu2 }
  0xb1   :  { %2602 = vpow2.f32 %v2511_v23 }
  0xb4   :  { %262 = vrot.lane.b32.xlu0 %v216_v14, %s3031_s23 }
  0xb6   :  { %v2601_v24 = vpop.eup %2600 }
  0xb7   :  { %v231_v25 = vadd.f32 1.0, %v2601_v24  ;;  %v2603_v26 = vpop.eup %2602 }
  0xb8   :  { %v230_v27 = vadd.f32 1.0, %v2603_v26 }
  0xb9   :  { %2604 = vrcp.f32 %v231_v25  ;;  %v258_v36 = vand.u32 2147483648, %v231_v25  ;;  %vm252_vm2 = vweird.f32 %v231_v25  ;;  %v256_v37 = vand.u32 2147483647, %v231_v25 }
  0xba   :  { %2606 = vrcp.f32 %v230_v27  ;;  %v243_v45 = vand.u32 2147483648, %v230_v27  ;;  %vm237_vm6 = vweird.f32 %v230_v27  ;;  %v241_v46 = vand.u32 2147483647, %v230_v27 }
  0xbb   :  { %v259_v40 = vor.u32 1.1754944e-38, %v258_v36  ;;  %vm257_vm4 = vcmp.eq.f32.partialorder %v256_v37, 8.507059e+37 }
  0xbc   :  { %v244_v48 = vor.u32 1.1754944e-38, %v243_v45  ;;  %vm242_vm8 = vcmp.eq.f32.partialorder %v241_v46, 8.507059e+37 }
  0xbf   :  { %v2605_v28 = vpop.eup %2604 }
  0xc0   :  { %v248_v29 = vmul.f32 %v2605_v28, %v231_v25  ;;  %v2607_v31 = vpop.eup %2606  ;;  %vm253_vm1 = vweird.f32 %v2605_v28 }
  0xc1   :  { %v233_v33 = vmul.f32 %v2607_v31, %v230_v27  ;;  %vm254_vm3 = vmor %vm252_vm2, %vm253_vm1  ;;  %vm238_vm5 = vweird.f32 %v2607_v31 }
  0xc2   :  { %v249_v30 = vsub.f32 1.0, %v248_v29  ;;  %vm239_vm7 = vmor %vm237_vm6, %vm238_vm5 }
  0xc3   :  { %v234_v35 = vsub.f32 1.0, %v233_v33 }
  0xc4   :  { %v250_v32 = vmul.f32 %v2605_v28, %v249_v30 }
  0xc5   :  { %v235_v39 = vmul.f32 %v2607_v31, %v234_v35 }
  0xc6   :  { %v251_v34 = vadd.f32 %v2605_v28, %v250_v32 }
  0xc7   :  { %v236_v44 = vadd.f32 %v2607_v31, %v235_v39 }
  0xc8   :  { %v255_v38 = vsel %vm254_vm3, %v2605_v28, %v251_v34 }
  0xc9   :  { %v260_v42 = vsel %vm257_vm4, %v259_v40, %v255_v38  ;;  %v240_v47 = vsel %vm239_vm7, %v2607_v31, %v236_v44 }
  0xca   :  { %v245_v50 = vsel %vm242_vm8, %v244_v48, %v240_v47  ;;  %v283_v60 = vsub.f32 1.0, %v260_v42  ;;  %v295_v62 = vmul.f32 0.0, %v260_v42 }
  0xcb   :  { %v282_v0 = vsub.f32 1.0, %v245_v50  ;;  %v294_v3 = vmul.f32 0.0, %v245_v50 }
 0x11e   :  { %v265_v41 = vpop.permute.xlu0 %264 }
 0x11f   :  { %v269_v43 = vmul.f32 %v265_v41, %v260_v42 }
 0x121   :  { %274 = vrot.lane.b32.xlu1 %v269_v43, %s3031_s23 }
 0x126   :  { %v263_v49 = vpop.permute.xlu0 %262 }
 0x127   :  { %v268_v51 = vmul.f32 %v263_v49, %v245_v50 }
 0x129   :  { %272 = vrot.lane.b32.xlu1 %v268_v51, %s3031_s23 }
 0x193   :  { %v275_v52 = vpop.permute.xlu1 %274 }
 0x194   :  { %v279_v53 = vadd.f32 %v275_v52, %v3212_v17 }
 0x196   :  { %2608 = vtanh.f32 %v279_v53 }
 0x19b   :  { %v273_v54 = vpop.permute.xlu1 %272 }
 0x19c   :  { %v2609_v55 = vpop.eup %2608  ;;  %v278_v56 = vadd.f32 %v273_v54, %v3215_v20 }
 0x19d   :  { %288 = vrot.lane.b32.xlu2 %v2609_v55, %s3032_s27 }
 0x19e   :  { %2610 = vtanh.f32 %v278_v56 }
 0x1a4   :  { %v2611_v57 = vpop.eup %2610 }
 0x1a5   :  { %286 = vrot.lane.b32.xlu2 %v2611_v57, %s3032_s27 }
 0x1f7   :  { %v289_v59 = vpop.permute.xlu2 %288 }
 0x1f8   :  { %v293_v61 = vmul.f32 %v289_v59, %v283_v60 }
 0x1fa   :  { %v3232_v63 = vadd.f32 %v295_v62, %v293_v61 }
 0x1fc   :  { %v309_v5 = vrot.slane %v3232_v63, 7 }
 0x1ff   :  { %v287_v1 = vpop.permute.xlu2 %286 }
 0x200   :  { %v292_v4 = vmul.f32 %v287_v1, %v282_v0 }
 0x202   :  { %v3235_v8 = vadd.f32 %v294_v3, %v292_v4 }
 0x204   :  { %v311_v10 = vsel %vm310_vm9, %v309_v5, %v3235_v8  ;;  %v412_v60 = vrot.slane %v3235_v8, 7 }
 0x205   :  { %312 = vrot.lane.b32.xlu0 %v311_v10, %s3032_s27 }
 0x277   :  { %v313_v11 = vpop.permute.xlu0 %312 }
 0x278   :  { %2513 = vmatmul.msk.f32.vlgmr.msrb.gmra.mxu2 %vm145_vm0, %v313_v11 }
 0x279   :  { %1063 = vmatpush.msrb.mxu2 %v3157_v2 }
 0x27b   :  { %1064 = vmatpush.msrb.mxu2 %v3163_v6 }
 0x27d   :  { %1065 = vmatpush.msrb.mxu2 %v3165_v7 }
 0x27f   :  { %1066 = vmatpush.msrb.mxu2 %v3175_v9 }
 0x2fb   :  { %v333_v14 = vpop.f32.mrf.mxu2 }
 0x2fc   :  { %v334_v15 = vadd.f32 %v3204_v12, %v333_v14 }
 0x2fe   :  { %382 = vrot.lane.b32.xlu2 %v334_v15, %s3031_s23  ;;  %v337_v16 = vrot.slane %v334_v15, 7  ;;  %v341_v18 = vadd.f32 %v334_v15, %v3212_v17 }
 0x300   :  { %380 = vrot.lane.b32.xlu1 %v337_v16, %s3031_s23  ;;  %v2515_v19 = vmul.f32 -1.442695, %v341_v18  ;;  %v340_v23 = vadd.f32 %v337_v16, %v3215_v20 }
 0x302   :  { %2612 = vpow2.f32 %v2515_v19  ;;  %v2514_v25 = vmul.f32 -1.442695, %v340_v23 }
 0x308   :  { %v2613_v21 = vpop.eup %2612 }
 0x309   :  { %v349_v22 = vadd.f32 1.0, %v2613_v21 }
 0x30b   :  { %2614 = vrcp.f32 %v349_v22  ;;  %v376_v32 = vand.u32 2147483648, %v349_v22  ;;  %vm370_vm11 = vweird.f32 %v349_v22  ;;  %v374_v33 = vand.u32 2147483647, %v349_v22 }
 0x30c   :  { %2616 = vpow2.f32 %v2514_v25 }
 0x30d   :  { %v377_v35 = vor.u32 1.1754944e-38, %v376_v32  ;;  %vm375_vm13 = vcmp.eq.f32.partialorder %v374_v33, 8.507059e+37 }
 0x311   :  { %v2615_v24 = vpop.eup %2614 }
 0x312   :  { %v366_v26 = vmul.f32 %v2615_v24, %v349_v22  ;;  %v2617_v29 = vpop.eup %2616  ;;  %vm371_vm10 = vweird.f32 %v2615_v24 }
 0x313   :  { %v348_v31 = vadd.f32 1.0, %v2617_v29  ;;  %vm372_vm12 = vmor %vm370_vm11, %vm371_vm10 }
 0x314   :  { %v367_v27 = vsub.f32 1.0, %v366_v26 }
 0x315   :  { %2618 = vrcp.f32 %v348_v31  ;;  %v361_v44 = vand.u32 2147483648, %v348_v31  ;;  %vm355_vm15 = vweird.f32 %v348_v31  ;;  %v359_v45 = vand.u32 2147483647, %v348_v31 }
 0x316   :  { %v368_v28 = vmul.f32 %v2615_v24, %v367_v27 }
 0x317   :  { %v362_v47 = vor.u32 1.1754944e-38, %v361_v44  ;;  %vm360_vm2 = vcmp.eq.f32.partialorder %v359_v45, 8.507059e+37 }
 0x318   :  { %v369_v30 = vadd.f32 %v2615_v24, %v368_v28 }
 0x31a   :  { %v373_v34 = vsel %vm372_vm12, %v2615_v24, %v369_v30 }
 0x31b   :  { %v378_v37 = vsel %vm375_vm13, %v377_v35, %v373_v34  ;;  %v2619_v39 = vpop.eup %2618 }
 0x31c   :  { %v351_v40 = vmul.f32 %v2619_v39, %v348_v31  ;;  %vm356_vm14 = vweird.f32 %v2619_v39  ;;  %v401_v58 = vsub.f32 1.0, %v378_v37  ;;  %v416_v3 = vmul.f32 %v378_v37, %v309_v5 }
 0x31d   :  { %vm357_vm1 = vmor %vm355_vm15, %vm356_vm14 }
 0x31e   :  { %v352_v41 = vsub.f32 1.0, %v351_v40 }
 0x320   :  { %v353_v42 = vmul.f32 %v2619_v39, %v352_v41 }
 0x322   :  { %v354_v43 = vadd.f32 %v2619_v39, %v353_v42 }
 0x324   :  { %v358_v46 = vsel %vm357_vm1, %v2619_v39, %v354_v43 }
 0x325   :  { %v363_v49 = vsel %vm360_vm2, %v362_v47, %v358_v46 }
 0x326   :  { %v400_v59 = vsub.f32 1.0, %v363_v49  ;;  %v415_v0 = vmul.f32 %v412_v60, %v363_v49 }
 0x358   :  { %v383_v36 = vpop.permute.xlu2 %382 }
 0x359   :  { %v387_v38 = vmul.f32 %v383_v36, %v378_v37 }
 0x35b   :  { %392 = vrot.lane.b32.xlu1 %v387_v38, %s3031_s23 }
 0x372   :  { %v381_v48 = vpop.permute.xlu1 %380 }
 0x373   :  { %v386_v50 = vmul.f32 %v381_v48, %v363_v49 }
 0x375   :  { %390 = vrot.lane.b32.xlu0 %v386_v50, %s3031_s23 }
 0x3cd   :  { %v393_v51 = vpop.permute.xlu1 %392 }
 0x3ce   :  { %v397_v52 = vadd.f32 %v393_v51, %v3212_v17 }
 0x3d0   :  { %2620 = vtanh.f32 %v397_v52 }
 0x3d6   :  { %v2621_v53 = vpop.eup %2620 }
 0x3d7   :  { %406 = vrot.lane.b32.xlu0 %v2621_v53, %s3032_s27 }
 0x3e7   :  { %v391_v54 = vpop.permute.xlu0 %390 }
 0x3e8   :  { %v396_v55 = vadd.f32 %v391_v54, %v3215_v20 }
 0x3ea   :  { %2622 = vtanh.f32 %v396_v55 }
 0x3f0   :  { %v2623_v56 = vpop.eup %2622 }
 0x3f1   :  { %404 = vrot.lane.b32.xlu2 %v2623_v56, %s3032_s27 }
 0x449   :  { %v407_v57 = vpop.permute.xlu0 %406 }
 0x44a   :  { %v411_v62 = vmul.f32 %v407_v57, %v401_v58 }
 0x44b   :  { %v405_v61 = vpop.permute.xlu2 %404 }
 0x44c   :  { %v410_v1 = vmul.f32 %v405_v61, %v400_v59  ;;  %v3265_v10 = vadd.f32 %v416_v3, %v411_v62 }
 0x44e   :  { %v3263_v4 = vadd.f32 %v415_v0, %v410_v1  ;;  %v534_v60 = vrot.slane %v3265_v10, 7 }
 0x450   :  { %v430_v11 = vrot.slane %v3263_v4, 1  ;;  %v533_v62 = vrot.slane %v3263_v4, 7 }
 0x452   :  { %v431_v14 = vsel %vm310_vm9, %v3265_v10, %v430_v11 }
 0x453   :  { %432 = vrot.lane.b32.xlu1 %v431_v14, %s3032_s27 }
 0x4c5   :  { %v433_v15 = vpop.permute.xlu1 %432 }
 0x4c6   :  { %2516 = vmatmul.msk.f32.vlgmr.msra.gmra.mxu3 %vm145_vm0, %v433_v15 }
 0x4c7   :  { %1186 = vmatpush.msra.mxu3 %v3157_v2 }
 0x4c9   :  { %1187 = vmatpush.msra.mxu3 %v3163_v6 }
 0x4cb   :  { %1188 = vmatpush.msra.mxu3 %v3165_v7 }
 0x4cd   :  { %1189 = vmatpush.msra.mxu3 %v3175_v9 }
 0x549   :  { %v453_v5 = vpop.f32.mrf.mxu3 }
 0x54a   :  { %v454_v16 = vadd.f32 %v3204_v12, %v453_v5 }
 0x54c   :  { %v457_v18 = vrot.slane %v454_v16, 6  ;;  %v458_v19 = vrot.slane %v454_v16, 7 }
 0x54e   :  { %503 = vrot.lane.b32.xlu0 %v458_v19, %s3031_s23  ;;  %501 = vrot.lane.b32.xlu2 %v457_v18, %s3031_s23  ;;  %v461_v21 = vadd.f32 %v457_v18, %v3215_v20  ;;  %v462_v25 = vadd.f32 %v458_v19, %v3212_v17 }
 0x550   :  { %v2517_v22 = vmul.f32 -1.442695, %v461_v21  ;;  %v2518_v27 = vmul.f32 -1.442695, %v462_v25 }
 0x552   :  { %2624 = vpow2.f32 %v2517_v22 }
 0x558   :  { %v2625_v23 = vpop.eup %2624 }
 0x559   :  { %v469_v24 = vadd.f32 1.0, %v2625_v23 }
 0x55b   :  { %2626 = vrcp.f32 %v469_v24  ;;  %v482_v34 = vand.u32 2147483648, %v469_v24  ;;  %vm476_vm4 = vweird.f32 %v469_v24  ;;  %v480_v35 = vand.u32 2147483647, %v469_v24 }
 0x55c   :  { %2628 = vpow2.f32 %v2518_v27 }
 0x55d   :  { %v483_v37 = vor.u32 1.1754944e-38, %v482_v34  ;;  %vm481_vm6 = vcmp.eq.f32.partialorder %v480_v35, 8.507059e+37 }
 0x561   :  { %v2627_v26 = vpop.eup %2626 }
 0x562   :  { %v472_v28 = vmul.f32 %v2627_v26, %v469_v24  ;;  %v2629_v30 = vpop.eup %2628  ;;  %vm477_vm3 = vweird.f32 %v2627_v26 }
 0x563   :  { %v470_v32 = vadd.f32 1.0, %v2629_v30  ;;  %vm478_vm5 = vmor %vm476_vm4, %vm477_vm3 }
 0x564   :  { %v473_v29 = vsub.f32 1.0, %v472_v28 }
 0x565   :  { %2630 = vrcp.f32 %v470_v32  ;;  %v497_v46 = vand.u32 2147483648, %v470_v32  ;;  %vm491_vm8 = vweird.f32 %v470_v32  ;;  %v495_v47 = vand.u32 2147483647, %v470_v32 }
 0x566   :  { %v474_v31 = vmul.f32 %v2627_v26, %v473_v29 }
 0x567   :  { %v498_v49 = vor.u32 1.1754944e-38, %v497_v46  ;;  %vm496_vm11 = vcmp.eq.f32.partialorder %v495_v47, 8.507059e+37 }
 0x568   :  { %v475_v33 = vadd.f32 %v2627_v26, %v474_v31 }
 0x56a   :  { %v479_v36 = vsel %vm478_vm5, %v2627_v26, %v475_v33 }
 0x56b   :  { %v484_v39 = vsel %vm481_vm6, %v483_v37, %v479_v36  ;;  %v2631_v41 = vpop.eup %2630 }
 0x56c   :  { %v487_v42 = vmul.f32 %v2631_v41, %v470_v32  ;;  %vm492_vm7 = vweird.f32 %v2631_v41  ;;  %v521_v61 = vsub.f32 1.0, %v484_v39  ;;  %v537_v14 = vmul.f32 %v533_v62, %v484_v39 }
 0x56d   :  { %vm493_vm10 = vmor %vm491_vm8, %vm492_vm7 }
 0x56e   :  { %v488_v43 = vsub.f32 1.0, %v487_v42 }
 0x570   :  { %v489_v44 = vmul.f32 %v2631_v41, %v488_v43 }
 0x572   :  { %v490_v45 = vadd.f32 %v2631_v41, %v489_v44 }
 0x574   :  { %v494_v48 = vsel %vm493_vm10, %v2631_v41, %v490_v45 }
 0x575   :  { %v499_v51 = vsel %vm496_vm11, %v498_v49, %v494_v48 }
 0x576   :  { %v522_v59 = vsub.f32 1.0, %v499_v51  ;;  %v538_v3 = vmul.f32 %v534_v60, %v499_v51 }
 0x5a8   :  { %v502_v38 = vpop.permute.xlu2 %501 }
 0x5a9   :  { %v507_v40 = vmul.f32 %v502_v38, %v484_v39 }
 0x5ab   :  { %511 = vrot.lane.b32.xlu1 %v507_v40, %s3031_s23 }
 0x5c0   :  { %v504_v50 = vpop.permute.xlu0 %503 }
 0x5c1   :  { %v508_v52 = vmul.f32 %v504_v50, %v499_v51 }
 0x5c3   :  { %513 = vrot.lane.b32.xlu2 %v508_v52, %s3031_s23 }
 0x61d   :  { %v514_v53 = vpop.permute.xlu2 %513  ;;  %v512_v54 = vpop.permute.xlu1 %511 }
 0x61e   :  { %v518_v55 = vadd.f32 %v514_v53, %v3212_v17  ;;  %v517_v56 = vadd.f32 %v512_v54, %v3215_v20 }
 0x620   :  { %2632 = vtanh.f32 %v518_v55 }
 0x621   :  { %2634 = vtanh.f32 %v517_v56 }
 0x626   :  { %v2633_v57 = vpop.eup %2632 }
 0x627   :  { %v2635_v58 = vpop.eup %2634  ;;  %527 = vrot.lane.b32.xlu1 %v2633_v57, %s3032_s27 }
 0x628   :  { %525 = vrot.lane.b32.xlu0 %v2635_v58, %s3032_s27 }
 0x699   :  { %v528_v0 = vpop.permute.xlu1 %527 }
 0x69a   :  { %v526_v1 = vpop.permute.xlu0 %525  ;;  %v532_v11 = vmul.f32 %v528_v0, %v522_v59 }
 0x69b   :  { %v531_v15 = vmul.f32 %v526_v1, %v521_v61 }
 0x69c   :  { %v3289_v5 = vadd.f32 %v538_v3, %v532_v11 }
 0x69d   :  { %v3291_v16 = vadd.f32 %v537_v14, %v531_v15 }
 0x69e   :  { %v553_v18 = vrot.slane %v3289_v5, 1  ;;  %v657_v15 = vrot.slane %v3289_v5, 7 }
 0x69f   :  { %v552_v19 = vrot.slane %v3291_v16, 2  ;;  %v656_v11 = vrot.slane %v3291_v16, 7 }
 0x6a1   :  { %v554_v21 = vsel %vm310_vm9, %v553_v18, %v552_v19 }
 0x6a2   :  { %555 = vrot.lane.b32.xlu2 %v554_v21, %s3032_s27 }
 0x6fc   :  { %v556_v22 = vpop.permute.xlu2 %555 }
 0x6fd   :  { %2519 = vmatmul.msk.f32.vlgmr.msra.gmra.mxu1 %vm145_vm0, %v556_v22 }
 0x6fe   :  { %1305 = vmatpush.msra.mxu1 %v3157_v2 }
 0x700   :  { %1306 = vmatpush.msra.mxu1 %v3163_v6 }
 0x702   :  { %1307 = vmatpush.msra.mxu1 %v3165_v7 }
 0x704   :  { %1308 = vmatpush.msra.mxu1 %v3175_v9 }
 0x77a   :  { %v576_v23 = vpop.f32.mrf.mxu1 }
 0x77b   :  { %v577_v24 = vadd.f32 %v3204_v12, %v576_v23 }
 0x77d   :  { %v580_v25 = vrot.slane %v577_v24, 5  ;;  %v581_v26 = vrot.slane %v577_v24, 6 }
 0x77f   :  { %626 = vrot.lane.b32.xlu1 %v581_v26, %s3031_s23  ;;  %624 = vrot.lane.b32.xlu0 %v580_v25, %s3031_s23  ;;  %v584_v27 = vadd.f32 %v580_v25, %v3215_v20  ;;  %v585_v28 = vadd.f32 %v581_v26, %v3212_v17 }
 0x781   :  { %v2520_v29 = vmul.f32 -1.442695, %v584_v27  ;;  %v2521_v30 = vmul.f32 -1.442695, %v585_v28 }
 0x783   :  { %2636 = vpow2.f32 %v2520_v29 }
 0x784   :  { %2638 = vpow2.f32 %v2521_v30 }
 0x789   :  { %v2637_v31 = vpop.eup %2636 }
 0x78a   :  { %v2639_v32 = vpop.eup %2638  ;;  %v592_v33 = vadd.f32 1.0, %v2637_v31 }
 0x78b   :  { %v593_v34 = vadd.f32 1.0, %v2639_v32 }
 0x78c   :  { %2640 = vrcp.f32 %v592_v33  ;;  %vm599_vm14 = vweird.f32 %v592_v33  ;;  %v605_v46 = vand.u32 2147483648, %v592_v33  ;;  %v603_v48 = vand.u32 2147483647, %v592_v33 }
 0x78d   :  { %2642 = vrcp.f32 %v593_v34  ;;  %v620_v45 = vand.u32 2147483648, %v593_v34  ;;  %vm614_vm15 = vweird.f32 %v593_v34  ;;  %v618_v47 = vand.u32 2147483647, %v593_v34 }
 0x78e   :  { %v606_v52 = vor.u32 1.1754944e-38, %v605_v46  ;;  %vm604_vm4 = vcmp.eq.f32.partialorder %v603_v48, 8.507059e+37 }
 0x78f   :  { %v621_v51 = vor.u32 1.1754944e-38, %v620_v45  ;;  %vm619_vm3 = vcmp.eq.f32.partialorder %v618_v47, 8.507059e+37 }
 0x792   :  { %v2641_v35 = vpop.eup %2640 }
 0x793   :  { %v2643_v36 = vpop.eup %2642  ;;  %v595_v38 = vmul.f32 %v2641_v35, %v592_v33  ;;  %vm600_vm12 = vweird.f32 %v2641_v35 }
 0x794   :  { %v610_v37 = vmul.f32 %v2643_v36, %v593_v34  ;;  %vm615_vm13 = vweird.f32 %v2643_v36  ;;  %vm601_vm1 = vmor %vm599_vm14, %vm600_vm12 }
 0x795   :  { %v596_v40 = vsub.f32 1.0, %v595_v38  ;;  %vm616_vm2 = vmor %vm614_vm15, %vm615_vm13 }
 0x796   :  { %v611_v39 = vsub.f32 1.0, %v610_v37 }
 0x797   :  { %v597_v42 = vmul.f32 %v2641_v35, %v596_v40 }
 0x798   :  { %v612_v41 = vmul.f32 %v2643_v36, %v611_v39 }
 0x799   :  { %v598_v44 = vadd.f32 %v2641_v35, %v597_v42 }
 0x79a   :  { %v613_v43 = vadd.f32 %v2643_v36, %v612_v41 }
 0x79b   :  { %v602_v50 = vsel %vm601_vm1, %v2641_v35, %v598_v44 }
 0x79c   :  { %v617_v49 = vsel %vm616_vm2, %v2643_v36, %v613_v43  ;;  %v607_v56 = vsel %vm604_vm4, %v606_v52, %v602_v50 }
 0x79d   :  { %v622_v54 = vsel %vm619_vm3, %v621_v51, %v617_v49  ;;  %v644_v3 = vsub.f32 1.0, %v607_v56  ;;  %v660_v21 = vmul.f32 %v656_v11, %v607_v56 }
 0x79e   :  { %v645_v14 = vsub.f32 1.0, %v622_v54  ;;  %v661_v23 = vmul.f32 %v657_v15, %v622_v54 }
 0x7f1   :  { %v627_v53 = vpop.permute.xlu1 %626  ;;  %v625_v55 = vpop.permute.xlu0 %624 }
 0x7f2   :  { %v631_v57 = vmul.f32 %v627_v53, %v622_v54  ;;  %v630_v58 = vmul.f32 %v625_v55, %v607_v56 }
 0x7f4   :  { %636 = vrot.lane.b32.xlu0 %v631_v57, %s3031_s23  ;;  %634 = vrot.lane.b32.xlu2 %v630_v58, %s3031_s23 }
 0x84e   :  { %v635_v59 = vpop.permute.xlu2 %634 }
 0x84f   :  { %v640_v60 = vadd.f32 %v635_v59, %v3215_v20 }
 0x851   :  { %2644 = vtanh.f32 %v640_v60 }
 0x857   :  { %v2645_v61 = vpop.eup %2644 }
 0x858   :  { %648 = vrot.lane.b32.xlu1 %v2645_v61, %s3032_s27 }
 0x866   :  { %v637_v62 = vpop.permute.xlu0 %636 }
 0x867   :  { %v641_v0 = vadd.f32 %v637_v62, %v3212_v17 }
 0x869   :  { %2646 = vtanh.f32 %v641_v0 }
 0x86f   :  { %v2647_v1 = vpop.eup %2646 }
 0x870   :  { %650 = vrot.lane.b32.xlu2 %v2647_v1, %s3032_s27 }
 0x8ca   :  { %v649_v18 = vpop.permute.xlu1 %648  ;;  %v651_v19 = vpop.permute.xlu2 %650 }
 0x8cb   :  { %v654_v22 = vmul.f32 %v649_v18, %v644_v3  ;;  %v655_v24 = vmul.f32 %v651_v19, %v645_v14 }
 0x8cd   :  { %v3315_v25 = vadd.f32 %v660_v21, %v654_v22  ;;  %v3317_v26 = vadd.f32 %v661_v23, %v655_v24 }
 0x8cf   :  { %v675_v27 = vrot.slane %v3315_v25, 3  ;;  %v676_v28 = vrot.slane %v3317_v26, 2  ;;  %v779_v24 = vrot.slane %v3315_v25, 7 }
 0x8d1   :  { %v677_v29 = vsel %vm310_vm9, %v676_v28, %v675_v27  ;;  %v780_v28 = vrot.slane %v3317_v26, 7 }
 0x8d2   :  { %678 = vrot.lane.b32.xlu0 %v677_v29, %s3032_s27 }
 0x944   :  { %v679_v30 = vpop.permute.xlu0 %678 }
 0x945   :  { %2522 = vmatmul.msk.f32.vlgmr.msra.gmra.mxu2 %vm145_vm0, %v679_v30 }
 0x946   :  { %1424 = vmatpush.msra.mxu2 %v3157_v2 }
 0x948   :  { %1425 = vmatpush.msra.mxu2 %v3163_v6 }
 0x94a   :  { %1426 = vmatpush.msra.mxu2 %v3165_v7 }
 0x94c   :  { %1427 = vmatpush.msra.mxu2 %v3175_v9 }
 0x9c8   :  { %v699_v31 = vpop.f32.mrf.mxu2 }
 0x9c9   :  { %v700_v32 = vadd.f32 %v3204_v12, %v699_v31 }
 0x9cb   :  { %v703_v33 = vrot.slane %v700_v32, 4  ;;  %v704_v34 = vrot.slane %v700_v32, 5 }
 0x9cd   :  { %749 = vrot.lane.b32.xlu2 %v704_v34, %s3031_s23  ;;  %747 = vrot.lane.b32.xlu1 %v703_v33, %s3031_s23  ;;  %v708_v35 = vadd.f32 %v704_v34, %v3212_v17  ;;  %v707_v39 = vadd.f32 %v703_v33, %v3215_v20 }
 0x9cf   :  { %v2524_v36 = vmul.f32 -1.442695, %v708_v35  ;;  %v2523_v41 = vmul.f32 -1.442695, %v707_v39 }
 0x9d1   :  { %2648 = vpow2.f32 %v2524_v36 }
 0x9d7   :  { %v2649_v37 = vpop.eup %2648 }
 0x9d8   :  { %v716_v38 = vadd.f32 1.0, %v2649_v37 }
 0x9da   :  { %2650 = vrcp.f32 %v716_v38  ;;  %v743_v48 = vand.u32 2147483648, %v716_v38  ;;  %vm737_vm6 = vweird.f32 %v716_v38  ;;  %v741_v49 = vand.u32 2147483647, %v716_v38 }
 0x9db   :  { %2652 = vpow2.f32 %v2523_v41 }
 0x9dc   :  { %v744_v51 = vor.u32 1.1754944e-38, %v743_v48  ;;  %vm742_vm8 = vcmp.eq.f32.partialorder %v741_v49, 8.507059e+37 }
 0x9e0   :  { %v2651_v40 = vpop.eup %2650 }
 0x9e1   :  { %v733_v42 = vmul.f32 %v2651_v40, %v716_v38  ;;  %v2653_v44 = vpop.eup %2652  ;;  %vm738_vm5 = vweird.f32 %v2651_v40 }
 0x9e2   :  { %v715_v46 = vadd.f32 1.0, %v2653_v44  ;;  %vm739_vm7 = vmor %vm737_vm6, %vm738_vm5 }
 0x9e3   :  { %v734_v43 = vsub.f32 1.0, %v733_v42 }
 0x9e4   :  { %2654 = vrcp.f32 %v715_v46  ;;  %v728_v60 = vand.u32 2147483648, %v715_v46  ;;  %vm722_vm11 = vweird.f32 %v715_v46  ;;  %v726_v61 = vand.u32 2147483647, %v715_v46 }
 0x9e5   :  { %v735_v45 = vmul.f32 %v2651_v40, %v734_v43 }
 0x9e6   :  { %v729_v0 = vor.u32 1.1754944e-38, %v728_v60  ;;  %vm727_vm13 = vcmp.eq.f32.partialorder %v726_v61, 8.507059e+37 }
 0x9e7   :  { %v736_v47 = vadd.f32 %v2651_v40, %v735_v45 }
 0x9e9   :  { %v740_v50 = vsel %vm739_vm7, %v2651_v40, %v736_v47 }
 0x9ea   :  { %v745_v53 = vsel %vm742_vm8, %v744_v51, %v740_v50  ;;  %v2655_v55 = vpop.eup %2654 }
 0x9eb   :  { %v718_v56 = vmul.f32 %v2655_v55, %v715_v46  ;;  %vm723_vm10 = vweird.f32 %v2655_v55  ;;  %v768_v27 = vsub.f32 1.0, %v745_v53  ;;  %v784_v33 = vmul.f32 %v780_v28, %v745_v53 }
 0x9ec   :  { %vm724_vm12 = vmor %vm722_vm11, %vm723_vm10 }
 0x9ed   :  { %v719_v57 = vsub.f32 1.0, %v718_v56 }
 0x9ef   :  { %v720_v58 = vmul.f32 %v2655_v55, %v719_v57 }
 0x9f1   :  { %v721_v59 = vadd.f32 %v2655_v55, %v720_v58 }
 0x9f3   :  { %v725_v62 = vsel %vm724_vm12, %v2655_v55, %v721_v59 }
 0x9f4   :  { %v730_v3 = vsel %vm727_vm13, %v729_v0, %v725_v62 }
 0x9f5   :  { %v767_v23 = vsub.f32 1.0, %v730_v3  ;;  %v783_v31 = vmul.f32 %v779_v24, %v730_v3 }
 0xa27   :  { %v750_v52 = vpop.permute.xlu2 %749 }
 0xa28   :  { %v754_v54 = vmul.f32 %v750_v52, %v745_v53 }
 0xa2a   :  { %759 = vrot.lane.b32.xlu1 %v754_v54, %s3031_s23 }
 0xa3f   :  { %v748_v1 = vpop.permute.xlu1 %747 }
 0xa40   :  { %v753_v11 = vmul.f32 %v748_v1, %v730_v3 }
 0xa42   :  { %757 = vrot.lane.b32.xlu0 %v753_v11, %s3031_s23 }
 0xa9c   :  { %v760_v14 = vpop.permute.xlu1 %759 }
 0xa9d   :  { %v764_v15 = vadd.f32 %v760_v14, %v3212_v17 }
 0xa9f   :  { %2656 = vtanh.f32 %v764_v15 }
 0xaa5   :  { %v2657_v18 = vpop.eup %2656 }
 0xaa6   :  { %773 = vrot.lane.b32.xlu0 %v2657_v18, %s3032_s27 }
 0xab4   :  { %v758_v19 = vpop.permute.xlu0 %757 }
 0xab5   :  { %v763_v21 = vadd.f32 %v758_v19, %v3215_v20 }
 0xab7   :  { %2658 = vtanh.f32 %v763_v21 }
 0xabd   :  { %v2659_v22 = vpop.eup %2658 }
 0xabe   :  { %771 = vrot.lane.b32.xlu2 %v2659_v22, %s3032_s27 }
 0xb18   :  { %v772_v29 = vpop.permute.xlu2 %771  ;;  %v774_v30 = vpop.permute.xlu0 %773 }
 0xb19   :  { %v777_v32 = vmul.f32 %v772_v29, %v767_v23  ;;  %v778_v34 = vmul.f32 %v774_v30, %v768_v27 }
 0xb1b   :  { %v3341_v35 = vadd.f32 %v783_v31, %v777_v32  ;;  %v3343_v36 = vadd.f32 %v784_v33, %v778_v34 }
 0xb1d   :  { %v798_v37 = vrot.slane %v3341_v35, 4  ;;  %v799_v38 = vrot.slane %v3343_v36, 3  ;;  %v903_v31 = vrot.slane %v3343_v36, 7  ;;  %v902_v33 = vrot.slane %v3341_v35, 7 }
 0xb1f   :  { %v800_v39 = vsel %vm310_vm9, %v799_v38, %v798_v37 }
 0xb20   :  { %801 = vrot.lane.b32.xlu1 %v800_v39, %s3032_s27 }
 0xb92   :  { %v802_v40 = vpop.permute.xlu1 %801 }
 0xb93   :  { %2525 = vmatmul.msk.f32.vlgmr.msrb.gmra.mxu3 %vm145_vm0, %v802_v40 }
 0xb94   :  { %1546 = vmatpush.msrb.mxu3 %v3157_v2 }
 0xb96   :  { %1547 = vmatpush.msrb.mxu3 %v3163_v6 }
 0xb98   :  { %1548 = vmatpush.msrb.mxu3 %v3165_v7 }
 0xb9a   :  { %1549 = vmatpush.msrb.mxu3 %v3175_v9 }
 0xc16   :  { %v822_v41 = vpop.f32.mrf.mxu3 }
 0xc17   :  { %v823_v42 = vadd.f32 %v3204_v12, %v822_v41 }
 0xc19   :  { %v826_v43 = vrot.slane %v823_v42, 3  ;;  %v827_v44 = vrot.slane %v823_v42, 4 }
 0xc1b   :  { %872 = vrot.lane.b32.xlu0 %v827_v44, %s3031_s23  ;;  %870 = vrot.lane.b32.xlu2 %v826_v43, %s3031_s23  ;;  %v830_v45 = vadd.f32 %v826_v43, %v3215_v20  ;;  %v831_v6 = vadd.f32 %v827_v44, %v3212_v17 }
 0xc1d   :  { %v2526_v46 = vmul.f32 -1.442695, %v830_v45  ;;  %v2527_v9 = vmul.f32 -1.442695, %v831_v6  ;;  %v3379_v6 = vld [vmem:[#allocation5 + $0x10] sm:$0xff] }
 0xc1f   :  { %2660 = vpow2.f32 %v2526_v46 }
 0xc25   :  { %v2661_v2 = vpop.eup %2660 }
 0xc26   :  { %v838_v47 = vadd.f32 1.0, %v2661_v2 }
 0xc28   :  { %2662 = vrcp.f32 %v838_v47  ;;  %v851_v53 = vand.u32 2147483648, %v838_v47  ;;  %vm845_vm15 = vweird.f32 %v838_v47  ;;  %v849_v54 = vand.u32 2147483647, %v838_v47 }
 0xc29   :  { %2664 = vpow2.f32 %v2527_v9  ;;  %v3385_v9 = vld [vmem:[#allocation5] sm:$0xff] }
 0xc2a   :  { %v852_v56 = vor.u32 1.1754944e-38, %v851_v53  ;;  %vm850_vm2 = vcmp.eq.f32.partialorder %v849_v54, 8.507059e+37 }
 0xc2e   :  { %v2663_v7 = vpop.eup %2662 }
 0xc2f   :  { %v841_v48 = vmul.f32 %v2663_v7, %v838_v47  ;;  %v2665_v49 = vpop.eup %2664  ;;  %vm846_vm14 = vweird.f32 %v2663_v7  ;;  %v3376_v47 = vld [vmem:[#allocation5 + $0x18] sm:$0xff] }
 0xc30   :  { %v839_v51 = vadd.f32 1.0, %v2665_v49  ;;  %vm847_vm1 = vmor %vm845_vm15, %vm846_vm14 }
 0xc31   :  { %v842_v12 = vsub.f32 1.0, %v841_v48 }
 0xc32   :  { %2666 = vrcp.f32 %v839_v51  ;;  %v866_v3 = vand.u32 2147483648, %v839_v51  ;;  %vm860_vm4 = vweird.f32 %v839_v51  ;;  %v864_v11 = vand.u32 2147483647, %v839_v51 }
 0xc33   :  { %v843_v50 = vmul.f32 %v2663_v7, %v842_v12  ;;  %v3391_v12 = vld [vmem:[%s3830_s6] ss:$0 sm:$0xff] }
 0xc34   :  { %v867_v15 = vor.u32 1.1754944e-38, %v866_v3  ;;  %vm865_vm6 = vcmp.eq.f32.partialorder %v864_v11, 8.507059e+37 }
 0xc35   :  { %v844_v52 = vadd.f32 %v2663_v7, %v843_v50 }
 0xc37   :  { %v848_v55 = vsel %vm847_vm1, %v2663_v7, %v844_v52  ;;  %v3382_v7 = vld [vmem:[#allocation5 + $0x8] sm:$0xff] }
 0xc38   :  { %v853_v58 = vsel %vm850_vm2, %v852_v56, %v848_v55  ;;  %v2667_v60 = vpop.eup %2666 }
 0xc39   :  { %v856_v61 = vmul.f32 %v2667_v60, %v839_v51  ;;  %vm861_vm3 = vweird.f32 %v2667_v60  ;;  %v890_v32 = vsub.f32 1.0, %v853_v58  ;;  %v906_v40 = vmul.f32 %v902_v33, %v853_v58 }
 0xc3a   :  { %vm862_vm5 = vmor %vm860_vm4, %vm861_vm3 }
 0xc3b   :  { %v857_v62 = vsub.f32 1.0, %v856_v61 }
 0xc3d   :  { %v858_v0 = vmul.f32 %v2667_v60, %v857_v62 }
 0xc3f   :  { %v859_v1 = vadd.f32 %v2667_v60, %v858_v0 }
 0xc41   :  { %v863_v14 = vsel %vm862_vm5, %v2667_v60, %v859_v1 }
 0xc42   :  { %v868_v19 = vsel %vm865_vm6, %v867_v15, %v863_v14 }
 0xc43   :  { %v891_v30 = vsub.f32 1.0, %v868_v19  ;;  %v907_v38 = vmul.f32 %v903_v31, %v868_v19 }
 0xc75   :  { %v871_v57 = vpop.permute.xlu2 %870 }
 0xc76   :  { %v876_v59 = vmul.f32 %v871_v57, %v853_v58 }
 0xc78   :  { %880 = vrot.lane.b32.xlu1 %v876_v59, %s3031_s23 }
 0xc8d   :  { %v873_v18 = vpop.permute.xlu0 %872 }
 0xc8e   :  { %v877_v21 = vmul.f32 %v873_v18, %v868_v19 }
 0xc90   :  { %882 = vrot.lane.b32.xlu2 %v877_v21, %s3031_s23 }
 0xcea   :  { %v883_v22 = vpop.permute.xlu2 %882  ;;  %v881_v23 = vpop.permute.xlu1 %880 }
 0xceb   :  { %v887_v24 = vadd.f32 %v883_v22, %v3212_v17  ;;  %v886_v27 = vadd.f32 %v881_v23, %v3215_v20 }
 0xced   :  { %2668 = vtanh.f32 %v887_v24 }
 0xcee   :  { %2670 = vtanh.f32 %v886_v27 }
 0xcf3   :  { %v2669_v28 = vpop.eup %2668 }
 0xcf4   :  { %v2671_v29 = vpop.eup %2670  ;;  %896 = vrot.lane.b32.xlu1 %v2669_v28, %s3032_s27 }
 0xcf5   :  { %894 = vrot.lane.b32.xlu0 %v2671_v29, %s3032_s27 }
 0xd66   :  { %v897_v34 = vpop.permute.xlu1 %896 }
 0xd67   :  { %v895_v37 = vpop.permute.xlu0 %894  ;;  %v901_v39 = vmul.f32 %v897_v34, %v891_v30 }
 0xd68   :  { %v900_v41 = vmul.f32 %v895_v37, %v890_v32 }
 0xd69   :  { %v3367_v42 = vadd.f32 %v907_v38, %v901_v39 }
 0xd6a   :  { %v3369_v43 = vadd.f32 %v906_v40, %v900_v41 }
 0xd6b   :  { %v922_v44 = vrot.slane %v3367_v42, 4 }
 0xd6c   :  { %v921_v45 = vrot.slane %v3369_v43, 5 }
 0xd6e   :  { %v923_v46 = vsel %vm310_vm9, %v922_v44, %v921_v45 }
 0xd6f   :  { %924 = vrot.lane.b32.xlu2 %v923_v46, %s3032_s27 }
 0xdc9   :  { %v925_v2 = vpop.permute.xlu2 %924 }
 0xdca   :  { %2528 = vmatmul.msk.f32.vlgmr.msrb.gmra.mxu1 %vm145_vm0, %v925_v2  ;;  %v1025_v2 = vrot.slane %v3369_v43, 7 }
 0xdcb   :  { %1790 = vmatpush.msrb.mxu1 %v3376_v47 }
 0xdcd   :  { %1791 = vmatpush.msrb.mxu1 %v3379_v6 }
 0xdcf   :  { %1792 = vmatpush.msrb.mxu1 %v3382_v7 }
 0xdd1   :  { %1793 = vmatpush.msrb.mxu1 %v3385_v9 }
 0xe47   :  { %v945_v48 = vpop.f32.mrf.mxu1 }
 0xe48   :  { %v946_v49 = vadd.f32 %v3391_v12, %v945_v48 }
 0xe4a   :  { %v949_v50 = vrot.slane %v946_v49, 2  ;;  %v950_v51 = vrot.slane %v946_v49, 3  ;;  %v1026_v49 = vrot.slane %v3367_v42, 7 }
 0xe4c   :  { %995 = vrot.lane.b32.xlu1 %v950_v51, %s3031_s23  ;;  %993 = vrot.lane.b32.xlu0 %v949_v50, %s3031_s23  ;;  %v953_v52 = vadd.f32 %v949_v50, %v3215_v20  ;;  %v954_v53 = vadd.f32 %v950_v51, %v3212_v17 }
 0xe4e   :  { %v2529_v54 = vmul.f32 -1.442695, %v953_v52  ;;  %v2530_v55 = vmul.f32 -1.442695, %v954_v53 }
 0xe50   :  { %2672 = vpow2.f32 %v2529_v54 }
 0xe51   :  { %2674 = vpow2.f32 %v2530_v55 }
 0xe56   :  { %v2673_v56 = vpop.eup %2672 }
 0xe57   :  { %v2675_v57 = vpop.eup %2674  ;;  %v961_v58 = vadd.f32 1.0, %v2673_v56 }
 0xe58   :  { %v962_v59 = vadd.f32 1.0, %v2675_v57 }
 0xe59   :  { %2676 = vrcp.f32 %v961_v58  ;;  %vm968_vm10 = vweird.f32 %v961_v58  ;;  %v974_v21 = vand.u32 2147483648, %v961_v58  ;;  %v972_v23 = vand.u32 2147483647, %v961_v58 }
 0xe5a   :  { %2678 = vrcp.f32 %v962_v59  ;;  %v989_v19 = vand.u32 2147483648, %v962_v59  ;;  %vm983_vm11 = vweird.f32 %v962_v59  ;;  %v987_v22 = vand.u32 2147483647, %v962_v59 }
 0xe5b   :  { %v975_v29 = vor.u32 1.1754944e-38, %v974_v21  ;;  %vm973_vm15 = vcmp.eq.f32.partialorder %v972_v23, 8.507059e+37 }
 0xe5c   :  { %v990_v28 = vor.u32 1.1754944e-38, %v989_v19  ;;  %vm988_vm14 = vcmp.eq.f32.partialorder %v987_v22, 8.507059e+37 }
 0xe5f   :  { %v2677_v60 = vpop.eup %2676 }
 0xe60   :  { %v2679_v61 = vpop.eup %2678  ;;  %v964_v0 = vmul.f32 %v2677_v60, %v961_v58  ;;  %vm969_vm7 = vweird.f32 %v2677_v60 }
 0xe61   :  { %v979_v62 = vmul.f32 %v2679_v61, %v962_v59  ;;  %vm984_vm8 = vweird.f32 %v2679_v61  ;;  %vm970_vm12 = vmor %vm968_vm10, %vm969_vm7 }
 0xe62   :  { %v965_v3 = vsub.f32 1.0, %v964_v0  ;;  %vm985_vm13 = vmor %vm983_vm11, %vm984_vm8 }
 0xe63   :  { %v980_v1 = vsub.f32 1.0, %v979_v62 }
 0xe64   :  { %v966_v14 = vmul.f32 %v2677_v60, %v965_v3 }
 0xe65   :  { %v981_v11 = vmul.f32 %v2679_v61, %v980_v1 }
 0xe66   :  { %v967_v18 = vadd.f32 %v2677_v60, %v966_v14 }
 0xe67   :  { %v982_v15 = vadd.f32 %v2679_v61, %v981_v11 }
 0xe68   :  { %v971_v27 = vsel %vm970_vm12, %v2677_v60, %v967_v18 }
 0xe69   :  { %v986_v24 = vsel %vm985_vm13, %v2679_v61, %v982_v15  ;;  %v976_v33 = vsel %vm973_vm15, %v975_v29, %v971_v27 }
 0xe6a   :  { %v991_v31 = vsel %vm988_vm14, %v990_v28, %v986_v24  ;;  %v1013_v46 = vsub.f32 1.0, %v976_v33  ;;  %v1029_v52 = vmul.f32 %v1025_v2, %v976_v33 }
 0xe6b   :  { %v1014_v48 = vsub.f32 1.0, %v991_v31  ;;  %v1030_v54 = vmul.f32 %v1026_v49, %v991_v31 }
 0xebe   :  { %v996_v30 = vpop.permute.xlu1 %995  ;;  %v994_v32 = vpop.permute.xlu0 %993 }
 0xebf   :  { %v1000_v34 = vmul.f32 %v996_v30, %v991_v31  ;;  %v999_v37 = vmul.f32 %v994_v32, %v976_v33 }
 0xec1   :  { %1005 = vrot.lane.b32.xlu0 %v1000_v34, %s3031_s23  ;;  %1003 = vrot.lane.b32.xlu2 %v999_v37, %s3031_s23 }
 0xf1b   :  { %v1004_v38 = vpop.permute.xlu2 %1003 }
 0xf1c   :  { %v1009_v39 = vadd.f32 %v1004_v38, %v3215_v20 }
 0xf1e   :  { %2680 = vtanh.f32 %v1009_v39 }
 0xf24   :  { %v2681_v40 = vpop.eup %2680 }
 0xf25   :  { %1017 = vrot.lane.b32.xlu1 %v2681_v40, %s3032_s27 }
 0xf33   :  { %v1006_v41 = vpop.permute.xlu0 %1005 }
 0xf34   :  { %v1010_v44 = vadd.f32 %v1006_v41, %v3212_v17 }
 0xf36   :  { %2682 = vtanh.f32 %v1010_v44 }
 0xf3c   :  { %v2683_v45 = vpop.eup %2682 }
 0xf3d   :  { %1019 = vrot.lane.b32.xlu2 %v2683_v45, %s3032_s27 }
 0xf97   :  { %v1018_v50 = vpop.permute.xlu1 %1017  ;;  %v1020_v51 = vpop.permute.xlu2 %1019 }
 0xf98   :  { %v1023_v53 = vmul.f32 %v1018_v50, %v1013_v46  ;;  %v1024_v55 = vmul.f32 %v1020_v51, %v1014_v48 }
 0xf9a   :  { %v3406_v56 = vadd.f32 %v1029_v52, %v1023_v53  ;;  %v3408_v57 = vadd.f32 %v1030_v54, %v1024_v55 }
 0xf9c   :  { %v1044_v58 = vrot.slane %v3406_v56, 6  ;;  %v1045_v59 = vrot.slane %v3408_v57, 5 }
 0xf9e   :  { %v1046_v60 = vsel %vm310_vm9, %v1045_v59, %v1044_v58 }
 0xf9f   :  { %1047 = vrot.lane.b32.xlu0 %v1046_v60, %s3032_s27 }
0x1011   :  { %v1048_v61 = vpop.permute.xlu0 %1047 }
0x1012   :  { %2531 = vmatmul.msk.f32.vlgmr.msrb.gmra.mxu2 %vm145_vm0, %v1048_v61 }
0x1013   :  { %1912 = vmatpush.msrb.mxu2 %v3376_v47 }
0x1015   :  { %1913 = vmatpush.msrb.mxu2 %v3379_v6 }
0x1017   :  { %1914 = vmatpush.msrb.mxu2 %v3382_v7 }
0x1019   :  { %1915 = vmatpush.msrb.mxu2 %v3385_v9 }
0x1095   :  { %v1068_v62 = vpop.f32.mrf.mxu2 }
0x1096   :  { %v1069_v0 = vadd.f32 %v3391_v12, %v1068_v62 }
0x1098   :  { %v1072_v1 = vrot.slane %v1069_v0, 1  ;;  %v1073_v3 = vrot.slane %v1069_v0, 2  ;;  %v1148_v0 = vrot.slane %v3406_v56, 7 }
0x109a   :  { %1118 = vrot.lane.b32.xlu2 %v1073_v3, %s3031_s23  ;;  %1116 = vrot.lane.b32.xlu1 %v1072_v1, %s3031_s23  ;;  %v1077_v11 = vadd.f32 %v1073_v3, %v3212_v17  ;;  %v1076_v19 = vadd.f32 %v1072_v1, %v3215_v20  ;;  %v1149_v3 = vrot.slane %v3408_v57, 7 }
0x109c   :  { %v2533_v14 = vmul.f32 -1.442695, %v1077_v11  ;;  %v2532_v22 = vmul.f32 -1.442695, %v1076_v19 }
0x109e   :  { %2684 = vpow2.f32 %v2533_v14 }
0x10a4   :  { %v2685_v15 = vpop.eup %2684 }
0x10a5   :  { %v1085_v18 = vadd.f32 1.0, %v2685_v15 }
0x10a7   :  { %2686 = vrcp.f32 %v1085_v18  ;;  %v1112_v31 = vand.u32 2147483648, %v1085_v18  ;;  %vm1106_vm2 = vweird.f32 %v1085_v18  ;;  %v1110_v32 = vand.u32 2147483647, %v1085_v18 }
0x10a8   :  { %2688 = vpow2.f32 %v2532_v22 }
0x10a9   :  { %v1113_v34 = vor.u32 1.1754944e-38, %v1112_v31  ;;  %vm1111_vm4 = vcmp.eq.f32.partialorder %v1110_v32, 8.507059e+37  ;;  %v2819_v32 = vld [vmem:[%s3828_s4] ss:$0 sm:$0xff]  ;;  %s2461_s4 = sshll.u32 %s3839_s15, 4  ;;  %s3036_s15 = smov [#allocation14]   ;;  %s2462_s4 = int_to_ptr.hbm [resolvable:$true] %s2461_s4 }
0x10aa   :  { %s2484_s22 = sshll.u32 %s3036_s15, 4  ;;  %s2485_s22 = int_to_ptr.vmem [resolvable:$true] %s2484_s22 }
0x10ad   :  { %v2687_v21 = vpop.eup %2686 }
0x10ae   :  { %v1102_v23 = vmul.f32 %v2687_v21, %v1085_v18  ;;  %v2689_v27 = vpop.eup %2688  ;;  %vm1107_vm1 = vweird.f32 %v2687_v21 }
0x10af   :  { %v1084_v29 = vadd.f32 1.0, %v2689_v27  ;;  %vm1108_vm3 = vmor %vm1106_vm2, %vm1107_vm1  ;;  %v134_v27 = vld [vmem:[%s3845_s20 + $0x8] sm:$0xff] }
0x10b0   :  { %v1103_v24 = vsub.f32 1.0, %v1102_v23  ;;  %2508 = vmatmul.msk.f32.gmra.mxu0 %vm145_vm0, %v134_v27 }
0x10b1   :  { %2690 = vrcp.f32 %v1084_v29  ;;  %v1097_v2 = vand.u32 2147483648, %v1084_v29  ;;  %vm1091_vm6 = vweird.f32 %v1084_v29  ;;  %v1095_v48 = vand.u32 2147483647, %v1084_v29 }
0x10b2   :  { %v1104_v28 = vmul.f32 %v2687_v21, %v1103_v24 }
0x10b3   :  { %v1098_v50 = vor.u32 1.1754944e-38, %v1097_v2  ;;  %vm1096_vm8 = vcmp.eq.f32.partialorder %v1095_v48, 8.507059e+37 }
0x10b4   :  { %v1105_v30 = vadd.f32 %v2687_v21, %v1104_v28 }
0x10b6   :  { %v1109_v33 = vsel %vm1108_vm3, %v2687_v21, %v1105_v30 }
0x10b7   :  { %v1114_v38 = vsel %vm1111_vm4, %v1113_v34, %v1109_v33  ;;  %v2691_v40 = vpop.eup %2690 }
0x10b8   :  { %v1087_v41 = vmul.f32 %v2691_v40, %v1084_v29  ;;  %vm1092_vm5 = vweird.f32 %v2691_v40  ;;  %v1137_v1 = vsub.f32 1.0, %v1114_v38  ;;  %v1153_v18 = vmul.f32 %v1149_v3, %v1114_v38 }
0x10b9   :  { %vm1093_vm7 = vmor %vm1091_vm6, %vm1092_vm5 }
0x10ba   :  { %v1088_v44 = vsub.f32 1.0, %v1087_v41 }
0x10bc   :  { %v1089_v45 = vmul.f32 %v2691_v40, %v1088_v44 }
0x10be   :  { %v1090_v46 = vadd.f32 %v2691_v40, %v1089_v45 }
0x10c0   :  { %v1094_v49 = vsel %vm1093_vm7, %v2691_v40, %v1090_v46 }
0x10c1   :  { %v1099_v52 = vsel %vm1096_vm8, %v1098_v50, %v1094_v49 }
0x10c2   :  { %v1136_v62 = vsub.f32 1.0, %v1099_v52 }
0x10f4   :  { %v1119_v37 = vpop.permute.xlu2 %1118 }
0x10f5   :  { %v1123_v39 = vmul.f32 %v1119_v37, %v1114_v38 }
0x10f7   :  { %1128 = vrot.lane.b32.xlu1 %v1123_v39, %s3031_s23 }
0x110c   :  { %v1117_v51 = vpop.permute.xlu1 %1116 }
0x110d   :  { %v1122_v53 = vmul.f32 %v1117_v51, %v1099_v52 }
0x110f   :  { %1126 = vrot.lane.b32.xlu0 %v1122_v53, %s3031_s23 }
0x112d   :  { %v178_v33 = vpop.f32.mrf.mxu0 }
0x112e   :  { %v3461_v37 = vadd.f32 %v2819_v32, %v178_v33 }
0x1169   :  { %v1129_v54 = vpop.permute.xlu1 %1128 }
0x116a   :  { %v1133_v55 = vadd.f32 %v1129_v54, %v3212_v17  ;;  %v1152_v17 = vmul.f32 %v1148_v0, %v1099_v52 }
0x116c   :  { %2692 = vtanh.f32 %v1133_v55 }
0x1172   :  { %v2693_v58 = vpop.eup %2692 }
0x1173   :  { %1142 = vrot.lane.b32.xlu0 %v2693_v58, %s3032_s27 }
0x1181   :  { %v1127_v59 = vpop.permute.xlu0 %1126 }
0x1182   :  { %v1132_v60 = vadd.f32 %v1127_v59, %v3215_v20 }
0x1184   :  { %2694 = vtanh.f32 %v1132_v60 }
0x118a   :  { %v2695_v61 = vpop.eup %2694 }
0x118b   :  { %1140 = vrot.lane.b32.xlu2 %v2695_v61, %s3032_s27 }
0x11e5   :  { %v1141_v11 = vpop.permute.xlu2 %1140  ;;  %v1143_v14 = vpop.permute.xlu0 %1142 }
0x11e6   :  { %v1146_v15 = vmul.f32 %v1141_v11, %v1136_v62  ;;  %v1147_v19 = vmul.f32 %v1143_v14, %v1137_v1 }
0x11e8   :  { %v3432_v21 = vadd.f32 %v1152_v17, %v1146_v15  ;;  %v3434_v22 = vadd.f32 %v1153_v18, %v1147_v19 }
0x11ea   :  { %v1167_v20 = vrot.slane %v3432_v21, 7  ;;  %v1168_v23 = vrot.slane %v3434_v22, 6 }
0x11ec   :  { %v1169_v24 = vsel %vm310_vm9, %v1168_v23, %v1167_v20 }
0x11ed   :  { %1170 = vrot.lane.b32.xlu1 %v1169_v24, %s3032_s27 }
0x125f   :  { %v1171_v28 = vpop.permute.xlu1 %1170 }
0x1260   :  { %2534 = vmatmul.msk.f32.vlgmr.msra.gmra.mxu3 %vm145_vm0, %v1171_v28 }
0x1261   :  { %2034 = vmatpush.msra.mxu3 %v3376_v47  ;;  %v3458_v47 = vadd.f32 %v2819_v32, %v3247_v13 }
0x1263   :  { %2035 = vmatpush.msra.mxu3 %v3379_v6 }
0x1265   :  { %2036 = vmatpush.msra.mxu3 %v3382_v7 }
0x1267   :  { %2037 = vmatpush.msra.mxu3 %v3385_v9 }
0x12e3   :  { %v1191_v29 = vpop.f32.mrf.mxu3 }
0x12e4   :  { %v1192_v30 = vadd.f32 %v3391_v12, %v1191_v29 }
0x12e6   :  { %1238 = vrot.lane.b32.xlu0 %v1192_v30, %s3031_s23  ;;  %v1195_v31 = vrot.slane %v1192_v30, 1  ;;  %v1198_v38 = vadd.f32 %v1192_v30, %v3461_v37 }
0x12e8   :  { %1240 = vrot.lane.b32.xlu2 %v1195_v31, %s3031_s23  ;;  %v1199_v6 = vadd.f32 %v1195_v31, %v3458_v47  ;;  %v2535_v39 = vmul.f32 -1.442695, %v1198_v38  ;;  %v1270_v31 = vrot.slane %v3434_v22, 7 }
0x12ea   :  { %v2536_v7 = vmul.f32 -1.442695, %v1199_v6 }
0x12ec   :  { %2696 = vpow2.f32 %v2536_v7 }
0x12f2   :  { %v2697_v9 = vpop.eup %2696 }
0x12f3   :  { %v1207_v34 = vadd.f32 1.0, %v2697_v9 }
0x12f5   :  { %2698 = vrcp.f32 %v1207_v34  ;;  %v1234_v48 = vand.u32 2147483648, %v1207_v34  ;;  %vm1228_vm11 = vweird.f32 %v1207_v34  ;;  %v1232_v49 = vand.u32 2147483647, %v1207_v34 }
0x12f6   :  { %2700 = vpow2.f32 %v2535_v39 }
0x12f7   :  { %v1235_v51 = vor.u32 1.1754944e-38, %v1234_v48  ;;  %vm1233_vm13 = vcmp.eq.f32.partialorder %v1232_v49, 8.507059e+37 }
0x12fb   :  { %v2699_v40 = vpop.eup %2698 }
0x12fc   :  { %v1224_v41 = vmul.f32 %v2699_v40, %v1207_v34  ;;  %v2701_v45 = vpop.eup %2700  ;;  %vm1229_vm10 = vweird.f32 %v2699_v40 }
0x12fd   :  { %v1206_v46 = vadd.f32 1.0, %v2701_v45  ;;  %vm1230_vm12 = vmor %vm1228_vm11, %vm1229_vm10 }
0x12fe   :  { %v1225_v44 = vsub.f32 1.0, %v1224_v41 }
0x12ff   :  { %2702 = vrcp.f32 %v1206_v46  ;;  %v1219_v62 = vand.u32 2147483648, %v1206_v46  ;;  %vm1213_vm15 = vweird.f32 %v1206_v46  ;;  %v1217_v0 = vand.u32 2147483647, %v1206_v46 }
0x1300   :  { %v1226_v13 = vmul.f32 %v2699_v40, %v1225_v44 }
0x1301   :  { %v1220_v3 = vor.u32 1.1754944e-38, %v1219_v62  ;;  %vm1218_vm2 = vcmp.eq.f32.partialorder %v1217_v0, 8.507059e+37 }
0x1302   :  { %v1227_v2 = vadd.f32 %v2699_v40, %v1226_v13 }
0x1304   :  { %v1231_v50 = vsel %vm1230_vm12, %v2699_v40, %v1227_v2 }
0x1305   :  { %v2703_v52 = vpop.eup %2702  ;;  %v1236_v54 = vsel %vm1233_vm13, %v1235_v51, %v1231_v50 }
0x1306   :  { %v1209_v58 = vmul.f32 %v2703_v52, %v1206_v46  ;;  %vm1214_vm14 = vweird.f32 %v2703_v52  ;;  %v1259_v30 = vsub.f32 1.0, %v1236_v54  ;;  %v1274_v7 = vmul.f32 %v1270_v31, %v1236_v54 }
0x1307   :  { %vm1215_vm1 = vmor %vm1213_vm15, %vm1214_vm14 }
0x1308   :  { %v1210_v59 = vsub.f32 1.0, %v1209_v58 }
0x130a   :  { %v1211_v60 = vmul.f32 %v2703_v52, %v1210_v59 }
0x130c   :  { %v1212_v61 = vadd.f32 %v2703_v52, %v1211_v60 }
0x130e   :  { %v1216_v1 = vsel %vm1215_vm1, %v2703_v52, %v1212_v61 }
0x130f   :  { %v1221_v14 = vsel %vm1218_vm2, %v1220_v3, %v1216_v1 }
0x1310   :  { %v1258_v29 = vsub.f32 1.0, %v1221_v14  ;;  %v1273_v33 = vmul.f32 %v1221_v14, %v1167_v20 }
0x1342   :  { %v1241_v53 = vpop.permute.xlu2 %1240 }
0x1343   :  { %v1245_v55 = vmul.f32 %v1241_v53, %v1236_v54 }
0x1345   :  { %1250 = vrot.lane.b32.xlu1 %v1245_v55, %s3031_s23 }
0x1358   :  { %v1239_v11 = vpop.permute.xlu0 %1238 }
0x1359   :  { %v1244_v17 = vmul.f32 %v1239_v11, %v1221_v14 }
0x135b   :  { %1248 = vrot.lane.b32.xlu2 %v1244_v17, %s3031_s23 }
0x13b5   :  { %v1249_v15 = vpop.permute.xlu2 %1248 }
0x13b6   :  { %v1254_v18 = vadd.f32 %v1249_v15, %v3461_v37 }
0x13b7   :  { %v1251_v19 = vpop.permute.xlu1 %1250 }
0x13b8   :  { %2704 = vtanh.f32 %v1254_v18  ;;  %v1255_v23 = vadd.f32 %v1251_v19, %v3458_v47 }
0x13ba   :  { %2706 = vtanh.f32 %v1255_v23 }
0x13be   :  { %v2705_v24 = vpop.eup %2704 }
0x13bf   :  { %1262 = vrot.lane.b32.xlu1 %v2705_v24, %s3032_s27 }
0x13c0   :  { %v2707_v27 = vpop.eup %2706 }
0x13c1   :  { %1264 = vrot.lane.b32.xlu0 %v2707_v27, %s3032_s27 }
0x1431   :  { %v1263_v28 = vpop.permute.xlu1 %1262 }
0x1432   :  { %v1268_v6 = vmul.f32 %v1263_v28, %v1258_v29 }
0x1433   :  { %v1265_v32 = vpop.permute.xlu0 %1264 }
0x1434   :  { %v1269_v9 = vmul.f32 %v1265_v32, %v1259_v30  ;;  %v3475_v38 = vadd.f32 %v1273_v33, %v1268_v6 }
0x1436   :  { %v3473_v34 = vadd.f32 %v1274_v7, %v1269_v9 }
0x1438   :  { %v1287_v39 = vrot.slane %v3473_v34, 7 }
0x143a   :  { %v1288_v40 = vsel %vm310_vm9, %v1287_v39, %v3475_v38 }
0x143b   :  { %1289 = vrot.lane.b32.xlu2 %v1288_v40, %s3032_s27 }
0x1495   :  { %v1290_v41 = vpop.permute.xlu2 %1289 }
0x1496   :  { %2537 = vmatmul.msk.f32.vlgmr.msra.gmra.mxu1 %vm145_vm0, %v1290_v41 }
0x1513   :  { %v1310_v44 = vpop.f32.mrf.mxu1 }
0x1514   :  { %v1311_v45 = vadd.f32 %v3391_v12, %v1310_v44 }
0x1516   :  { %1359 = vrot.lane.b32.xlu1 %v1311_v45, %s3031_s23  ;;  %v1314_v20 = vrot.slane %v1311_v45, 7  ;;  %v1318_v13 = vadd.f32 %v1311_v45, %v3458_v47 }
0x1518   :  { %1357 = vrot.lane.b32.xlu0 %v1314_v20, %s3031_s23  ;;  %v1317_v46 = vadd.f32 %v1314_v20, %v3461_v37  ;;  %v2539_v2 = vmul.f32 -1.442695, %v1318_v13  ;;  %v1389_v20 = vrot.slane %v3475_v38, 7 }
0x151a   :  { %v2538_v48 = vmul.f32 -1.442695, %v1317_v46  ;;  %2708 = vpow2.f32 %v2539_v2 }
0x151c   :  { %2710 = vpow2.f32 %v2538_v48 }
0x1520   :  { %v2709_v49 = vpop.eup %2708 }
0x1521   :  { %v1326_v51 = vadd.f32 1.0, %v2709_v49 }
0x1522   :  { %v2711_v50 = vpop.eup %2710 }
0x1523   :  { %v1325_v52 = vadd.f32 1.0, %v2711_v50  ;;  %2712 = vrcp.f32 %v1326_v51  ;;  %v1353_v1 = vand.u32 2147483648, %v1326_v51  ;;  %vm1347_vm4 = vweird.f32 %v1326_v51 }
0x1524   :  { %v1351_v3 = vand.u32 2147483647, %v1326_v51 }
0x1525   :  { %2714 = vrcp.f32 %v1325_v52  ;;  %v1338_v14 = vand.u32 2147483648, %v1325_v52  ;;  %vm1332_vm7 = vweird.f32 %v1325_v52  ;;  %v1336_v15 = vand.u32 2147483647, %v1325_v52 }
0x1526   :  { %v1354_v18 = vor.u32 1.1754944e-38, %v1353_v1  ;;  %vm1352_vm10 = vcmp.eq.f32.partialorder %v1351_v3, 8.507059e+37 }
0x1527   :  { %v1339_v27 = vor.u32 1.1754944e-38, %v1338_v14  ;;  %vm1337_vm11 = vcmp.eq.f32.partialorder %v1336_v15, 8.507059e+37 }
0x1529   :  { %v2713_v53 = vpop.eup %2712 }
0x152a   :  { %v1343_v55 = vmul.f32 %v2713_v53, %v1326_v51  ;;  %vm1348_vm3 = vweird.f32 %v2713_v53 }
0x152b   :  { %v2715_v54 = vpop.eup %2714  ;;  %vm1349_vm6 = vmor %vm1347_vm4, %vm1348_vm3 }
0x152c   :  { %v1328_v58 = vmul.f32 %v2715_v54, %v1325_v52  ;;  %v1344_v59 = vsub.f32 1.0, %v1343_v55  ;;  %vm1333_vm5 = vweird.f32 %v2715_v54 }
0x152d   :  { %vm1334_vm8 = vmor %vm1332_vm7, %vm1333_vm5 }
0x152e   :  { %v1329_v60 = vsub.f32 1.0, %v1328_v58  ;;  %v1345_v61 = vmul.f32 %v2713_v53, %v1344_v59 }
0x1530   :  { %v1330_v62 = vmul.f32 %v2715_v54, %v1329_v60  ;;  %v1346_v0 = vadd.f32 %v2713_v53, %v1345_v61 }
0x1532   :  { %v1331_v11 = vadd.f32 %v2715_v54, %v1330_v62  ;;  %v1350_v17 = vsel %vm1349_vm6, %v2713_v53, %v1346_v0 }
0x1533   :  { %v1355_v24 = vsel %vm1352_vm10, %v1354_v18, %v1350_v17 }
0x1534   :  { %v1335_v19 = vsel %vm1334_vm8, %v2715_v54, %v1331_v11  ;;  %v1378_v44 = vsub.f32 1.0, %v1355_v24  ;;  %v1393_v49 = vmul.f32 %v1355_v24, %v1287_v39 }
0x1535   :  { %v1340_v30 = vsel %vm1337_vm11, %v1339_v27, %v1335_v19 }
0x1536   :  { %v1377_v45 = vsub.f32 1.0, %v1340_v30  ;;  %v1392_v2 = vmul.f32 %v1389_v20, %v1340_v30 }
0x1588   :  { %v1360_v23 = vpop.permute.xlu1 %1359 }
0x1589   :  { %v1364_v28 = vmul.f32 %v1360_v23, %v1355_v24 }
0x158a   :  { %v1358_v29 = vpop.permute.xlu0 %1357 }
0x158b   :  { %v1363_v31 = vmul.f32 %v1358_v29, %v1340_v30  ;;  %1369 = vrot.lane.b32.xlu0 %v1364_v28, %s3031_s23 }
0x158d   :  { %1367 = vrot.lane.b32.xlu2 %v1363_v31, %s3031_s23 }
0x15e7   :  { %v1368_v32 = vpop.permute.xlu2 %1367 }
0x15e8   :  { %v1373_v6 = vadd.f32 %v1368_v32, %v3461_v37 }
0x15ea   :  { %2716 = vtanh.f32 %v1373_v6 }
0x15f0   :  { %v2717_v7 = vpop.eup %2716 }
0x15f1   :  { %1381 = vrot.lane.b32.xlu1 %v2717_v7, %s3032_s27 }
0x15fd   :  { %v1370_v9 = vpop.permute.xlu0 %1369 }
0x15fe   :  { %v1374_v33 = vadd.f32 %v1370_v9, %v3458_v47 }
0x1600   :  { %2718 = vtanh.f32 %v1374_v33 }
0x1606   :  { %v2719_v40 = vpop.eup %2718 }
0x1607   :  { %1383 = vrot.lane.b32.xlu2 %v2719_v40, %s3032_s27 }
0x1661   :  { %v1384_v41 = vpop.permute.xlu2 %1383 }
0x1662   :  { %v1388_v46 = vmul.f32 %v1384_v41, %v1378_v44 }
0x1663   :  { %v1382_v13 = vpop.permute.xlu1 %1381 }
0x1664   :  { %v1387_v48 = vmul.f32 %v1382_v13, %v1377_v45  ;;  %v3500_v51 = vadd.f32 %v1393_v49, %v1388_v46 }
0x1666   :  { %v3498_v50 = vadd.f32 %v1392_v2, %v1387_v48 }
0x1668   :  { %v1406_v52 = vrot.slane %v3498_v50, 1 }
0x166a   :  { %v1407_v53 = vsel %vm310_vm9, %v3500_v51, %v1406_v52 }
0x166b   :  { %1408 = vrot.lane.b32.xlu0 %v1407_v53, %s3032_s27 }
0x16dd   :  { %v1409_v54 = vpop.permute.xlu0 %1408 }
0x16de   :  { %2540 = vmatmul.msk.f32.vlgmr.msra.gmra.mxu2 %vm145_vm0, %v1409_v54 }
0x1761   :  { %v1429_v55 = vpop.f32.mrf.mxu2 }
0x1762   :  { %v1430_v58 = vadd.f32 %v3391_v12, %v1429_v55 }
0x1764   :  { %v1433_v59 = vrot.slane %v1430_v58, 6  ;;  %v1434_v60 = vrot.slane %v1430_v58, 7 }
0x1766   :  { %1479 = vrot.lane.b32.xlu2 %v1434_v60, %s3031_s23  ;;  %1477 = vrot.lane.b32.xlu1 %v1433_v59, %s3031_s23  ;;  %v1438_v39 = vadd.f32 %v1434_v60, %v3458_v47  ;;  %v1437_v1 = vadd.f32 %v1433_v59, %v3461_v37  ;;  %v1509_v59 = vrot.slane %v3498_v50, 7 }
0x1768   :  { %v2542_v61 = vmul.f32 -1.442695, %v1438_v39  ;;  %v2541_v11 = vmul.f32 -1.442695, %v1437_v1  ;;  %v1510_v39 = vrot.slane %v3500_v51, 7 }
0x176a   :  { %2720 = vpow2.f32 %v2542_v61 }
0x1770   :  { %v2721_v62 = vpop.eup %2720 }
0x1771   :  { %v1446_v0 = vadd.f32 1.0, %v2721_v62 }
0x1773   :  { %2722 = vrcp.f32 %v1446_v0  ;;  %v1473_v24 = vand.u32 2147483648, %v1446_v0  ;;  %vm1467_vm13 = vweird.f32 %v1446_v0  ;;  %v1471_v27 = vand.u32 2147483647, %v1446_v0 }
0x1774   :  { %2724 = vpow2.f32 %v2541_v11 }
0x1775   :  { %v1474_v29 = vor.u32 1.1754944e-38, %v1473_v24  ;;  %vm1472_vm15 = vcmp.eq.f32.partialorder %v1471_v27, 8.507059e+37 }
0x1779   :  { %v2723_v3 = vpop.eup %2722 }
0x177a   :  { %v1463_v14 = vmul.f32 %v2723_v3, %v1446_v0  ;;  %v2725_v15 = vpop.eup %2724  ;;  %vm1468_vm12 = vweird.f32 %v2723_v3 }
0x177b   :  { %v1445_v19 = vadd.f32 1.0, %v2725_v15  ;;  %vm1469_vm14 = vmor %vm1467_vm13, %vm1468_vm12 }
0x177c   :  { %v1464_v17 = vsub.f32 1.0, %v1463_v14 }
0x177d   :  { %2726 = vrcp.f32 %v1445_v19  ;;  %v1458_v41 = vand.u32 2147483648, %v1445_v19  ;;  %vm1452_vm2 = vweird.f32 %v1445_v19  ;;  %v1456_v44 = vand.u32 2147483647, %v1445_v19 }
0x177e   :  { %v1465_v18 = vmul.f32 %v2723_v3, %v1464_v17 }
0x177f   :  { %v1459_v20 = vor.u32 1.1754944e-38, %v1458_v41  ;;  %vm1457_vm4 = vcmp.eq.f32.partialorder %v1456_v44, 8.507059e+37 }
0x1780   :  { %v1466_v23 = vadd.f32 %v2723_v3, %v1465_v18 }
0x1782   :  { %v1470_v28 = vsel %vm1469_vm14, %v2723_v3, %v1466_v23 }
0x1783   :  { %v1475_v31 = vsel %vm1472_vm15, %v1474_v29, %v1470_v28  ;;  %v2727_v6 = vpop.eup %2726 }
0x1784   :  { %v1448_v7 = vmul.f32 %v2727_v6, %v1445_v19  ;;  %vm1453_vm1 = vweird.f32 %v2727_v6  ;;  %v1498_v60 = vsub.f32 1.0, %v1475_v31  ;;  %v1514_v3 = vmul.f32 %v1510_v39, %v1475_v31 }
0x1785   :  { %vm1454_vm3 = vmor %vm1452_vm2, %vm1453_vm1 }
0x1786   :  { %v1449_v9 = vsub.f32 1.0, %v1448_v7 }
0x1788   :  { %v1450_v33 = vmul.f32 %v2727_v6, %v1449_v9 }
0x178a   :  { %v1451_v40 = vadd.f32 %v2727_v6, %v1450_v33 }
0x178c   :  { %v1455_v45 = vsel %vm1454_vm3, %v2727_v6, %v1451_v40 }
0x178d   :  { %v1460_v46 = vsel %vm1457_vm4, %v1459_v20, %v1455_v45 }
0x178e   :  { %v1497_v58 = vsub.f32 1.0, %v1460_v46  ;;  %v1513_v0 = vmul.f32 %v1509_v59, %v1460_v46 }
0x17c0   :  { %v1480_v30 = vpop.permute.xlu2 %1479 }
0x17c1   :  { %v1484_v32 = vmul.f32 %v1480_v30, %v1475_v31 }
0x17c3   :  { %1489 = vrot.lane.b32.xlu1 %v1484_v32, %s3031_s23 }
0x17d8   :  { %v1478_v13 = vpop.permute.xlu1 %1477 }
0x17d9   :  { %v1483_v2 = vmul.f32 %v1478_v13, %v1460_v46 }
0x17db   :  { %1487 = vrot.lane.b32.xlu0 %v1483_v2, %s3031_s23 }
0x1835   :  { %v1490_v48 = vpop.permute.xlu1 %1489 }
0x1836   :  { %v1494_v49 = vadd.f32 %v1490_v48, %v3458_v47 }
0x1838   :  { %2728 = vtanh.f32 %v1494_v49 }
0x183e   :  { %v2729_v52 = vpop.eup %2728 }
0x183f   :  { %1503 = vrot.lane.b32.xlu0 %v2729_v52, %s3032_s27 }
0x184d   :  { %v1488_v53 = vpop.permute.xlu0 %1487 }
0x184e   :  { %v1493_v54 = vadd.f32 %v1488_v53, %v3461_v37 }
0x1850   :  { %2730 = vtanh.f32 %v1493_v54 }
0x1856   :  { %v2731_v55 = vpop.eup %2730 }
0x1857   :  { %1501 = vrot.lane.b32.xlu2 %v2731_v55, %s3032_s27 }
0x18b1   :  { %v1502_v61 = vpop.permute.xlu2 %1501  ;;  %v1504_v62 = vpop.permute.xlu0 %1503 }
0x18b2   :  { %v1507_v1 = vmul.f32 %v1502_v61, %v1497_v58  ;;  %v1508_v11 = vmul.f32 %v1504_v62, %v1498_v60 }
0x18b4   :  { %v3520_v14 = vadd.f32 %v1513_v0, %v1507_v1  ;;  %v3522_v17 = vadd.f32 %v1514_v3, %v1508_v11 }
0x18b6   :  { %v1527_v15 = vrot.slane %v3520_v14, 2  ;;  %v1528_v18 = vrot.slane %v3522_v17, 1 }
0x18b8   :  { %v1529_v19 = vsel %vm310_vm9, %v1528_v18, %v1527_v15 }
0x18b9   :  { %1530 = vrot.lane.b32.xlu1 %v1529_v19, %s3032_s27 }
0x192b   :  { %v1531_v23 = vpop.permute.xlu1 %1530 }
0x192c   :  { %2543 = vmatmul.msk.f32.vlgmr.msrb.gmra.mxu3 %vm145_vm0, %v1531_v23 }
0x19af   :  { %v1551_v24 = vpop.f32.mrf.mxu3 }
0x19b0   :  { %v1552_v27 = vadd.f32 %v3391_v12, %v1551_v24 }
0x19b2   :  { %v1555_v28 = vrot.slane %v1552_v27, 5  ;;  %v1556_v29 = vrot.slane %v1552_v27, 6 }
0x19b4   :  { %1601 = vrot.lane.b32.xlu0 %v1556_v29, %s3031_s23  ;;  %1599 = vrot.lane.b32.xlu2 %v1555_v28, %s3031_s23  ;;  %v1559_v30 = vadd.f32 %v1555_v28, %v3461_v37  ;;  %v1560_v7 = vadd.f32 %v1556_v29, %v3458_v47 }
0x19b6   :  { %v2544_v31 = vmul.f32 -1.442695, %v1559_v30  ;;  %v2545_v33 = vmul.f32 -1.442695, %v1560_v7  ;;  %v1632_v30 = vrot.slane %v3522_v17, 7 }
0x19b8   :  { %2732 = vpow2.f32 %v2544_v31 }
0x19be   :  { %v2733_v32 = vpop.eup %2732 }
0x19bf   :  { %v1567_v6 = vadd.f32 1.0, %v2733_v32  ;;  %v1631_v32 = vrot.slane %v3520_v14, 7 }
0x19c1   :  { %2734 = vrcp.f32 %v1567_v6  ;;  %v1580_v46 = vand.u32 2147483648, %v1567_v6  ;;  %vm1574_vm6 = vweird.f32 %v1567_v6  ;;  %v1578_v2 = vand.u32 2147483647, %v1567_v6 }
0x19c2   :  { %2736 = vpow2.f32 %v2545_v33 }
0x19c3   :  { %v1581_v49 = vor.u32 1.1754944e-38, %v1580_v46  ;;  %vm1579_vm8 = vcmp.eq.f32.partialorder %v1578_v2, 8.507059e+37 }
0x19c7   :  { %v2735_v9 = vpop.eup %2734 }
0x19c8   :  { %v1570_v40 = vmul.f32 %v2735_v9, %v1567_v6  ;;  %v2737_v44 = vpop.eup %2736  ;;  %vm1575_vm5 = vweird.f32 %v2735_v9 }
0x19c9   :  { %v1568_v20 = vadd.f32 1.0, %v2737_v44  ;;  %vm1576_vm7 = vmor %vm1574_vm6, %vm1575_vm5 }
0x19ca   :  { %v1571_v41 = vsub.f32 1.0, %v1570_v40 }
0x19cb   :  { %2738 = vrcp.f32 %v1568_v20  ;;  %v1595_v61 = vand.u32 2147483648, %v1568_v20  ;;  %vm1589_vm11 = vweird.f32 %v1568_v20  ;;  %v1593_v62 = vand.u32 2147483647, %v1568_v20 }
0x19cc   :  { %v1572_v45 = vmul.f32 %v2735_v9, %v1571_v41 }
0x19cd   :  { %v1596_v1 = vor.u32 1.1754944e-38, %v1595_v61  ;;  %vm1594_vm13 = vcmp.eq.f32.partialorder %v1593_v62, 8.507059e+37 }
0x19ce   :  { %v1573_v13 = vadd.f32 %v2735_v9, %v1572_v45 }
0x19d0   :  { %v1577_v48 = vsel %vm1576_vm7, %v2735_v9, %v1573_v13 }
0x19d1   :  { %v1582_v53 = vsel %vm1579_vm8, %v1581_v49, %v1577_v48  ;;  %v2739_v55 = vpop.eup %2738 }
0x19d2   :  { %v1585_v58 = vmul.f32 %v2739_v55, %v1568_v20  ;;  %vm1590_vm10 = vweird.f32 %v2739_v55  ;;  %v1619_v31 = vsub.f32 1.0, %v1582_v53  ;;  %v1635_v40 = vmul.f32 %v1631_v32, %v1582_v53 }
0x19d3   :  { %vm1591_vm12 = vmor %vm1589_vm11, %vm1590_vm10 }
0x19d4   :  { %v1586_v59 = vsub.f32 1.0, %v1585_v58 }
0x19d6   :  { %v1587_v60 = vmul.f32 %v2739_v55, %v1586_v59 }
0x19d8   :  { %v1588_v39 = vadd.f32 %v2739_v55, %v1587_v60 }
0x19da   :  { %v1592_v0 = vsel %vm1591_vm12, %v2739_v55, %v1588_v39 }
0x19db   :  { %v1597_v11 = vsel %vm1594_vm13, %v1596_v1, %v1592_v0 }
0x19dc   :  { %v1620_v29 = vsub.f32 1.0, %v1597_v11  ;;  %v1636_v9 = vmul.f32 %v1632_v30, %v1597_v11 }
0x1a0e   :  { %v1600_v52 = vpop.permute.xlu2 %1599 }
0x1a0f   :  { %v1605_v54 = vmul.f32 %v1600_v52, %v1582_v53 }
0x1a11   :  { %1609 = vrot.lane.b32.xlu1 %v1605_v54, %s3031_s23 }
0x1a26   :  { %v1602_v3 = vpop.permute.xlu0 %1601 }
0x1a27   :  { %v1606_v15 = vmul.f32 %v1602_v3, %v1597_v11 }
0x1a29   :  { %1611 = vrot.lane.b32.xlu2 %v1606_v15, %s3031_s23 }
0x1a83   :  { %v1612_v18 = vpop.permute.xlu2 %1611  ;;  %v1610_v19 = vpop.permute.xlu1 %1609 }
0x1a84   :  { %v1616_v23 = vadd.f32 %v1612_v18, %v3458_v47  ;;  %v1615_v24 = vadd.f32 %v1610_v19, %v3461_v37 }
0x1a86   :  { %2740 = vtanh.f32 %v1616_v23 }
0x1a87   :  { %2742 = vtanh.f32 %v1615_v24 }
0x1a8c   :  { %v2741_v27 = vpop.eup %2740 }
0x1a8d   :  { %v2743_v28 = vpop.eup %2742  ;;  %1625 = vrot.lane.b32.xlu1 %v2741_v27, %s3032_s27 }
0x1a8e   :  { %1623 = vrot.lane.b32.xlu0 %v2743_v28, %s3032_s27 }
0x1aff   :  { %v1626_v6 = vpop.permute.xlu1 %1625 }
0x1b00   :  { %v1624_v7 = vpop.permute.xlu0 %1623  ;;  %v1630_v33 = vmul.f32 %v1626_v6, %v1620_v29 }
0x1b01   :  { %v1629_v41 = vmul.f32 %v1624_v7, %v1619_v31 }
0x1b02   :  { %v3542_v44 = vadd.f32 %v1636_v9, %v1630_v33 }
0x1b03   :  { %v3544_v45 = vadd.f32 %v1635_v40, %v1629_v41 }
0x1b04   :  { %v1650_v20 = vrot.slane %v3542_v44, 2 }
0x1b05   :  { %v1649_v13 = vrot.slane %v3544_v45, 3 }
0x1b07   :  { %v1651_v46 = vsel %vm310_vm9, %v1650_v20, %v1649_v13 }
0x1b08   :  { %1652 = vrot.lane.b32.xlu2 %v1651_v46, %s3032_s27 }
0x1b62   :  { %v1653_v2 = vpop.permute.xlu2 %1652 }
0x1b63   :  { %2546 = vmatmul.msk.f32.vlgmr.msrb.gmra.mxu0 %vm145_vm0, %v1653_v2 }
0x1be0   :  { %v1673_v48 = vpop.f32.mrf.mxu0 }
0x1be1   :  { %v1674_v49 = vadd.f32 %v3391_v12, %v1673_v48 }
0x1be3   :  { %v1677_v52 = vrot.slane %v1674_v49, 4  ;;  %v1678_v53 = vrot.slane %v1674_v49, 5 }
0x1be5   :  { %1723 = vrot.lane.b32.xlu1 %v1678_v53, %s3031_s23  ;;  %1721 = vrot.lane.b32.xlu0 %v1677_v52, %s3031_s23  ;;  %v1681_v54 = vadd.f32 %v1677_v52, %v3461_v37  ;;  %v1682_v55 = vadd.f32 %v1678_v53, %v3458_v47 }
0x1be7   :  { %v2547_v58 = vmul.f32 -1.442695, %v1681_v54  ;;  %v2548_v59 = vmul.f32 -1.442695, %v1682_v55  ;;  %v1753_v55 = vrot.slane %v3544_v45, 7 }
0x1be9   :  { %2744 = vpow2.f32 %v2547_v58 }
0x1bea   :  { %2746 = vpow2.f32 %v2548_v59  ;;  %v1754_v59 = vrot.slane %v3542_v44, 7 }
0x1bef   :  { %v2745_v60 = vpop.eup %2744 }
0x1bf0   :  { %v2747_v39 = vpop.eup %2746  ;;  %v1689_v61 = vadd.f32 1.0, %v2745_v60 }
0x1bf1   :  { %v1690_v62 = vadd.f32 1.0, %v2747_v39 }
0x1bf2   :  { %2748 = vrcp.f32 %v1689_v61  ;;  %vm1696_vm1 = vweird.f32 %v1689_v61  ;;  %v1702_v28 = vand.u32 2147483648, %v1689_v61  ;;  %v1700_v30 = vand.u32 2147483647, %v1689_v61 }
0x1bf3   :  { %2750 = vrcp.f32 %v1690_v62  ;;  %v1717_v27 = vand.u32 2147483648, %v1690_v62  ;;  %vm1711_vm2 = vweird.f32 %v1690_v62  ;;  %v1715_v29 = vand.u32 2147483647, %v1690_v62 }
0x1bf4   :  { %v1703_v7 = vor.u32 1.1754944e-38, %v1702_v28  ;;  %vm1701_vm6 = vcmp.eq.f32.partialorder %v1700_v30, 8.507059e+37 }
0x1bf5   :  { %v1718_v6 = vor.u32 1.1754944e-38, %v1717_v27  ;;  %vm1716_vm5 = vcmp.eq.f32.partialorder %v1715_v29, 8.507059e+37 }
0x1bf8   :  { %v2749_v12 = vpop.eup %2748 }
0x1bf9   :  { %v2751_v0 = vpop.eup %2750  ;;  %v1692_v3 = vmul.f32 %v2749_v12, %v1689_v61  ;;  %vm1697_vm14 = vweird.f32 %v2749_v12 }
0x1bfa   :  { %v1707_v1 = vmul.f32 %v2751_v0, %v1690_v62  ;;  %vm1712_vm15 = vweird.f32 %v2751_v0  ;;  %vm1698_vm3 = vmor %vm1696_vm1, %vm1697_vm14 }
0x1bfb   :  { %v1693_v15 = vsub.f32 1.0, %v1692_v3  ;;  %vm1713_vm4 = vmor %vm1711_vm2, %vm1712_vm15 }
0x1bfc   :  { %v1708_v11 = vsub.f32 1.0, %v1707_v1 }
0x1bfd   :  { %v1694_v19 = vmul.f32 %v2749_v12, %v1693_v15 }
0x1bfe   :  { %v1709_v18 = vmul.f32 %v2751_v0, %v1708_v11 }
0x1bff   :  { %v1695_v24 = vadd.f32 %v2749_v12, %v1694_v19 }
0x1c00   :  { %v1710_v23 = vadd.f32 %v2751_v0, %v1709_v18 }
0x1c01   :  { %v1699_v32 = vsel %vm1698_vm3, %v2749_v12, %v1695_v24  ;;  %v3576_v24 = vld [vmem:[%s3830_s6] ss:$0 sm:$0xff]  ;;  %s2459_s6 = sshll.u32 %s3034_s1, 4  ;;  %s2460_s6 = int_to_ptr.vmem [resolvable:$true] %s2459_s6 }
0x1c02   :  { %v1714_v31 = vsel %vm1713_vm4, %v2751_v0, %v1710_v23  ;;  %v1704_v41 = vsel %vm1701_vm6, %v1703_v7, %v1699_v32 }
0x1c03   :  { %v1719_v33 = vsel %vm1716_vm5, %v1718_v6, %v1714_v31  ;;  %v1741_v54 = vsub.f32 1.0, %v1704_v41  ;;  %v1757_v61 = vmul.f32 %v1753_v55, %v1704_v41 }
0x1c04   :  { %v1742_v58 = vsub.f32 1.0, %v1719_v33  ;;  %v1758_v12 = vmul.f32 %v1754_v59, %v1719_v33 }
0x1c57   :  { %v1724_v9 = vpop.permute.xlu1 %1723  ;;  %v1722_v40 = vpop.permute.xlu0 %1721 }
0x1c58   :  { %v1728_v20 = vmul.f32 %v1724_v9, %v1719_v33  ;;  %v1727_v13 = vmul.f32 %v1722_v40, %v1704_v41 }
0x1c5a   :  { %1733 = vrot.lane.b32.xlu0 %v1728_v20, %s3031_s23  ;;  %1731 = vrot.lane.b32.xlu2 %v1727_v13, %s3031_s23 }
0x1cb4   :  { %v1732_v46 = vpop.permute.xlu2 %1731 }
0x1cb5   :  { %v1737_v2 = vadd.f32 %v1732_v46, %v3461_v37 }
0x1cb7   :  { %2752 = vtanh.f32 %v1737_v2 }
0x1cbd   :  { %v2753_v48 = vpop.eup %2752 }
0x1cbe   :  { %1745 = vrot.lane.b32.xlu1 %v2753_v48, %s3032_s27 }
0x1ccc   :  { %v1734_v49 = vpop.permute.xlu0 %1733 }
0x1ccd   :  { %v1738_v52 = vadd.f32 %v1734_v49, %v3458_v47 }
0x1ccf   :  { %2754 = vtanh.f32 %v1738_v52 }
0x1cd5   :  { %v2755_v53 = vpop.eup %2754 }
0x1cd6   :  { %1747 = vrot.lane.b32.xlu2 %v2755_v53, %s3032_s27 }
0x1d30   :  { %v1746_v60 = vpop.permute.xlu1 %1745  ;;  %v1748_v39 = vpop.permute.xlu2 %1747 }
0x1d31   :  { %v1751_v62 = vmul.f32 %v1746_v60, %v1741_v54  ;;  %v1752_v0 = vmul.f32 %v1748_v39, %v1742_v58 }
0x1d33   :  { %v3564_v1 = vadd.f32 %v1757_v61, %v1751_v62  ;;  %v3566_v3 = vadd.f32 %v1758_v12, %v1752_v0 }
0x1d35   :  { %v1771_v11 = vrot.slane %v3564_v1, 4  ;;  %v1772_v15 = vrot.slane %v3566_v3, 3 }
0x1d37   :  { %v1773_v18 = vsel %vm310_vm9, %v1772_v15, %v1771_v11 }
0x1d38   :  { %1774 = vrot.lane.b32.xlu0 %v1773_v18, %s3032_s27 }
0x1daa   :  { %v1775_v19 = vpop.permute.xlu0 %1774 }
0x1dab   :  { %2549 = vmatmul.msk.f32.vlgmr.msrb.gmra.mxu1 %vm145_vm0, %v1775_v19 }
0x1e28   :  { %v1795_v23 = vpop.f32.mrf.mxu1 }
0x1e29   :  { %v1796_v27 = vadd.f32 %v3576_v24, %v1795_v23 }
0x1e2b   :  { %v1799_v28 = vrot.slane %v1796_v27, 3  ;;  %v1800_v29 = vrot.slane %v1796_v27, 4 }
0x1e2d   :  { %1845 = vrot.lane.b32.xlu2 %v1800_v29, %s3031_s23  ;;  %1843 = vrot.lane.b32.xlu1 %v1799_v28, %s3031_s23  ;;  %v1804_v30 = vadd.f32 %v1800_v29, %v3458_v47  ;;  %v1803_v7 = vadd.f32 %v1799_v28, %v3461_v37 }
0x1e2f   :  { %v2551_v31 = vmul.f32 -1.442695, %v1804_v30  ;;  %v2550_v33 = vmul.f32 -1.442695, %v1803_v7  ;;  %v1875_v7 = vrot.slane %v3564_v1, 7 }
0x1e31   :  { %2756 = vpow2.f32 %v2551_v31 }
0x1e37   :  { %v2757_v32 = vpop.eup %2756 }
0x1e38   :  { %v1812_v6 = vadd.f32 1.0, %v2757_v32 }
0x1e3a   :  { %2758 = vrcp.f32 %v1812_v6  ;;  %v1839_v48 = vand.u32 2147483648, %v1812_v6  ;;  %vm1833_vm8 = vweird.f32 %v1812_v6  ;;  %v1837_v49 = vand.u32 2147483647, %v1812_v6 }
0x1e3b   :  { %2760 = vpow2.f32 %v2550_v33  ;;  %v1876_v33 = vrot.slane %v3566_v3, 7 }
0x1e3c   :  { %v1840_v53 = vor.u32 1.1754944e-38, %v1839_v48  ;;  %vm1838_vm11 = vcmp.eq.f32.partialorder %v1837_v49, 8.507059e+37 }
0x1e40   :  { %v2759_v9 = vpop.eup %2758 }
0x1e41   :  { %v1829_v40 = vmul.f32 %v2759_v9, %v1812_v6  ;;  %v2761_v20 = vpop.eup %2760  ;;  %vm1834_vm7 = vweird.f32 %v2759_v9 }
0x1e42   :  { %v1811_v46 = vadd.f32 1.0, %v2761_v20  ;;  %vm1835_vm10 = vmor %vm1833_vm8, %vm1834_vm7 }
0x1e43   :  { %v1830_v41 = vsub.f32 1.0, %v1829_v40 }
0x1e44   :  { %2762 = vrcp.f32 %v1811_v46  ;;  %v1824_v12 = vand.u32 2147483648, %v1811_v46  ;;  %vm1818_vm13 = vweird.f32 %v1811_v46  ;;  %v1822_v0 = vand.u32 2147483647, %v1811_v46 }
0x1e45   :  { %v1831_v13 = vmul.f32 %v2759_v9, %v1830_v41 }
0x1e46   :  { %v1825_v15 = vor.u32 1.1754944e-38, %v1824_v12  ;;  %vm1823_vm15 = vcmp.eq.f32.partialorder %v1822_v0, 8.507059e+37 }
0x1e47   :  { %v1832_v2 = vadd.f32 %v2759_v9, %v1831_v13 }
0x1e49   :  { %v1836_v52 = vsel %vm1835_vm10, %v2759_v9, %v1832_v2 }
0x1e4a   :  { %v1841_v55 = vsel %vm1838_vm11, %v1840_v53, %v1836_v52  ;;  %v2763_v59 = vpop.eup %2762 }
0x1e4b   :  { %v1814_v60 = vmul.f32 %v2763_v59, %v1811_v46  ;;  %vm1819_vm12 = vweird.f32 %v2763_v59  ;;  %v1864_v9 = vsub.f32 1.0, %v1841_v55  ;;  %v1880_v46 = vmul.f32 %v1876_v33, %v1841_v55 }
0x1e4c   :  { %vm1820_vm14 = vmor %vm1818_vm13, %vm1819_vm12 }
0x1e4d   :  { %v1815_v39 = vsub.f32 1.0, %v1814_v60 }
0x1e4f   :  { %v1816_v61 = vmul.f32 %v2763_v59, %v1815_v39 }
0x1e51   :  { %v1817_v62 = vadd.f32 %v2763_v59, %v1816_v61 }
0x1e53   :  { %v1821_v11 = vsel %vm1820_vm14, %v2763_v59, %v1817_v62 }
0x1e54   :  { %v1826_v19 = vsel %vm1823_vm15, %v1825_v15, %v1821_v11 }
0x1e55   :  { %v1863_v6 = vsub.f32 1.0, %v1826_v19  ;;  %v1879_v20 = vmul.f32 %v1875_v7, %v1826_v19 }
0x1e87   :  { %v1846_v54 = vpop.permute.xlu2 %1845 }
0x1e88   :  { %v1850_v58 = vmul.f32 %v1846_v54, %v1841_v55 }
0x1e8a   :  { %1855 = vrot.lane.b32.xlu1 %v1850_v58, %s3031_s23 }
0x1e9f   :  { %v1844_v18 = vpop.permute.xlu1 %1843 }
0x1ea0   :  { %v1849_v23 = vmul.f32 %v1844_v18, %v1826_v19 }
0x1ea2   :  { %1853 = vrot.lane.b32.xlu0 %v1849_v23, %s3031_s23 }
0x1efc   :  { %v1856_v27 = vpop.permute.xlu1 %1855 }
0x1efd   :  { %v1860_v28 = vadd.f32 %v1856_v27, %v3458_v47 }
0x1eff   :  { %2764 = vtanh.f32 %v1860_v28 }
0x1f05   :  { %v2765_v29 = vpop.eup %2764 }
0x1f06   :  { %1869 = vrot.lane.b32.xlu0 %v2765_v29, %s3032_s27 }
0x1f14   :  { %v1854_v30 = vpop.permute.xlu0 %1853 }
0x1f15   :  { %v1859_v31 = vadd.f32 %v1854_v30, %v3461_v37 }
0x1f17   :  { %2766 = vtanh.f32 %v1859_v31 }
0x1f1d   :  { %v2767_v32 = vpop.eup %2766 }
0x1f1e   :  { %1867 = vrot.lane.b32.xlu2 %v2767_v32, %s3032_s27 }
0x1f78   :  { %v1868_v40 = vpop.permute.xlu2 %1867  ;;  %v1870_v41 = vpop.permute.xlu0 %1869 }
0x1f79   :  { %v1873_v13 = vmul.f32 %v1868_v40, %v1863_v6  ;;  %v1874_v2 = vmul.f32 %v1870_v41, %v1864_v9 }
0x1f7b   :  { %v3591_v48 = vadd.f32 %v1879_v20, %v1873_v13  ;;  %v3593_v49 = vadd.f32 %v1880_v46, %v1874_v2 }
0x1f7d   :  { %v1893_v52 = vrot.slane %v3591_v48, 5  ;;  %v1894_v53 = vrot.slane %v3593_v49, 4 }
0x1f7f   :  { %v1895_v54 = vsel %vm310_vm9, %v1894_v53, %v1893_v52 }
0x1f80   :  { %1896 = vrot.lane.b32.xlu1 %v1895_v54, %s3032_s27 }
0x1ff2   :  { %v1897_v58 = vpop.permute.xlu1 %1896 }
0x1ff3   :  { %2552 = vmatmul.msk.f32.vlgmr.msrb.gmra.mxu2 %vm145_vm0, %v1897_v58 }
0x2076   :  { %v1917_v59 = vpop.f32.mrf.mxu2 }
0x2077   :  { %v1918_v60 = vadd.f32 %v3576_v24, %v1917_v59 }
0x2079   :  { %v1921_v55 = vrot.slane %v1918_v60, 2  ;;  %v1922_v39 = vrot.slane %v1918_v60, 3 }
0x207b   :  { %1967 = vrot.lane.b32.xlu0 %v1922_v39, %s3031_s23  ;;  %1965 = vrot.lane.b32.xlu2 %v1921_v55, %s3031_s23  ;;  %v1925_v61 = vadd.f32 %v1921_v55, %v3461_v37  ;;  %v1926_v11 = vadd.f32 %v1922_v39, %v3458_v47 }
0x207d   :  { %v2553_v62 = vmul.f32 -1.442695, %v1925_v61  ;;  %v2554_v18 = vmul.f32 -1.442695, %v1926_v11 }
0x207f   :  { %2768 = vpow2.f32 %v2553_v62 }
0x2085   :  { %v2769_v12 = vpop.eup %2768 }
0x2086   :  { %v1933_v0 = vadd.f32 1.0, %v2769_v12 }
0x2088   :  { %2770 = vrcp.f32 %v1933_v0  ;;  %v1946_v31 = vand.u32 2147483648, %v1933_v0  ;;  %vm1940_vm2 = vweird.f32 %v1933_v0  ;;  %v1944_v32 = vand.u32 2147483647, %v1933_v0 }
0x2089   :  { %2772 = vpow2.f32 %v2554_v18  ;;  %v1998_v18 = vrot.slane %v3593_v49, 7 }
0x208a   :  { %v1947_v7 = vor.u32 1.1754944e-38, %v1946_v31  ;;  %vm1945_vm4 = vcmp.eq.f32.partialorder %v1944_v32, 8.507059e+37 }
0x208e   :  { %v2771_v15 = vpop.eup %2770 }
0x208f   :  { %v1936_v19 = vmul.f32 %v2771_v15, %v1933_v0  ;;  %v2773_v27 = vpop.eup %2772  ;;  %vm1941_vm1 = vweird.f32 %v2771_v15 }
0x2090   :  { %v1934_v29 = vadd.f32 1.0, %v2773_v27  ;;  %vm1942_vm3 = vmor %vm1940_vm2, %vm1941_vm1 }
0x2091   :  { %v1937_v23 = vsub.f32 1.0, %v1936_v19 }
0x2092   :  { %2774 = vrcp.f32 %v1934_v29  ;;  %v1961_v52 = vand.u32 2147483648, %v1934_v29  ;;  %vm1955_vm6 = vweird.f32 %v1934_v29  ;;  %v1959_v53 = vand.u32 2147483647, %v1934_v29 }
0x2093   :  { %v1938_v28 = vmul.f32 %v2771_v15, %v1937_v23  ;;  %v1997_v23 = vrot.slane %v3591_v48, 7 }
0x2094   :  { %v1962_v58 = vor.u32 1.1754944e-38, %v1961_v52  ;;  %vm1960_vm8 = vcmp.eq.f32.partialorder %v1959_v53, 8.507059e+37 }
0x2095   :  { %v1939_v30 = vadd.f32 %v2771_v15, %v1938_v28 }
0x2097   :  { %v1943_v6 = vsel %vm1942_vm3, %v2771_v15, %v1939_v30  ;;  %vm427_vm3 = vcmask 254977  }
0x2098   :  { %v1948_v33 = vsel %vm1945_vm4, %v1947_v7, %v1943_v6  ;;  %v2775_v41 = vpop.eup %2774  ;;  %vm795_vm4 = vcmask 258052  }
0x2099   :  { %v1951_v20 = vmul.f32 %v2775_v41, %v1934_v29  ;;  %vm1956_vm5 = vweird.f32 %v2775_v41  ;;  %v1985_v19 = vsub.f32 1.0, %v1948_v33  ;;  %v2001_v31 = vmul.f32 %v1997_v23, %v1948_v33 }
0x209a   :  { %vm1957_vm7 = vmor %vm1955_vm6, %vm1956_vm5  ;;  %vm1164_vm5 = vcmask 261127   ;;  %vm549_vm6 = vcmask 256002  }
0x209b   :  { %v1952_v13 = vsub.f32 1.0, %v1951_v20 }
0x209d   :  { %v1953_v46 = vmul.f32 %v2775_v41, %v1952_v13 }
0x209f   :  { %v1954_v2 = vadd.f32 %v2775_v41, %v1953_v46 }
0x20a1   :  { %v1958_v54 = vsel %vm1957_vm7, %v2775_v41, %v1954_v2  ;;  %vm918_vm7 = vcmask 259077  }
0x20a2   :  { %v1963_v60 = vsel %vm1960_vm8, %v1962_v58, %v1958_v54  ;;  %vm306_vm8 = vcmask 253952  }
0x20a3   :  { %v1986_v15 = vsub.f32 1.0, %v1963_v60  ;;  %v2002_v29 = vmul.f32 %v1998_v18, %v1963_v60 }
0x20d5   :  { %v1966_v9 = vpop.permute.xlu2 %1965 }
0x20d6   :  { %v1971_v40 = vmul.f32 %v1966_v9, %v1948_v33 }
0x20d8   :  { %1975 = vrot.lane.b32.xlu1 %v1971_v40, %s3031_s23 }
0x20ed   :  { %v1968_v59 = vpop.permute.xlu0 %1967 }
0x20ee   :  { %v1972_v55 = vmul.f32 %v1968_v59, %v1963_v60 }
0x20f0   :  { %1977 = vrot.lane.b32.xlu2 %v1972_v55, %s3031_s23 }
0x214a   :  { %v1978_v39 = vpop.permute.xlu2 %1977  ;;  %v1976_v61 = vpop.permute.xlu1 %1975 }
0x214b   :  { %v1982_v62 = vadd.f32 %v1978_v39, %v3458_v47  ;;  %v1981_v12 = vadd.f32 %v1976_v61, %v3461_v37 }
0x214d   :  { %2776 = vtanh.f32 %v1982_v62 }
0x214e   :  { %2778 = vtanh.f32 %v1981_v12 }
0x2153   :  { %v2777_v0 = vpop.eup %2776 }
0x2154   :  { %v2779_v11 = vpop.eup %2778  ;;  %1991 = vrot.lane.b32.xlu1 %v2777_v0, %s3032_s27 }
0x2155   :  { %1989 = vrot.lane.b32.xlu0 %v2779_v11, %s3032_s27 }
0x21c6   :  { %v1992_v27 = vpop.permute.xlu1 %1991 }
0x21c7   :  { %v1990_v28 = vpop.permute.xlu0 %1989  ;;  %v1996_v30 = vmul.f32 %v1992_v27, %v1986_v15 }
0x21c8   :  { %v1995_v32 = vmul.f32 %v1990_v28, %v1985_v19 }
0x21c9   :  { %v3613_v6 = vadd.f32 %v2002_v29, %v1996_v30 }
0x21ca   :  { %v3615_v7 = vadd.f32 %v2001_v31, %v1995_v32 }
0x21cb   :  { %v2016_v9 = vrot.slane %v3613_v6, 5 }
0x21cc   :  { %v2015_v40 = vrot.slane %v3615_v7, 6 }
0x21ce   :  { %v2017_v41 = vsel %vm310_vm9, %v2016_v9, %v2015_v40 }
0x21cf   :  { %2018 = vrot.lane.b32.xlu2 %v2017_v41, %s3032_s27 }
0x2229   :  { %v2019_v20 = vpop.permute.xlu2 %2018 }
0x222a   :  { %2555 = vmatmul.msk.f32.vlgmr.msra.gmra.mxu3 %vm145_vm0, %v2019_v20 }
0x22ad   :  { %v2039_v13 = vpop.f32.mrf.mxu3 }
0x22ae   :  { %v2040_v46 = vadd.f32 %v3576_v24, %v2039_v13 }
0x22b0   :  { %v2043_v33 = vrot.slane %v2040_v46, 1  ;;  %v2044_v2 = vrot.slane %v2040_v46, 2 }
0x22b2   :  { %2089 = vrot.lane.b32.xlu1 %v2044_v2, %s3031_s23  ;;  %2087 = vrot.lane.b32.xlu0 %v2043_v33, %s3031_s23  ;;  %v2047_v52 = vadd.f32 %v2043_v33, %v3461_v37  ;;  %v2048_v53 = vadd.f32 %v2044_v2, %v3458_v47 }
0x22b4   :  { %v2556_v24 = vmul.f32 -1.442695, %v2047_v52  ;;  %v2557_v54 = vmul.f32 -1.442695, %v2048_v53 }
0x22b6   :  { %2780 = vpow2.f32 %v2556_v24  ;;  %v2120_v24 = vrot.slane %v3613_v6, 7 }
0x22b7   :  { %2782 = vpow2.f32 %v2557_v54 }
0x22ba   :  { %421 = vrot.lane.b32.xlu1 %v3263_v4, %s3032_s27 }
0x22bc   :  { %v2781_v58 = vpop.eup %2780 }
0x22bd   :  { %v2783_v59 = vpop.eup %2782  ;;  %v2055_v60 = vadd.f32 1.0, %v2781_v58 }
0x22be   :  { %v2056_v55 = vadd.f32 1.0, %v2783_v59 }
0x22bf   :  { %2784 = vrcp.f32 %v2055_v60  ;;  %vm2062_vm12 = vweird.f32 %v2055_v60  ;;  %v2068_v19 = vand.u32 2147483648, %v2055_v60  ;;  %v2066_v27 = vand.u32 2147483647, %v2055_v60 }
0x22c0   :  { %2786 = vrcp.f32 %v2056_v55  ;;  %v2083_v18 = vand.u32 2147483648, %v2056_v55  ;;  %vm2077_vm13 = vweird.f32 %v2056_v55  ;;  %v2081_v23 = vand.u32 2147483647, %v2056_v55 }
0x22c1   :  { %v2069_v31 = vor.u32 1.1754944e-38, %v2068_v19  ;;  %vm2067_vm2 = vcmp.eq.f32.partialorder %v2066_v27, 8.507059e+37 }
0x22c2   :  { %789 = vrot.lane.b32.xlu1 %v3341_v35, %s3032_s27  ;;  %v2084_v30 = vor.u32 1.1754944e-38, %v2083_v18  ;;  %vm2082_vm1 = vcmp.eq.f32.partialorder %v2081_v23, 8.507059e+37  ;;  %v2596_v23 = vld [vmem:[%s3832_s8] ss:$0 sm:$0xff] }
0x22c5   :  { %v2785_v4 = vpop.eup %2784 }
0x22c6   :  { %v2787_v39 = vpop.eup %2786  ;;  %v2058_v61 = vmul.f32 %v2785_v4, %v2055_v60  ;;  %vm2063_vm10 = vweird.f32 %v2785_v4 }
0x22c7   :  { %v2073_v35 = vmul.f32 %v2787_v39, %v2056_v55  ;;  %vm2078_vm11 = vweird.f32 %v2787_v39  ;;  %vm2064_vm14 = vmor %vm2062_vm12, %vm2063_vm10  ;;  %vm672_vm10 = vcmask 257027   ;;  %vm2224_vm12 = vcmask 130112  }
0x22c8   :  { %vm2079_vm15 = vmor %vm2077_vm13, %vm2078_vm11  ;;  %vm1041_vm11 = vcmask 260102   ;;  %vm2232_vm13 = vcmask 123904  }
0x22c9   :  { %v2074_v62 = vsub.f32 1.0, %v2073_v35 }
0x22ca   :  { %1158 = vrot.lane.b32.xlu1 %v3432_v21, %s3032_s27  ;;  %v2059_v21 = vsub.f32 1.0, %v2058_v61 }
0x22cb   :  { %v2075_v12 = vmul.f32 %v2787_v39, %v2074_v62 }
0x22cc   :  { %v2060_v0 = vmul.f32 %v2785_v4, %v2059_v21 }
0x22cd   :  { %v2076_v11 = vadd.f32 %v2787_v39, %v2075_v12 }
0x22ce   :  { %v2061_v15 = vadd.f32 %v2785_v4, %v2060_v0 }
0x22cf   :  { %v2080_v28 = vsel %vm2079_vm15, %v2787_v39, %v2076_v11 }
0x22d0   :  { %v2065_v29 = vsel %vm2064_vm14, %v2785_v4, %v2061_v15  ;;  %v3633_v9 = vsel %vm2082_vm1, %v2084_v30, %v2080_v28 }
0x22d1   :  { %v3635_v41 = vsel %vm2067_vm2, %v2069_v31, %v2065_v29  ;;  %v2124_v60 = vmul.f32 %v2120_v24, %v3633_v9 }
0x2324   :  { %v2090_v32 = vpop.permute.xlu1 %2089  ;;  %v2088_v40 = vpop.permute.xlu0 %2087 }
0x2325   :  { %v2094_v20 = vmul.f32 %v2090_v32, %v3633_v9  ;;  %v2093_v13 = vmul.f32 %v2088_v40, %v3635_v41 }
0x2327   :  { %2099 = vrot.lane.b32.xlu0 %v2094_v20, %s3031_s23  ;;  %2097 = vrot.lane.b32.xlu2 %v2093_v13, %s3031_s23  ;;  %v3033_v13 = vmov 0  }
0x2328   :  { %2588 = vset.pattern.permute.xlu2 %v3033_v13  ;;  %v2312_v13 = vld [vmem:[#allocation10 + $0x8] sm:$0xff] }
0x232c   :  { %v422_v46 = vpop.permute.xlu1 %421 }
0x232d   :  { %428 = vst.msk [vmem:[#allocation11] sm:$0x2] %vm427_vm3, %v422_v46 }
0x232f   :  { %300 = vrot.lane.b32.xlu0 %v3235_v8, %s3032_s27  ;;  %543 = vrot.lane.b32.xlu2 %v3291_v16, %s3032_s27 }
0x2334   :  { %v790_v33 = vpop.permute.xlu1 %789 }
0x2335   :  { %796 = vst.msk [vmem:[#allocation11] sm:$0x10] %vm795_vm4, %v790_v33 }
0x2337   :  { %666 = vrot.lane.b32.xlu0 %v3315_v25, %s3032_s27  ;;  %912 = vrot.lane.b32.xlu2 %v3369_v43, %s3032_s27 }
0x233c   :  { %v1159_v2 = vpop.permute.xlu1 %1158 }
0x233d   :  { %1165 = vst.msk [vmem:[#allocation11] sm:$0x80] %vm1164_vm5, %v1159_v2 }
0x233f   :  { %1035 = vrot.lane.b32.xlu0 %v3406_v56, %s3032_s27  ;;  %1279 = vrot.lane.b32.xlu2 %v3475_v38, %s3032_s27 }
0x2347   :  { %1398 = vrot.lane.b32.xlu0 %v3498_v50, %s3032_s27  ;;  %1641 = vrot.lane.b32.xlu2 %v3544_v45, %s3032_s27 }
0x234f   :  { %1763 = vrot.lane.b32.xlu0 %v3564_v1, %s3032_s27 }
0x2357   :  { %545 = vrot.lane.b32.xlu0 %v3289_v5, %s3032_s27  ;;  %v2144_v5 = vld [vmem:[#allocation7 + $0x18] sm:$0xff] }
0x2358   :  { %2169 = vmatpush.msra.mxu0 %v2144_v5 }
0x235f   :  { %914 = vrot.lane.b32.xlu0 %v3367_v42, %s3032_s27  ;;  %v2143_v42 = vld [vmem:[#allocation7 + $0x10] sm:$0xff] }
0x2360   :  { %2170 = vmatpush.msra.mxu0 %v2143_v42 }
0x2367   :  { %1281 = vrot.lane.b32.xlu0 %v3473_v34, %s3032_s27  ;;  %v2142_v34 = vld [vmem:[#allocation7 + $0x8] sm:$0xff] }
0x2368   :  { %2171 = vmatpush.msra.mxu0 %v2142_v34 }
0x2381   :  { %v2098_v8 = vpop.permute.xlu2 %2097 }
0x2382   :  { %v2103_v16 = vadd.f32 %v2098_v8, %v3461_v37  ;;  %v2141_v37 = vld [vmem:[#allocation7] sm:$0xff] }
0x2383   :  { %2172 = vmatpush.msra.mxu0 %v2141_v37 }
0x2384   :  { %2788 = vtanh.f32 %v2103_v16 }
0x2389   :  { %v544_v25 = vpop.permute.xlu2 %543 }
0x238a   :  { %v2789_v43 = vpop.eup %2788  ;;  %550 = vst.msk [vmem:[#allocation11] sm:$0x4] %vm549_vm6, %v544_v25 }
0x238b   :  { %2111 = vrot.lane.b32.xlu1 %v2789_v43, %s3032_s27 }
0x2391   :  { %v913_v56 = vpop.permute.xlu2 %912 }
0x2392   :  { %919 = vst.msk [vmem:[#allocation11] sm:$0x20] %vm918_vm7, %v913_v56 }
0x2393   :  { %1519 = vrot.lane.b32.xlu1 %v3520_v14, %s3032_s27 }
0x2399   :  { %v2100_v38 = vpop.permute.xlu0 %2099  ;;  %v1280_v50 = vpop.permute.xlu2 %1279 }
0x239a   :  { %v2104_v45 = vadd.f32 %v2100_v38, %v3458_v47  ;;  %1285 = vst.msk [vmem:[#allocation11 + $0x8] sm:$0x1] %vm306_vm8, %v1280_v50  ;;  %v2210_v38 = vld [vmem:[%s3826_s2] sm:$0x3]  ;;  %s2475_s2 = sshll.u32 %s3840_s16, 4  ;;  %s2476_s2 = int_to_ptr.hbm [resolvable:$true] %s2475_s2 }
0x239b   :  { %1885 = vrot.lane.b32.xlu1 %v3591_v48, %s3032_s27 }
0x239c   :  { %2790 = vtanh.f32 %v2104_v45  ;;  %v2211_v45 = vlaneseq }
0x23a1   :  { %v301_v14 = vpop.permute.xlu0 %300  ;;  %v1642_v1 = vpop.permute.xlu2 %1641 }
0x23a2   :  { %v2791_v52 = vpop.eup %2790  ;;  %307 = vst.msk [vmem:[#allocation11] sm:$0x1] %vm306_vm8, %v301_v14  ;;  %v2212_v14 = vand.u32 127, %v2211_v45 }
0x23a3   :  { %1647 = vst.msk [vmem:[#allocation11 + $0x8] sm:$0x8] %vm672_vm10, %v1642_v1  ;;  %2113 = vrot.lane.b32.xlu2 %v2791_v52, %s3032_s27  ;;  %302 = vrot.lane.b32.xlu1 %v3232_v63, %s3032_s27 }
0x23a4   :  { %v2222_v1 = vadd.s32 4294967288, %v2212_v14 }
0x23a9   :  { %v667_v47 = vpop.permute.xlu0 %666 }
0x23aa   :  { %673 = vst.msk [vmem:[#allocation11] sm:$0x8] %vm672_vm10, %v667_v47 }
0x23ab   :  { %2007 = vrot.lane.b32.xlu2 %v3615_v7, %s3032_s27  ;;  %668 = vrot.lane.b32.xlu1 %v3317_v26, %s3032_s27 }
0x23b1   :  { %v1036_v48 = vpop.permute.xlu0 %1035 }
0x23b2   :  { %1042 = vst.msk [vmem:[#allocation11] sm:$0x40] %vm1041_vm11, %v1036_v48 }
0x23b3   :  { %423 = vrot.lane.b32.xlu2 %v3265_v10, %s3032_s27  ;;  %1037 = vrot.lane.b32.xlu1 %v3408_v57, %s3032_s27 }
0x23b9   :  { %v1399_v63 = vpop.permute.xlu0 %1398  ;;  %v3693_v53 = vld [vmem:[#allocation11] sm:$0xff] }
0x23ba   :  { %1404 = vst.msk [vmem:[#allocation11 + $0x8] sm:$0x2] %vm427_vm3, %v1399_v63  ;;  %2558 = vmatmul.msk.f32.vlgmr.msra.gmra.mxu0 %vm145_vm0, %v3693_v53 }
0x23bb   :  { %791 = vrot.lane.b32.xlu2 %v3343_v36, %s3032_s27  ;;  %1400 = vrot.lane.b32.xlu1 %v3500_v51, %s3032_s27  ;;  %v2119_v51 = vrot.slane %v3615_v7, 7 }
0x23c1   :  { %v1764_v26 = vpop.permute.xlu0 %1763 }
0x23c2   :  { %1769 = vst.msk [vmem:[#allocation11 + $0x8] sm:$0x10] %vm795_vm4, %v1764_v26 }
0x23c3   :  { %1160 = vrot.lane.b32.xlu2 %v3434_v22, %s3032_s27  ;;  %1765 = vrot.lane.b32.xlu1 %v3566_v3, %s3032_s27  ;;  %v2107_v22 = vsub.f32 1.0, %v3635_v41  ;;  %v2108_v3 = vsub.f32 1.0, %v3633_v9 }
0x23c9   :  { %v546_v10 = vpop.permute.xlu0 %545 }
0x23ca   :  { %551 = vst.msk [vmem:[#allocation11 + $0x10] sm:$0x4] %vm549_vm6, %v546_v10 }
0x23cb   :  { %1521 = vrot.lane.b32.xlu2 %v3522_v17, %s3032_s27  ;;  %v2123_v17 = vmul.f32 %v2119_v51, %v3635_v41 }
0x23d1   :  { %v915_v57 = vpop.permute.xlu0 %914 }
0x23d2   :  { %920 = vst.msk [vmem:[#allocation11 + $0x10] sm:$0x20] %vm918_vm7, %v915_v57 }
0x23d3   :  { %1887 = vrot.lane.b32.xlu2 %v3593_v49, %s3032_s27 }
0x23d9   :  { %v1282_v36 = vpop.permute.xlu0 %1281 }
0x23da   :  { %1286 = vst.msk [vmem:[#allocation11 + $0x18] sm:$0x1] %vm306_vm8, %v1282_v36 }
0x23fd   :  { %v2112_v54 = vpop.permute.xlu1 %2111  ;;  %v2114_v58 = vpop.permute.xlu2 %2113 }
0x23fe   :  { %v2117_v59 = vmul.f32 %v2112_v54, %v2107_v22  ;;  %v2118_v55 = vmul.f32 %v2114_v58, %v2108_v3 }
0x2400   :  { %v2125_v49 = vadd.f32 %v2123_v17, %v2117_v59  ;;  %v2126_v4 = vadd.f32 %v2124_v60, %v2118_v55 }
0x2402   :  { %2129 = vrot.lane.b32.xlu0 %v2125_v49, %s3032_s27  ;;  %2131 = vrot.lane.b32.xlu1 %v2126_v4, %s3032_s27  ;;  %v2260_v49 = vshrl.u32 %v2211_v45, 7 }
0x2404   :  { %2589 = vset.pattern.permute.xlu0 %v2260_v49  ;;  %v2267_v4 = vadd.s32 8, %v2260_v49 }
0x2405   :  { %v1520_v39 = vpop.permute.xlu1 %1519  ;;  %v2008_v7 = vpop.permute.xlu2 %2007 }
0x2406   :  { %1525 = vst.msk [vmem:[#allocation11 + $0x8] sm:$0x4] %vm549_vm6, %v1520_v39  ;;  %2590 = vset.pattern.permute.xlu1 %v2267_v4 }
0x2407   :  { %2013 = vst.msk [vmem:[#allocation11 + $0x8] sm:$0x40] %vm1041_vm11, %v2008_v7 }
0x240a   :  { %1643 = vrot.lane.b32.xlu0 %v3542_v44, %s3032_s27 }
0x240d   :  { %v1886_v35 = vpop.permute.xlu1 %1885  ;;  %v424_v61 = vpop.permute.xlu2 %423 }
0x240e   :  { %1891 = vst.msk [vmem:[#allocation11 + $0x8] sm:$0x20] %vm918_vm7, %v1886_v35 }
0x240f   :  { %429 = vst.msk [vmem:[#allocation11 + $0x10] sm:$0x2] %vm427_vm3, %v424_v61 }
0x2412   :  { %2009 = vrot.lane.b32.xlu0 %v3613_v6, %s3032_s27 }
0x2415   :  { %v303_v62 = vpop.permute.xlu1 %302  ;;  %v792_v21 = vpop.permute.xlu2 %791 }
0x2416   :  { %308 = vst.msk [vmem:[#allocation11 + $0x10] sm:$0x1] %vm306_vm8, %v303_v62 }
0x2417   :  { %797 = vst.msk [vmem:[#allocation11 + $0x10] sm:$0x10] %vm795_vm4, %v792_v21 }
0x241d   :  { %v669_v12 = vpop.permute.xlu1 %668  ;;  %v1161_v0 = vpop.permute.xlu2 %1160 }
0x241e   :  { %674 = vst.msk [vmem:[#allocation11 + $0x10] sm:$0x8] %vm672_vm10, %v669_v12 }
0x241f   :  { %1166 = vst.msk [vmem:[#allocation11 + $0x10] sm:$0x80] %vm1164_vm5, %v1161_v0 }
0x2425   :  { %v1038_v44 = vpop.permute.xlu1 %1037  ;;  %v1522_v11 = vpop.permute.xlu2 %1521 }
0x2426   :  { %1043 = vst.msk [vmem:[#allocation11 + $0x10] sm:$0x40] %vm1041_vm11, %v1038_v44 }
0x2427   :  { %1526 = vst.msk [vmem:[#allocation11 + $0x18] sm:$0x4] %vm549_vm6, %v1522_v11 }
0x242d   :  { %v1401_v15 = vpop.permute.xlu1 %1400  ;;  %v1888_v6 = vpop.permute.xlu2 %1887  ;;  %v3750_v41 = vld [vmem:[#allocation11 + $0x10] sm:$0xff] }
0x242e   :  { %1405 = vst.msk [vmem:[#allocation11 + $0x18] sm:$0x2] %vm427_vm3, %v1401_v15 }
0x242f   :  { %1892 = vst.msk [vmem:[#allocation11 + $0x18] sm:$0x20] %vm918_vm7, %v1888_v6 }
0x2435   :  { %v1766_v18 = vpop.permute.xlu1 %1765 }
0x2436   :  { %1770 = vst.msk [vmem:[#allocation11 + $0x18] sm:$0x10] %vm795_vm4, %v1766_v18 }
0x2437   :  { %v2174_v19 = vpop.f32.mrf.mxu0 }
0x2438   :  { %2792 = vtanh.f32 %v2174_v19 }
0x243e   :  { %v2793_v27 = vpop.eup %2792 }
0x243f   :  { %v2194_v28 = vmul.f32 %v2793_v27, %v2596_v23  ;;  %v2309_v27 = vld [vmem:[#allocation8 + $0x10] sm:$0xff] }
0x2441   :  { %v2198_v29 = vsel %vm145_vm0, %v2194_v28, 0.0  ;;  %v2308_v28 = vld [vmem:[#allocation8 + $0x8] sm:$0xff] }
0x2442   :  { %2199 = vadd.xlane.f32.xlu2 %v2198_v29  ;;  %v2314_v29 = vld [vmem:[#allocation10 + $0x18] sm:$0xff] }
0x2443   :  { %2332 = vmatpush.msra.mxu1 %v2314_v29 }
0x2474   :  { %v2130_v30 = vpop.permute.xlu0 %2129  ;;  %v2132_v31 = vpop.permute.xlu1 %2131 }
0x2475   :  { %2135 = vst.msk [vmem:[#allocation11 + $0x8] sm:$0x80] %vm1164_vm5, %v2130_v30  ;;  %v2307_v30 = vld [vmem:[#allocation8] sm:$0xff] }
0x2476   :  { %2136 = vst.msk [vmem:[#allocation11 + $0x18] sm:$0x80] %vm1164_vm5, %v2132_v31  ;;  %v2306_v31 = vld [vmem:[%s3846_s5] sm:$0x3] }
0x247c   :  { %v1644_v32 = vpop.permute.xlu0 %1643  ;;  %v3745_v9 = vld [vmem:[#allocation11 + $0x8] sm:$0xff] }
0x247d   :  { %1648 = vst.msk [vmem:[#allocation11 + $0x18] sm:$0x8] %vm672_vm10, %v1644_v32  ;;  %2559 = vmatmul.msk.f32.gmra.mxu0 %vm145_vm0, %v3745_v9  ;;  %v2313_v32 = vld [vmem:[#allocation10 + $0x10] sm:$0xff] }
0x247e   :  { %2333 = vmatpush.msra.mxu1 %v2313_v32 }
0x2480   :  { %2334 = vmatpush.msra.mxu1 %v2312_v13 }
0x2484   :  { %v2010_v40 = vpop.permute.xlu0 %2009 }
0x2485   :  { %2014 = vst.msk [vmem:[#allocation11 + $0x18] sm:$0x40] %vm1041_vm11, %v2010_v40  ;;  %2560 = vmatmul.msk.f32.gmra.mxu0 %vm145_vm0, %v3750_v41 }
0x2486   :  { %2467 = dma.vmem_to_hbm [thread:$0]  %s2460_s6, 512, %s2462_s4, [#allocation4], %s3024_s18, %s3024_s18, %s3025_s19  }
0x248c   :  { %v3755_v20 = vld [vmem:[#allocation11 + $0x18] sm:$0xff] }
0x248d   :  { %2561 = vmatmul.msk.f32.gmra.mxu0 %vm145_vm0, %v3755_v20 }
0x24b5   :  { %v2200_v50 = vpop.xlane.xlu2 %2199 }
0x24b6   :  { %v2221_v57 = vperm.slane %v2200_v50, %v2212_v14 }
0x24fa   :  { %v2177_v46 = vpop.f32.mrf.mxu0 }
0x24fb   :  { %2794 = vtanh.f32 %v2177_v46  ;;  %v2311_v46 = vld [vmem:[#allocation10] sm:$0xff] }
0x24fc   :  { %2335 = vmatpush.msra.mxu1 %v2311_v46 }
0x2501   :  { %v2795_v33 = vpop.eup %2794 }
0x2502   :  { %v2180_v2 = vpop.f32.mrf.mxu0  ;;  %v2195_v8 = vmul.f32 %v2795_v33, %v2596_v23  ;;  %v2597_v33 = vld [vmem:[%s3836_s12] ss:$0 sm:$0xff] }
0x2503   :  { %2796 = vtanh.f32 %v2180_v2 }
0x2504   :  { %v2201_v16 = vsel %vm145_vm0, %v2195_v8, 0.0 }
0x2505   :  { %2202 = vadd.xlane.f32.xlu0 %v2201_v16 }
0x2509   :  { %v2797_v25 = vpop.eup %2796 }
0x250a   :  { %v2183_v43 = vpop.f32.mrf.mxu0  ;;  %v2196_v56 = vmul.f32 %v2797_v25, %v2596_v23 }
0x250b   :  { %2798 = vtanh.f32 %v2183_v43 }
0x250c   :  { %v2204_v5 = vsel %vm145_vm0, %v2196_v56, 0.0 }
0x250d   :  { %2205 = vadd.xlane.f32.xlu1 %v2204_v5 }
0x2511   :  { %v2799_v42 = vpop.eup %2798 }
0x2512   :  { %v2197_v34 = vmul.f32 %v2799_v42, %v2596_v23  ;;  %v2310_v23 = vld [vmem:[#allocation8 + $0x18] sm:$0xff] }
0x2513   :  { %2355 = vmatpush.msra.mxu2 %v2310_v23  ;;  %v2408_v23 = vld [vmem:[%s3837_s13] sm:$0xff] }
0x2514   :  { %v2207_v37 = vsel %vm145_vm0, %v2197_v34, 0.0 }
0x2515   :  { %2208 = vadd.xlane.f32.xlu2 %v2207_v37  ;;  %2356 = vmatpush.msra.mxu2 %v2309_v27 }
0x2517   :  { %2357 = vmatpush.msra.mxu2 %v2308_v28 }
0x2519   :  { %2358 = vmatpush.msra.mxu2 %v2307_v30 }
0x251a   :  { %2563 = vmatmul.msk.f32.vlgmr.msra.gmra.mxu2 %vm145_vm0, %v2306_v31  ;;  %v2599_v31 = vld [vmem:[%s3838_s14] ss:$0 sm:$0xff]  ;;  %s3035_s14 = smov [#allocation12]  }
0x251b   :  { %s2473_s20 = sshll.u32 %s3035_s14, 4  ;;  %s2474_s20 = int_to_ptr.vmem [resolvable:$true] %s2473_s20 }
0x252d   :  { %2214 = vperm.xlu2 %2588, %v2210_v38  }
0x2535   :  { %2591 = vset.pattern.permute.xlu2 %v2260_v49 }
0x2578   :  { %v2203_v47 = vpop.xlane.xlu0 %2202 }
0x2579   :  { %v2223_v26 = vperm.slane %v2203_v47, %v2222_v1 }
0x257b   :  { %v2225_v22 = vsel %vm2224_vm12, %v2223_v26, %v2221_v57 }
0x2580   :  { %v2206_v48 = vpop.xlane.xlu1 %2205 }
0x2581   :  { %v2226_v10 = vperm.slane %v2206_v48, %v2212_v14 }
0x2588   :  { %v2209_v52 = vpop.xlane.xlu2 %2208 }
0x2589   :  { %v2227_v63 = vperm.slane %v2209_v52, %v2222_v1 }
0x258b   :  { %v2228_v36 = vsel %vm2224_vm12, %v2227_v63, %v2226_v10 }
0x258c   :  { %v2229_v3 = vsel %vm310_vm9, %v2228_v36, %v2225_v22  ;;  %v2598_v22 = vld [vmem:[%s3835_s11] ss:$0 sm:$0xff] }
0x2590   :  { %v2215_v51 = vpop.permute.xlu2 %2214 }
0x2591   :  { %vm2216_vm14 = vcmp.lt.s32.totalorder %v2212_v14, %v2215_v51 }
0x2592   :  { %v2231_v24 = vsel %vm2216_vm14, %v2229_v3, -1e+30 }
0x2593   :  { %v2233_v54 = vsel %vm2232_vm13, %v2231_v24, -inf }
0x2594   :  { %2234 = vmax.xlane.f32.xlu0 %v2233_v54 }
0x2607   :  { %v2235_v58 = vpop.xlane.xlu0 %2234 }
0x2608   :  { %v2236_v17 = vsub.f32 %v2231_v24, %v2235_v58 }
0x260a   :  { %v2237_v59 = vmul.f32 1.442695, %v2236_v17 }
0x260c   :  { %2800 = vpow2.f32 %v2237_v59 }
0x2612   :  { %v2801_v60 = vpop.eup %2800 }
0x2613   :  { %v2239_v55 = vsel %vm2232_vm13, %v2801_v60, 0.0 }
0x2614   :  { %2240 = vadd.xlane.f32.xlu1 %v2239_v55 }
0x2687   :  { %v2241_v39 = vpop.xlane.xlu1 %2240 }
0x2688   :  { %2802 = vrcp.f32 %v2241_v39  ;;  %v2253_v62 = vand.u32 2147483648, %v2241_v39  ;;  %v2251_v12 = vand.u32 2147483647, %v2241_v39  ;;  %vm2247_vm1 = vweird.f32 %v2241_v39 }
0x268a   :  { %v2254_v44 = vor.u32 1.1754944e-38, %v2253_v62  ;;  %vm2252_vm3 = vcmp.eq.f32.partialorder %v2251_v12, 8.507059e+37 }
0x268e   :  { %v2803_v7 = vpop.eup %2802 }
0x268f   :  { %v2243_v35 = vmul.f32 %v2803_v7, %v2241_v39  ;;  %vm2248_vm15 = vweird.f32 %v2803_v7 }
0x2690   :  { %vm2249_vm2 = vmor %vm2247_vm1, %vm2248_vm15 }
0x2691   :  { %v2244_v61 = vsub.f32 1.0, %v2243_v35 }
0x2693   :  { %v2245_v21 = vmul.f32 %v2803_v7, %v2244_v61 }
0x2695   :  { %v2246_v0 = vadd.f32 %v2803_v7, %v2245_v21 }
0x2697   :  { %v2250_v11 = vsel %vm2249_vm2, %v2803_v7, %v2246_v0 }
0x2698   :  { %v2255_v15 = vsel %vm2252_vm3, %v2254_v44, %v2250_v11 }
0x2699   :  { %v2256_v6 = vmul.f32 %v2801_v60, %v2255_v15 }
0x269b   :  { %v2271_v18 = vperm.slane %v2256_v6, 1  ;;  %2257 = vst.msk [vmem:[#allocation14] sm:$0x3] %vm2232_vm13, %v2256_v6  ;;  %v2258_v19 = vperm.slane %v2256_v6, 0  ;;  %v2411_v6 = vld [vmem:[%s3837_s13 + $0x18] sm:$0xff] }
0x269c   :  { %2433 = vmatpush.msrb.mxu3 %v2411_v6 }
0x269d   :  { %2276 = vperm.xlu2 %2591, %v2271_v18   ;;  %2269 = vperm.xlu1 %2590, %v2258_v19  }
0x269e   :  { %2263 = vperm.xlu0 %2589, %v2258_v19   ;;  %v2409_v19 = vld [vmem:[%s3837_s13 + $0x8] sm:$0xff] }
0x26a5   :  { %2592 = vset.pattern.permute.xlu2 %v2267_v4  ;;  %2392 = vrot.lane.b32.xlu1 %v2597_v33, %s3031_s23 }
0x26a6   :  { %2593 = vset.pattern.permute.xlu0 %v2267_v4 }
0x26ad   :  { %2282 = vperm.xlu2 %2592, %v2271_v18   ;;  %v2410_v18 = vld [vmem:[%s3837_s13 + $0x10] sm:$0xff] }
0x26ae   :  { %2434 = vmatpush.msrb.mxu3 %v2410_v18 }
0x26b0   :  { %2435 = vmatpush.msrb.mxu3 %v2409_v19 }
0x26b2   :  { %2436 = vmatpush.msrb.mxu3 %v2408_v23 }
0x26f7   :  { %v2277_v40 = vpop.permute.xlu2 %2276 }
0x26f8   :  { %v2286_v2 = vmul.f32 %v2277_v40, %v3750_v41 }
0x26fa   :  { %v2297_v25 = vsel %vm145_vm0, %v2286_v2, 0.0 }
0x2707   :  { %v2283_v8 = vpop.permute.xlu2 %2282 }
0x2708   :  { %v2287_v16 = vmul.f32 %v2283_v8, %v3755_v20 }
0x270a   :  { %v2298_v43 = vsel %vm145_vm0, %v2287_v16, 0.0 }
0x270b   :  { %v2299_v56 = vadd.f32 %v2298_v43, %v2297_v25 }
0x270d   :  { %v2300_v5 = vrot.slane %v2299_v56, 4 }
0x270f   :  { %v2270_v42 = vpop.permute.xlu1 %2269  ;;  %v2301_v34 = vadd.f32 %v2300_v5, %v2299_v56 }
0x2710   :  { %v2285_v37 = vmul.f32 %v2270_v42, %v3745_v9  ;;  %v2264_v38 = vpop.permute.xlu0 %2263 }
0x2711   :  { %v2284_v50 = vmul.f32 %v2264_v38, %v3693_v53  ;;  %v2302_v14 = vrot.slane %v2301_v34, 2  ;;  %v2360_v53 = vpop.f32.mrf.mxu2 }
0x2712   :  { %v2289_v45 = vsel %vm145_vm0, %v2285_v37, 0.0 }
0x2713   :  { %v2288_v41 = vsel %vm145_vm0, %v2284_v50, 0.0  ;;  %v2303_v52 = vadd.f32 %v2302_v14, %v2301_v34 }
0x2714   :  { %v2290_v1 = vadd.f32 %v2289_v45, %v2288_v41 }
0x2715   :  { %v2304_v63 = vrot.slane %v2303_v52, 1 }
0x2716   :  { %v2291_v20 = vrot.slane %v2290_v1, 4 }
0x2717   :  { %v2305_v57 = vadd.f32 %v2304_v63, %v2303_v52  ;;  %v2393_v61 = vpop.permute.xlu1 %2392 }
0x2718   :  { %v2292_v47 = vadd.f32 %v2291_v20, %v2290_v1 }
0x271a   :  { %v2293_v48 = vrot.slane %v2292_v47, 2 }
0x271c   :  { %v2294_v26 = vadd.f32 %v2293_v48, %v2292_v47 }
0x271e   :  { %v2295_v10 = vrot.slane %v2294_v26, 1 }
0x2720   :  { %v2296_v36 = vadd.f32 %v2295_v10, %v2294_v26 }
0x2722   :  { %v2317_v9 = vsel %vm310_vm9, %v2305_v57, %v2296_v36 }
0x2723   :  { %2562 = vmatmul.msk.f32.vlgmr.msra.gmra.mxu1 %vm145_vm0, %v2317_v9 }
0x27a0   :  { %v2337_v51 = vpop.f32.mrf.mxu1 }
0x27a1   :  { %v2361_v3 = vadd.f32 %v2360_v53, %v2337_v51 }
0x27a3   :  { %v2367_v24 = vadd.f32 %v2598_v22, %v2361_v3 }
0x27a5   :  { %v2372_v54 = vadd.f32 %v2597_v33, %v2367_v24 }
0x27a7   :  { %v2564_v58 = vmul.f32 -1.442695, %v2372_v54 }
0x27a9   :  { %2804 = vpow2.f32 %v2564_v58 }
0x27af   :  { %v2805_v17 = vpop.eup %2804 }
0x27b0   :  { %v2376_v59 = vadd.f32 1.0, %v2805_v17 }
0x27b2   :  { %2806 = vrcp.f32 %v2376_v59  ;;  %v2388_v4 = vand.u32 2147483648, %v2376_v59  ;;  %v2386_v7 = vand.u32 2147483647, %v2376_v59  ;;  %vm2382_vm4 = vweird.f32 %v2376_v59 }
0x27b4   :  { %v2389_v62 = vor.u32 1.1754944e-38, %v2388_v4  ;;  %vm2387_vm6 = vcmp.eq.f32.partialorder %v2386_v7, 8.507059e+37 }
0x27b8   :  { %v2807_v60 = vpop.eup %2806 }
0x27b9   :  { %v2378_v55 = vmul.f32 %v2807_v60, %v2376_v59  ;;  %vm2383_vm9 = vweird.f32 %v2807_v60 }
0x27ba   :  { %vm2384_vm5 = vmor %vm2382_vm4, %vm2383_vm9 }
0x27bb   :  { %v2379_v49 = vsub.f32 1.0, %v2378_v55 }
0x27bd   :  { %v2380_v39 = vmul.f32 %v2807_v60, %v2379_v49 }
0x27bf   :  { %v2381_v35 = vadd.f32 %v2807_v60, %v2380_v39 }
0x27c1   :  { %v2385_v21 = vsel %vm2384_vm5, %v2807_v60, %v2381_v35 }
0x27c2   :  { %v2390_v12 = vsel %vm2387_vm6, %v2389_v62, %v2385_v21 }
0x27c3   :  { %v2395_v0 = vmul.f32 %v2393_v61, %v2390_v12  ;;  %v2402_v27 = vsub.f32 1.0, %v2390_v12 }
0x27c5   :  { %2397 = vrot.lane.b32.xlu2 %v2395_v0, %s3031_s23 }
0x281f   :  { %v2398_v44 = vpop.permute.xlu2 %2397 }
0x2820   :  { %v2400_v11 = vadd.f32 %v2398_v44, %v2367_v24 }
0x2822   :  { %2808 = vtanh.f32 %v2400_v11 }
0x2828   :  { %v2809_v15 = vpop.eup %2808 }
0x2829   :  { %2404 = vrot.lane.b32.xlu1 %v2809_v15, %s3032_s27 }
0x289b   :  { %v2405_v28 = vpop.permute.xlu1 %2404 }
0x289c   :  { %v2407_v29 = vmul.f32 %v2405_v28, %v2402_v27 }
0x289e   :  { %2417 = vrot.lane.b32.xlu2 %v2407_v29, %s3032_s27 }
0x28f8   :  { %v2418_v30 = vpop.permute.xlu2 %2417 }
0x28f9   :  { %2565 = vmatmul.msk.f32.vlgmr.msrb.gmra.mxu3 %vm145_vm0, %v2418_v30 }
0x297c   :  { %v2438_v32 = vpop.f32.mrf.mxu3 }
0x297d   :  { %v2439_v40 = vadd.f32 %v2599_v31, %v2438_v32 }
0x297f   :  { %v2441_v13 = vsel %vm2232_vm13, %v2439_v40, -inf }
0x2980   :  { %2442 = vmax.xlane.f32.xlu0 %v2441_v13 }
0x29f3   :  { %v2443_v46 = vpop.xlane.xlu0 %2442 }
0x29f4   :  { %v2444_v33 = vsub.f32 %v2439_v40, %v2443_v46 }
0x29f6   :  { %v2445_v2 = vmul.f32 1.442695, %v2444_v33 }
0x29f8   :  { %2810 = vpow2.f32 %v2445_v2 }
0x29fe   :  { %v2811_v8 = vpop.eup %2810 }
0x29ff   :  { %v2447_v16 = vsel %vm2232_vm13, %v2811_v8, 0.0 }
0x2a00   :  { %2448 = vadd.xlane.f32.xlu1 %v2447_v16 }
0x2a73   :  { %v2449_v25 = vpop.xlane.xlu1 %2448 }
0x2a74   :  { %2812 = vlog2.f32 %v2449_v25 }
0x2a7a   :  { %v2813_v43 = vpop.eup %2812 }
0x2a7b   :  { %v2451_v56 = vmul.f32 0.6931472, %v2813_v43 }
0x2a7d   :  { %v2452_v5 = vadd.f32 %v2451_v56, %v2443_v46 }
0x2a7f   :  { %v2453_v42 = vsub.f32 %v2439_v40, %v2452_v5 }
0x2a81   :  { %2454 = vst.msk [vmem:[#allocation12] sm:$0x3] %vm2232_vm13, %v2453_v42 }
0x2a82   :  { %2478 = dma.vmem_to_hbm [thread:$0]  %s2474_s20, 32, %s2476_s2, [#allocation13]  }
0x2a83   :  { %2489 = dma.vmem_to_hbm [thread:$0]  %s2485_s22, 32, %s2487_s24, [#allocation13]  }
0x2a84   :  { %3019 = dma.done.wait [#allocation4], 512  }
0x2a85   :  { %3020 = vsyncadd [#allocation4], 4294966784 }
0x2a86   :  { %3021 = dma.done.wait [#allocation13], 64  }
0x2a87   :  { %3022 = vsyncadd [#allocation13], 4294967232 }
0x2a88   :  { %2502 = vsyncpa [#allocation3], 1 }
0x2a89   :  { %2503 = vsyncpa [#allocation6], 1 }
0x2a8a   :  { %2504 = vsyncpa [#allocation9], 1 }
0x2a8b   :  { %2505 = vsyncpa [#allocation4], 1 }
0x2a8c   :  { %2506 = vsyncpa [#allocation13], 1 }

</bundles_post_ra>
